<compile_context>
chip_gen: v7x
topology: tpu7x:2x2x1
jax: 0.10.0
libtpu: 0.0.40
codegen_flags: <defaults>
</compile_context>

<pallas_src>
import functools

import jax
import jax.numpy as jnp
from jax import lax
from jax.experimental import pallas as pl
from jax.experimental.pallas import tpu as pltpu

LANE = 128                      # channel padding granularity (vreg lane width)
COMPUTE_DTYPE = jnp.bfloat16    # MXU operand dtype (f32 accumulation preserved)
EPS = 1e-5
VMEM_BUDGET = 12 * 1024 * 1024  # working-set target per grid step (fits v7x w/ 2x buffering)
VMEM_LIMIT = 32 * 1024 * 1024   # explicit scoped-VMEM request (safe on v5e/v6e/v7x)


def _round_up(x, m):
    return (x + m - 1) // m * m


# ----------------------------- Pallas kernels ------------------------------

def conv3x3_kernel(x_ref, w_ref, b_ref, scale_ref, shift_ref, y_ref, stats_ref,
                   *, tile_h, img_h, img_w, fuse_input_bn_relu):
    """One (tile_h x img_w) output row-band of a 3x3 SAME convolution.

    x_ref:     (tile_h+2, img_w+2, Cin_p)  zero-padded halo tile (COMPUTE_DTYPE)
    w_ref:     (9*Cin_p, Cout_p)           tap-folded weights    (COMPUTE_DTYPE)
    b_ref:     (1, Cout_p)                 conv bias             (f32)
    scale_ref: (1, Cin_p)                  previous layer's folded BN scale (f32)
    shift_ref: (1, Cin_p)                  previous layer's folded BN shift (f32)
    y_ref:     (tile_h, img_w, Cout_p)     raw conv output       (COMPUTE_DTYPE)
    stats_ref: (8, Cout_p)                 rows 0/1 = per-channel sum / sum-of-squares
    """
    thp, wp = tile_h + 2, img_w + 2
    x = x_ref[...]

    if fuse_input_bn_relu:
        # Previous layer's BN+ReLU applied on the fly (VPU work is free filler under
        # the MXU-bound conv); the zero-padding ring is forced back to 0 afterwards.
        t = pl.program_id(1)
        xa = jnp.maximum(x.astype(jnp.float32) * scale_ref[...] + shift_ref[...], 0.0)
        row = lax.broadcasted_iota(jnp.int32, (thp, wp, 1), 0) + t * tile_h
        col = lax.broadcasted_iota(jnp.int32, (thp, wp, 1), 1)
        interior = (row >= 1) & (row <= img_h) & (col >= 1) & (col <= img_w)
        x = jnp.where(interior, xa, 0.0).astype(x_ref.dtype)

    # Fold the 9 taps into the contraction dim: one big matmul, K = 9*Cin_p.
    taps = [x[dy:dy + tile_h, dx:dx + img_w, :] for dy in range(3) for dx in range(3)]
    tap_mat = jnp.concatenate(taps, axis=-1).reshape(tile_h * img_w, -1)
    acc = jnp.dot(tap_mat, w_ref[...], preferred_element_type=jnp.float32)
    acc = acc + b_ref[...]

    y_ref[...] = acc.reshape(tile_h, img_w, -1).astype(y_ref.dtype)
    # Per-block BN partial statistics (8-row padded block keeps the write aligned).
    stats_ref[...] = jnp.concatenate(
        [jnp.sum(acc, axis=0, keepdims=True),
         jnp.sum(acc * acc, axis=0, keepdims=True),
         jnp.zeros((6, acc.shape[-1]), jnp.float32)], axis=0)


def bn_relu_kernel(y_ref, scale_ref, shift_ref, o_ref):
    """Final folded BatchNorm scale/shift + ReLU (elementwise, lane-dense)."""
    o_ref[...] = jnp.maximum(
        y_ref[...].astype(jnp.float32) * scale_ref[...] + shift_ref[...], 0.0
    ).astype(o_ref.dtype)


# ------------------------------ tiling helpers ------------------------------

def _vmem_bytes(tile_h, w, cin_p, cout_p):
    thp, wp = tile_h + 2, w + 2
    cs = jnp.dtype(COMPUTE_DTYPE).itemsize
    in_tile = thp * wp * cin_p * cs
    out_tile = tile_h * w * cout_p * cs
    weights = 9 * cin_p * cout_p * cs
    stats = 8 * cout_p * 4
    taps = tile_h * w * 9 * cin_p * cs          # in-kernel tap matrix
    acc = tile_h * w * cout_p * 4               # f32 accumulator
    act = thp * wp * cin_p * 4                  # f32 fused-activation temp
    return 2 * (in_tile + out_tile + weights + stats) + taps + acc + act


def choose_tile_h(h, w, cin_p, cout_p, budget=VMEM_BUDGET):
    best = 1
    for th in range(1, h + 1):
        if h % th == 0 and _vmem_bytes(th, w, cin_p, cout_p) <= budget:
            best = th
    return best


# ------------------------------ layer wrappers ------------------------------

def conv3x3_bn_stats(x, w_mat, bias_p, *, tile_h, pre_scale=None, pre_shift=None):
    """x: (N, H, W, Cin_p) channel-padded NHWC in COMPUTE_DTYPE.
    Returns raw conv output (N, H, W, Cout_p) and f32 (sum, sum_sq) stats (2, Cout_p)."""
    N, H, W, cin_p = x.shape
    cout_p = w_mat.shape[-1]
    assert H % tile_h == 0
    T = H // tile_h
    thp, wp = tile_h + 2, W + 2
    fuse = pre_scale is not None

    xp = jnp.pad(x, ((0, 0), (1, 1), (1, 1), (0, 0)))            # spatial zero pad
    if T == 1:
        x_tiles = xp[:, None]                                    # (N, 1, H+2, W+2, C)
    else:
        # Overlapping halo row-bands: duplicates only 2 rows per tile (vs 9x im2col).
        x_tiles = jnp.stack(
            [xp[:, t * tile_h: t * tile_h + thp] for t in range(T)], axis=1)

    if not fuse:
        pre_scale = jnp.ones((cin_p,), jnp.float32)
        pre_shift = jnp.zeros((cin_p,), jnp.float32)

    kernel = functools.partial(conv3x3_kernel, tile_h=tile_h, img_h=H, img_w=W,
                               fuse_input_bn_relu=fuse)

    y_raw, stats = pl.pallas_call(
        kernel,
        out_shape=(jax.ShapeDtypeStruct((N, H, W, cout_p), COMPUTE_DTYPE),
                   jax.ShapeDtypeStruct((N, T, 8, cout_p), jnp.float32)),
        grid=(N, T),
        in_specs=[
            pl.BlockSpec((None, None, thp, wp, cin_p), lambda n, t: (n, t, 0, 0, 0)),
            pl.BlockSpec((9 * cin_p, cout_p), lambda n, t: (0, 0)),
            pl.BlockSpec((1, cout_p), lambda n, t: (0, 0)),
            pl.BlockSpec((1, cin_p), lambda n, t: (0, 0)),
            pl.BlockSpec((1, cin_p), lambda n, t: (0, 0)),
        ],
        out_specs=(
            pl.BlockSpec((None, tile_h, W, cout_p), lambda n, t: (n, t, 0, 0)),
            pl.BlockSpec((None, None, 8, cout_p), lambda n, t: (n, t, 0, 0)),
        ),
        compiler_params=pltpu.CompilerParams(
            dimension_semantics=("parallel", "parallel"),
            vmem_limit_bytes=VMEM_LIMIT),
    )(x_tiles, w_mat, bias_p.reshape(1, cout_p),
      pre_scale.reshape(1, cin_p), pre_shift.reshape(1, cin_p))

    return y_raw, jnp.sum(stats, axis=(0, 1))[:2]


def bn_affine(stats, gamma_p, beta_p, count):
    """Fold training-mode BatchNorm (biased batch variance) into scale/shift."""
    mean = stats[0] / count
    # NOTE: E[x^2]-E[x]^2 in f32 is fine at these magnitudes (see review); guard >= 0.
    var = jnp.maximum(stats[1] / count - mean * mean, 0.0)
    scale = gamma_p / jnp.sqrt(var + EPS)
    shift = beta_p - mean * scale
    return scale, shift


def bn_relu(y_raw, scale, shift, *, tile_h):
    N, H, W, cp = y_raw.shape
    T = H // tile_h
    return pl.pallas_call(
        bn_relu_kernel,
        out_shape=jax.ShapeDtypeStruct((N, H, W, cp), jnp.float32),
        grid=(N, T),
        in_specs=[
            pl.BlockSpec((None, tile_h, W, cp), lambda n, t: (n, t, 0, 0)),
            pl.BlockSpec((1, cp), lambda n, t: (0, 0)),
            pl.BlockSpec((1, cp), lambda n, t: (0, 0)),
        ],
        out_specs=pl.BlockSpec((None, tile_h, W, cp), lambda n, t: (n, t, 0, 0)),
        compiler_params=pltpu.CompilerParams(
            dimension_semantics=("parallel", "parallel"),
            vmem_limit_bytes=VMEM_LIMIT),
    )(y_raw, scale.reshape(1, cp), shift.reshape(1, cp))


def double_conv(x_nchw, p, tile_h=None):
    """Pallas DoubleConv forward (NCHW in / NCHW out, training-mode BatchNorm)."""
    N, in_ch, H, W = x_nchw.shape
    out_ch = p["b1"].shape[0]
    cin_p = _round_up(in_ch, LANE)
    cout_p = _round_up(out_ch, LANE)
    cnt = jnp.float32(N * H * W)

    if tile_h is None:
        tile_h = choose_tile_h(H, W, max(cin_p, cout_p), cout_p)
    assert H % tile_h == 0

    # NCHW -> NHWC, pad channels to the lane boundary, cast MXU operands to bf16.
    # (For real pipelines keep activations NHWC end-to-end and drop these transposes.)
    x = jnp.transpose(x_nchw, (0, 2, 3, 1))
    x = jnp.pad(x, ((0, 0), (0, 0), (0, 0), (0, cin_p - in_ch))).astype(COMPUTE_DTYPE)

    # conv1 (raw output) + batch statistics
    y1, stats1 = conv3x3_bn_stats(x, p["w1_mat"], p["b1_p"], tile_h=tile_h)
    scale1, shift1 = bn_affine(stats1, p["gamma1_p"], p["beta1_p"], cnt)

    # BN1 + ReLU fused into conv2's input path; conv2 (raw output) + batch statistics
    y2, stats2 = conv3x3_bn_stats(y1, p["w2_mat"], p["b2_p"], tile_h=tile_h,
                                  pre_scale=scale1, pre_shift=shift1)
    scale2, shift2 = bn_affine(stats2, p["gamma2_p"], p["beta2_p"], cnt)

    # Final BN2 + ReLU
    out = bn_relu(y2, scale2, shift2, tile_h=tile_h)
    return jnp.transpose(out[..., :out_ch], (0, 3, 1, 2))


# ------------------------- deterministic parameters -------------------------

def _oihw_to_mat(w_oihw, cin_p, cout_p):
    """(Cout, Cin, 3, 3) -> (9*Cin_p, Cout_p), K index = (3*dy+dx)*Cin_p + cin."""
    cout, cin = w_oihw.shape[:2]
    w = jnp.transpose(w_oihw, (2, 3, 1, 0))                       # (3, 3, Cin, Cout)
    w = jnp.pad(w, ((0, 0), (0, 0), (0, cin_p - cin), (0, cout_p - cout)))
    return w.reshape(9 * cin_p, cout_p).astype(COMPUTE_DTYPE)


def _pad_vec(v, cp):
    return jnp.pad(v.astype(jnp.float32), (0, cp - v.shape[0]))


def init_params(key, in_ch, out_ch):
    cin_p, cout_p = _round_up(in_ch, LANE), _round_up(out_ch, LANE)
    k1, k2, k3, k4 = jax.random.split(key, 4)
    w1 = 0.1 * jax.random.normal(k1, (out_ch, in_ch, 3, 3), jnp.float32)   # OIHW
    b1 = 0.1 * jax.random.normal(k2, (out_ch,), jnp.float32)
    w2 = 0.1 * jax.random.normal(k3, (out_ch, out_ch, 3, 3), jnp.float32)
    b2 = 0.1 * jax.random.normal(k4, (out_ch,), jnp.float32)
    g1 = jnp.linspace(0.8, 1.2, out_ch).astype(jnp.float32)
    be1 = jnp.linspace(-0.1, 0.1, out_ch).astype(jnp.float32)
    g2 = jnp.linspace(1.2, 0.8, out_ch).astype(jnp.float32)
    be2 = jnp.linspace(0.1, -0.1, out_ch).astype(jnp.float32)
    return {
        "w1": w1, "b1": b1, "gamma1": g1, "beta1": be1,
        "w2": w2, "b2": b2, "gamma2": g2, "beta2": be2,
        "w1_mat": _oihw_to_mat(w1, cin_p, cout_p), "b1_p": _pad_vec(b1, cout_p),
        "gamma1_p": _pad_vec(g1, cout_p), "beta1_p": _pad_vec(be1, cout_p),
        "w2_mat": _oihw_to_mat(w2, cout_p, cout_p), "b2_p": _pad_vec(b2, cout_p),
        "gamma2_p": _pad_vec(g2, cout_p), "beta2_p": _pad_vec(be2, cout_p),
    }


# ------------------------------ pure-JAX reference --------------------------

def ref_conv_bn_relu(x_nchw, w_oihw, b, gamma, beta, eps=EPS):
    y = lax.conv_general_dilated(x_nchw, w_oihw, window_strides=(1, 1),
                                 padding=((1, 1), (1, 1)),
                                 dimension_numbers=("NCHW", "OIHW", "NCHW"))
    y = y + b[None, :, None, None]
    mean = jnp.mean(y, axis=(0, 2, 3), keepdims=True)
    var = jnp.var(y, axis=(0, 2, 3), keepdims=True)   # biased, like PyTorch BN forward
    y = (y - mean) / jnp.sqrt(var + eps)
    y = y * gamma[None, :, None, None] + beta[None, :, None, None]
    return jnp.maximum(y, 0.0)


if __name__ == "__main__":
    # TODO(synk): BatchNorm2d running_mean/running_var momentum updates are a
    # training-time buffer side effect not represented (they do not affect the output).
    key = jax.random.PRNGKey(0)
    kx, kp = jax.random.split(key)
    N, in_ch, out_ch, H, W = 2, 4, 8, 16, 16

    x = jax.random.normal(kx, (N, in_ch, H, W), jnp.float32)   # NCHW, like PyTorch
    p = init_params(kp, in_ch, out_ch)

    # tile_h=8 -> 2 row tiles per image, exercising halo + border-mask paths.
    fwd = jax.jit(functools.partial(double_conv, tile_h=8))
    out = jax.block_until_ready(fwd(x, p))

    ref = ref_conv_bn_relu(x, p["w1"], p["b1"], p["gamma1"], p["beta1"])
    ref = ref_conv_bn_relu(ref, p["w2"], p["b2"], p["gamma2"], p["beta2"])

    assert out.shape == (N, out_ch, H, W), out.shape
    err = float(jnp.max(jnp.abs(out - ref)))
    # Tolerance reflects bf16 MXU operands (f32 accumulation); real layout/tap bugs
    # would show up as O(0.1..1) errors on these BN-normalized outputs.
    assert err < 6e-2, err
    print("KERNEL_OK")
</pallas_src>

<mosaic_0001>
module attributes {stable_mosaic.version = 11 : i64} {
  func.func @bn_relu_kernel(%arg0: i32, %arg1: i32, %arg2: memref<1x8x16x128xbf16, #tpu.memory_space<vmem>>, %arg3: memref<1x128xf32, #tpu.memory_space<vmem>>, %arg4: memref<1x128xf32, #tpu.memory_space<vmem>>, %arg5: memref<1x8x16x128xf32, #tpu.memory_space<vmem>>) attributes {dimension_semantics = [#tpu.dimension_semantics<parallel>, #tpu.dimension_semantics<parallel>], iteration_bounds = array<i64: 2, 2>, scalar_prefetch = 0 : i64, scratch_operands = 0 : i64, tpu.core_type = #tpu.core_type<tc>, window_params = [{transform_indices = @transform_0, window_bounds = array<i64: 1, 8, 16, 128>}, {pipeline_mode = #tpu.pipeline_mode<synchronous>, transform_indices = @transform_1, window_bounds = array<i64: 1, 128>}, {pipeline_mode = #tpu.pipeline_mode<synchronous>, transform_indices = @transform_2, window_bounds = array<i64: 1, 128>}, {transform_indices = @transform_3, window_bounds = array<i64: 1, 8, 16, 128>}]} {
    %c0 = arith.constant 0 : index
    %c0_0 = arith.constant 0 : index
    %c0_1 = arith.constant 0 : index
    %c0_2 = arith.constant 0 : index
    %0 = vector.load %arg2[%c0, %c0_0, %c0_1, %c0_2] : memref<1x8x16x128xbf16, #tpu.memory_space<vmem>>, vector<1x8x16x128xbf16>
    %1 = vector.shape_cast %0 : vector<1x8x16x128xbf16> to vector<8x16x128xbf16>
    %2 = arith.extf %1 : vector<8x16x128xbf16> to vector<8x16x128xf32>
    %c0_3 = arith.constant 0 : index
    %c0_4 = arith.constant 0 : index
    %3 = vector.load %arg3[%c0_3, %c0_4] : memref<1x128xf32, #tpu.memory_space<vmem>>, vector<1x128xf32>
    %4 = vector.shape_cast %3 : vector<1x128xf32> to vector<1x1x128xf32>
    %5 = vector.broadcast %4 : vector<1x1x128xf32> to vector<8x16x128xf32>
    %6 = arith.mulf %2, %5 : vector<8x16x128xf32>
    %c0_5 = arith.constant 0 : index
    %c0_6 = arith.constant 0 : index
    %7 = vector.load %arg4[%c0_5, %c0_6] : memref<1x128xf32, #tpu.memory_space<vmem>>, vector<1x128xf32>
    %8 = vector.shape_cast %7 : vector<1x128xf32> to vector<1x1x128xf32>
    %9 = vector.broadcast %8 : vector<1x1x128xf32> to vector<8x16x128xf32>
    %10 = arith.addf %6, %9 : vector<8x16x128xf32>
    %cst = arith.constant 0.000000e+00 : f32
    %11 = vector.broadcast %cst : f32 to vector<8x16x128xf32>
    %12 = arith.maximumf %10, %11 : vector<8x16x128xf32>
    %c0_7 = arith.constant 0 : index
    %c0_8 = arith.constant 0 : index
    %c0_9 = arith.constant 0 : index
    %c0_10 = arith.constant 0 : index
    %13 = vector.load %arg5[%c0_7, %c0_8, %c0_9, %c0_10] : memref<1x8x16x128xf32, #tpu.memory_space<vmem>>, vector<1x8x16x128xf32>
    %14 = vector.shape_cast %13 : vector<1x8x16x128xf32> to vector<8x16x128xf32>
    %15 = vector.shape_cast %12 : vector<8x16x128xf32> to vector<1x8x16x128xf32>
    tpu.vector_store %arg5[%c0_7, %c0_8, %c0_9, %c0_10], %15 {strides = array<i32>} : memref<1x8x16x128xf32, #tpu.memory_space<vmem>>, vector<1x8x16x128xf32>,
    return
  }
  func.func @transform_0(%arg0: i32, %arg1: i32) -> (i32, i32, i32, i32) {
    %c0_i32 = arith.constant 0 : i32
    %c0_i32_0 = arith.constant 0 : i32
    %c0_i32_1 = arith.constant 0 : i32
    return %arg0, %arg1, %c0_i32, %c0_i32_0 : i32, i32, i32, i32
  }
  func.func @transform_1(%arg0: i32, %arg1: i32) -> (i32, i32) {
    %c0_i32 = arith.constant 0 : i32
    %c0_i32_0 = arith.constant 0 : i32
    %c0_i32_1 = arith.constant 0 : i32
    return %c0_i32, %c0_i32_0 : i32, i32
  }
  func.func @transform_2(%arg0: i32, %arg1: i32) -> (i32, i32) {
    %c0_i32 = arith.constant 0 : i32
    %c0_i32_0 = arith.constant 0 : i32
    %c0_i32_1 = arith.constant 0 : i32
    return %c0_i32, %c0_i32_0 : i32, i32
  }
  func.func @transform_3(%arg0: i32, %arg1: i32) -> (i32, i32, i32, i32) {
    %c0_i32 = arith.constant 0 : i32
    %c0_i32_0 = arith.constant 0 : i32
    %c0_i32_1 = arith.constant 0 : i32
    return %arg0, %arg1, %c0_i32, %c0_i32_0 : i32, i32, i32, i32
  }
}

module attributes {stable_mosaic.version = 11 : i64} {
  func.func @conv3x3_kernel(%arg0: i32, %arg1: i32, %arg2: memref<1x1x10x18x128xbf16, #tpu.memory_space<vmem>>, %arg3: memref<1152x128xbf16, #tpu.memory_space<vmem>>, %arg4: memref<1x128xf32, #tpu.memory_space<vmem>>, %arg5: memref<1x128xf32, #tpu.memory_space<vmem>>, %arg6: memref<1x128xf32, #tpu.memory_space<vmem>>, %arg7: memref<1x8x16x128xbf16, #tpu.memory_space<vmem>>, %arg8: memref<1x1x8x128xf32, #tpu.memory_space<vmem>>) attributes {dimension_semantics = [#tpu.dimension_semantics<parallel>, #tpu.dimension_semantics<parallel>], iteration_bounds = array<i64: 2, 2>, scalar_prefetch = 0 : i64, scratch_operands = 0 : i64, tpu.core_type = #tpu.core_type<tc>, window_params = [{transform_indices = @transform_0, window_bounds = array<i64: 1, 1, 10, 18, 128>}, {pipeline_mode = #tpu.pipeline_mode<synchronous>, transform_indices = @transform_1, window_bounds = array<i64: 1152, 128>}, {pipeline_mode = #tpu.pipeline_mode<synchronous>, transform_indices = @transform_2, window_bounds = array<i64: 1, 128>}, {pipeline_mode = #tpu.pipeline_mode<synchronous>, transform_indices = @transform_3, window_bounds = array<i64: 1, 128>}, {pipeline_mode = #tpu.pipeline_mode<synchronous>, transform_indices = @transform_4, window_bounds = array<i64: 1, 128>}, {transform_indices = @transform_5, window_bounds = array<i64: 1, 8, 16, 128>}, {transform_indices = @transform_6, window_bounds = array<i64: 1, 1, 8, 128>}]} {
    %c0 = arith.constant 0 : index
    %c0_0 = arith.constant 0 : index
    %c0_1 = arith.constant 0 : index
    %c0_2 = arith.constant 0 : index
    %c0_3 = arith.constant 0 : index
    %0 = vector.load %arg2[%c0, %c0_0, %c0_1, %c0_2, %c0_3] : memref<1x1x10x18x128xbf16, #tpu.memory_space<vmem>>, vector<1x1x10x18x128xbf16>
    %1 = vector.shape_cast %0 : vector<1x1x10x18x128xbf16> to vector<10x18x128xbf16>
    %2 = vector.extract_strided_slice %1 {offsets = [0, 0, 0], sizes = [8, 16, 128], strides = [1, 1, 1]} : vector<10x18x128xbf16> to vector<8x16x128xbf16>
    %3 = vector.extract_strided_slice %1 {offsets = [0, 1, 0], sizes = [8, 16, 128], strides = [1, 1, 1]} : vector<10x18x128xbf16> to vector<8x16x128xbf16>
    %4 = vector.extract_strided_slice %1 {offsets = [0, 2, 0], sizes = [8, 16, 128], strides = [1, 1, 1]} : vector<10x18x128xbf16> to vector<8x16x128xbf16>
    %5 = vector.extract_strided_slice %1 {offsets = [1, 0, 0], sizes = [8, 16, 128], strides = [1, 1, 1]} : vector<10x18x128xbf16> to vector<8x16x128xbf16>
    %6 = vector.extract_strided_slice %1 {offsets = [1, 1, 0], sizes = [8, 16, 128], strides = [1, 1, 1]} : vector<10x18x128xbf16> to vector<8x16x128xbf16>
    %7 = vector.extract_strided_slice %1 {offsets = [1, 2, 0], sizes = [8, 16, 128], strides = [1, 1, 1]} : vector<10x18x128xbf16> to vector<8x16x128xbf16>
    %8 = vector.extract_strided_slice %1 {offsets = [2, 0, 0], sizes = [8, 16, 128], strides = [1, 1, 1]} : vector<10x18x128xbf16> to vector<8x16x128xbf16>
    %9 = vector.extract_strided_slice %1 {offsets = [2, 1, 0], sizes = [8, 16, 128], strides = [1, 1, 1]} : vector<10x18x128xbf16> to vector<8x16x128xbf16>
    %10 = vector.extract_strided_slice %1 {offsets = [2, 2, 0], sizes = [8, 16, 128], strides = [1, 1, 1]} : vector<10x18x128xbf16> to vector<8x16x128xbf16>
    %11 = tpu.concatenate %2, %3, %4, %5, %6, %7, %8, %9, %10 in 2 : vector<8x16x128xbf16>, vector<8x16x128xbf16>, vector<8x16x128xbf16>, vector<8x16x128xbf16>, vector<8x16x128xbf16>, vector<8x16x128xbf16>, vector<8x16x128xbf16>, vector<8x16x128xbf16>, vector<8x16x128xbf16> -> vector<8x16x1152xbf16>
    %12 = vector.shape_cast %11 : vector<8x16x1152xbf16> to vector<128x1152xbf16>
    %c0_4 = arith.constant 0 : index
    %c0_5 = arith.constant 0 : index
    %13 = vector.load %arg3[%c0_4, %c0_5] : memref<1152x128xbf16, #tpu.memory_space<vmem>>, vector<1152x128xbf16>
    %cst = arith.constant dense<0.000000e+00> : vector<128x128xf32>
    %14 = tpu.matmul %12, %13, %cst {dimension_numbers = #tpu.dot_dimension_numbers<[1], [0], [0], [1], [0, 0, 1, 1], [], []>} : vector<128x1152xbf16>, vector<1152x128xbf16>, vector<128x128xf32> -> vector<128x128xf32>
    %c0_6 = arith.constant 0 : index
    %c0_7 = arith.constant 0 : index
    %15 = vector.load %arg4[%c0_6, %c0_7] : memref<1x128xf32, #tpu.memory_space<vmem>>, vector<1x128xf32>
    %16 = vector.broadcast %15 : vector<1x128xf32> to vector<128x128xf32>
    %17 = arith.addf %14, %16 : vector<128x128xf32>
    %18 = vector.shape_cast %17 : vector<128x128xf32> to vector<8x16x128xf32>
    %19 = arith.truncf %18 : vector<8x16x128xf32> to vector<8x16x128xbf16>
    %c0_8 = arith.constant 0 : index
    %c0_9 = arith.constant 0 : index
    %c0_10 = arith.constant 0 : index
    %c0_11 = arith.constant 0 : index
    %20 = vector.load %arg7[%c0_8, %c0_9, %c0_10, %c0_11] : memref<1x8x16x128xbf16, #tpu.memory_space<vmem>>, vector<1x8x16x128xbf16>
    %21 = vector.shape_cast %20 : vector<1x8x16x128xbf16> to vector<8x16x128xbf16>
    %22 = vector.shape_cast %19 : vector<8x16x128xbf16> to vector<1x8x16x128xbf16>
    tpu.vector_store %arg7[%c0_8, %c0_9, %c0_10, %c0_11], %22 {strides = array<i32>} : memref<1x8x16x128xbf16, #tpu.memory_space<vmem>>, vector<1x8x16x128xbf16>,
    %cst_12 = arith.constant dense<0.000000e+00> : vector<128xf32>
    %23 = vector.multi_reduction <add>, %17, %cst_12 [0] : vector<128x128xf32> to vector<128xf32>
    %24 = vector.shape_cast %23 : vector<128xf32> to vector<1x128xf32>
    %25 = arith.mulf %17, %17 : vector<128x128xf32>
    %cst_13 = arith.constant dense<0.000000e+00> : vector<128xf32>
    %26 = vector.multi_reduction <add>, %25, %cst_13 [0] : vector<128x128xf32> to vector<128xf32>
    %27 = vector.shape_cast %26 : vector<128xf32> to vector<1x128xf32>
    %cst_14 = arith.constant 0.000000e+00 : f32
    %28 = vector.broadcast %cst_14 : f32 to vector<6x128xf32>
    %29 = tpu.concatenate %24, %27, %28 in 0 : vector<1x128xf32>, vector<1x128xf32>, vector<6x128xf32> -> vector<8x128xf32>
    %c0_15 = arith.constant 0 : index
    %c0_16 = arith.constant 0 : index
    %c0_17 = arith.constant 0 : index
    %c0_18 = arith.constant 0 : index
    %30 = vector.load %arg8[%c0_15, %c0_16, %c0_17, %c0_18] : memref<1x1x8x128xf32, #tpu.memory_space<vmem>>, vector<1x1x8x128xf32>
    %31 = vector.shape_cast %30 : vector<1x1x8x128xf32> to vector<8x128xf32>
    %32 = vector.shape_cast %29 : vector<8x128xf32> to vector<1x1x8x128xf32>
    tpu.vector_store %arg8[%c0_15, %c0_16, %c0_17, %c0_18], %32 {strides = array<i32>} : memref<1x1x8x128xf32, #tpu.memory_space<vmem>>, vector<1x1x8x128xf32>,
    return
  }
  func.func @transform_0(%arg0: i32, %arg1: i32) -> (i32, i32, i32, i32, i32) {
    %c0_i32 = arith.constant 0 : i32
    %c0_i32_0 = arith.constant 0 : i32
    %c0_i32_1 = arith.constant 0 : i32
    %c0_i32_2 = arith.constant 0 : i32
    return %arg0, %arg1, %c0_i32, %c0_i32_0, %c0_i32_1 : i32, i32, i32, i32, i32
  }
  func.func @transform_1(%arg0: i32, %arg1: i32) -> (i32, i32) {
    %c0_i32 = arith.constant 0 : i32
    %c0_i32_0 = arith.constant 0 : i32
    %c0_i32_1 = arith.constant 0 : i32
    return %c0_i32, %c0_i32_0 : i32, i32
  }
  func.func @transform_2(%arg0: i32, %arg1: i32) -> (i32, i32) {
    %c0_i32 = arith.constant 0 : i32
    %c0_i32_0 = arith.constant 0 : i32
    %c0_i32_1 = arith.constant 0 : i32
    return %c0_i32, %c0_i32_0 : i32, i32
  }
  func.func @transform_3(%arg0: i32, %arg1: i32) -> (i32, i32) {
    %c0_i32 = arith.constant 0 : i32
    %c0_i32_0 = arith.constant 0 : i32
    %c0_i32_1 = arith.constant 0 : i32
    return %c0_i32, %c0_i32_0 : i32, i32
  }
  func.func @transform_4(%arg0: i32, %arg1: i32) -> (i32, i32) {
    %c0_i32 = arith.constant 0 : i32
    %c0_i32_0 = arith.constant 0 : i32
    %c0_i32_1 = arith.constant 0 : i32
    return %c0_i32, %c0_i32_0 : i32, i32
  }
  func.func @transform_5(%arg0: i32, %arg1: i32) -> (i32, i32, i32, i32) {
    %c0_i32 = arith.constant 0 : i32
    %c0_i32_0 = arith.constant 0 : i32
    %c0_i32_1 = arith.constant 0 : i32
    return %arg0, %arg1, %c0_i32, %c0_i32_0 : i32, i32, i32, i32
  }
  func.func @transform_6(%arg0: i32, %arg1: i32) -> (i32, i32, i32, i32) {
    %c0_i32 = arith.constant 0 : i32
    %c0_i32_0 = arith.constant 0 : i32
    %c0_i32_1 = arith.constant 0 : i32
    return %arg0, %arg1, %c0_i32, %c0_i32_0 : i32, i32, i32, i32
  }
}

module attributes {stable_mosaic.version = 11 : i64} {
  func.func @conv3x3_kernel(%arg0: i32, %arg1: i32, %arg2: memref<1x1x10x18x128xbf16, #tpu.memory_space<vmem>>, %arg3: memref<1152x128xbf16, #tpu.memory_space<vmem>>, %arg4: memref<1x128xf32, #tpu.memory_space<vmem>>, %arg5: memref<1x128xf32, #tpu.memory_space<vmem>>, %arg6: memref<1x128xf32, #tpu.memory_space<vmem>>, %arg7: memref<1x8x16x128xbf16, #tpu.memory_space<vmem>>, %arg8: memref<1x1x8x128xf32, #tpu.memory_space<vmem>>) attributes {dimension_semantics = [#tpu.dimension_semantics<parallel>, #tpu.dimension_semantics<parallel>], iteration_bounds = array<i64: 2, 2>, scalar_prefetch = 0 : i64, scratch_operands = 0 : i64, tpu.core_type = #tpu.core_type<tc>, window_params = [{transform_indices = @transform_0, window_bounds = array<i64: 1, 1, 10, 18, 128>}, {pipeline_mode = #tpu.pipeline_mode<synchronous>, transform_indices = @transform_1, window_bounds = array<i64: 1152, 128>}, {pipeline_mode = #tpu.pipeline_mode<synchronous>, transform_indices = @transform_2, window_bounds = array<i64: 1, 128>}, {pipeline_mode = #tpu.pipeline_mode<synchronous>, transform_indices = @transform_3, window_bounds = array<i64: 1, 128>}, {pipeline_mode = #tpu.pipeline_mode<synchronous>, transform_indices = @transform_4, window_bounds = array<i64: 1, 128>}, {transform_indices = @transform_5, window_bounds = array<i64: 1, 8, 16, 128>}, {transform_indices = @transform_6, window_bounds = array<i64: 1, 1, 8, 128>}]} {
    %c0 = arith.constant 0 : index
    %c0_0 = arith.constant 0 : index
    %c0_1 = arith.constant 0 : index
    %c0_2 = arith.constant 0 : index
    %c0_3 = arith.constant 0 : index
    %0 = vector.load %arg2[%c0, %c0_0, %c0_1, %c0_2, %c0_3] : memref<1x1x10x18x128xbf16, #tpu.memory_space<vmem>>, vector<1x1x10x18x128xbf16>
    %1 = vector.shape_cast %0 : vector<1x1x10x18x128xbf16> to vector<10x18x128xbf16>
    %2 = arith.extf %1 : vector<10x18x128xbf16> to vector<10x18x128xf32>
    %c0_4 = arith.constant 0 : index
    %c0_5 = arith.constant 0 : index
    %3 = vector.load %arg5[%c0_4, %c0_5] : memref<1x128xf32, #tpu.memory_space<vmem>>, vector<1x128xf32>
    %4 = vector.shape_cast %3 : vector<1x128xf32> to vector<1x1x128xf32>
    %5 = vector.broadcast %4 : vector<1x1x128xf32> to vector<10x18x128xf32>
    %6 = arith.mulf %2, %5 : vector<10x18x128xf32>
    %c0_6 = arith.constant 0 : index
    %c0_7 = arith.constant 0 : index
    %7 = vector.load %arg6[%c0_6, %c0_7] : memref<1x128xf32, #tpu.memory_space<vmem>>, vector<1x128xf32>
    %8 = vector.shape_cast %7 : vector<1x128xf32> to vector<1x1x128xf32>
    %9 = vector.broadcast %8 : vector<1x1x128xf32> to vector<10x18x128xf32>
    %10 = arith.addf %6, %9 : vector<10x18x128xf32>
    %cst = arith.constant 0.000000e+00 : f32
    %11 = vector.broadcast %cst : f32 to vector<10x18x128xf32>
    %12 = arith.maximumf %10, %11 : vector<10x18x128xf32>
    %13 = tpu.iota {dimensions = array<i32: 0>} : vector<10x18x1xi32>
    %c8_i32 = arith.constant 8 : i32
    %14 = arith.muli %arg1, %c8_i32 : i32
    %15 = vector.broadcast %14 : i32 to vector<10x18x1xi32>
    %16 = arith.addi %13, %15 : vector<10x18x1xi32>
    %17 = tpu.iota {dimensions = array<i32: 1>} : vector<10x18x1xi32>
    %c1_i32 = arith.constant 1 : i32
    %18 = vector.broadcast %c1_i32 : i32 to vector<10x18x1xi32>
    %19 = arith.cmpi sge, %16, %18 : vector<10x18x1xi32>
    %c16_i32 = arith.constant 16 : i32
    %20 = vector.broadcast %c16_i32 : i32 to vector<10x18x1xi32>
    %21 = arith.cmpi sle, %16, %20 : vector<10x18x1xi32>
    %22 = arith.andi %19, %21 : vector<10x18x1xi1>
    %c1_i32_8 = arith.constant 1 : i32
    %23 = vector.broadcast %c1_i32_8 : i32 to vector<10x18x1xi32>
    %24 = arith.cmpi sge, %17, %23 : vector<10x18x1xi32>
    %25 = arith.andi %22, %24 : vector<10x18x1xi1>
    %c16_i32_9 = arith.constant 16 : i32
    %26 = vector.broadcast %c16_i32_9 : i32 to vector<10x18x1xi32>
    %27 = arith.cmpi sle, %17, %26 : vector<10x18x1xi32>
    %28 = arith.andi %25, %27 : vector<10x18x1xi1>
    %cst_10 = arith.constant 0.000000e+00 : f32
    %29 = vector.shape_cast %28 : vector<10x18x1xi1> to vector<10x18x1xi1>
    %30 = vector.broadcast %29 : vector<10x18x1xi1> to vector<10x18x128xi1>
    %31 = vector.broadcast %cst_10 : f32 to vector<10x18x128xf32>
    %32 = arith.select %30, %12, %31 : vector<10x18x128xi1>, vector<10x18x128xf32>
    %33 = arith.truncf %32 : vector<10x18x128xf32> to vector<10x18x128xbf16>
    %34 = vector.extract_strided_slice %33 {offsets = [0, 0, 0], sizes = [8, 16, 128], strides = [1, 1, 1]} : vector<10x18x128xbf16> to vector<8x16x128xbf16>
    %35 = vector.extract_strided_slice %33 {offsets = [0, 1, 0], sizes = [8, 16, 128], strides = [1, 1, 1]} : vector<10x18x128xbf16> to vector<8x16x128xbf16>
    %36 = vector.extract_strided_slice %33 {offsets = [0, 2, 0], sizes = [8, 16, 128], strides = [1, 1, 1]} : vector<10x18x128xbf16> to vector<8x16x128xbf16>
    %37 = vector.extract_strided_slice %33 {offsets = [1, 0, 0], sizes = [8, 16, 128], strides = [1, 1, 1]} : vector<10x18x128xbf16> to vector<8x16x128xbf16>
    %38 = vector.extract_strided_slice %33 {offsets = [1, 1, 0], sizes = [8, 16, 128], strides = [1, 1, 1]} : vector<10x18x128xbf16> to vector<8x16x128xbf16>
    %39 = vector.extract_strided_slice %33 {offsets = [1, 2, 0], sizes = [8, 16, 128], strides = [1, 1, 1]} : vector<10x18x128xbf16> to vector<8x16x128xbf16>
    %40 = vector.extract_strided_slice %33 {offsets = [2, 0, 0], sizes = [8, 16, 128], strides = [1, 1, 1]} : vector<10x18x128xbf16> to vector<8x16x128xbf16>
    %41 = vector.extract_strided_slice %33 {offsets = [2, 1, 0], sizes = [8, 16, 128], strides = [1, 1, 1]} : vector<10x18x128xbf16> to vector<8x16x128xbf16>
    %42 = vector.extract_strided_slice %33 {offsets = [2, 2, 0], sizes = [8, 16, 128], strides = [1, 1, 1]} : vector<10x18x128xbf16> to vector<8x16x128xbf16>
    %43 = tpu.concatenate %34, %35, %36, %37, %38, %39, %40, %41, %42 in 2 : vector<8x16x128xbf16>, vector<8x16x128xbf16>, vector<8x16x128xbf16>, vector<8x16x128xbf16>, vector<8x16x128xbf16>, vector<8x16x128xbf16>, vector<8x16x128xbf16>, vector<8x16x128xbf16>, vector<8x16x128xbf16> -> vector<8x16x1152xbf16>
    %44 = vector.shape_cast %43 : vector<8x16x1152xbf16> to vector<128x1152xbf16>
    %c0_11 = arith.constant 0 : index
    %c0_12 = arith.constant 0 : index
    %45 = vector.load %arg3[%c0_11, %c0_12] : memref<1152x128xbf16, #tpu.memory_space<vmem>>, vector<1152x128xbf16>
    %cst_13 = arith.constant dense<0.000000e+00> : vector<128x128xf32>
    %46 = tpu.matmul %44, %45, %cst_13 {dimension_numbers = #tpu.dot_dimension_numbers<[1], [0], [0], [1], [0, 0, 1, 1], [], []>} : vector<128x1152xbf16>, vector<1152x128xbf16>, vector<128x128xf32> -> vector<128x128xf32>
    %c0_14 = arith.constant 0 : index
    %c0_15 = arith.constant 0 : index
    %47 = vector.load %arg4[%c0_14, %c0_15] : memref<1x128xf32, #tpu.memory_space<vmem>>, vector<1x128xf32>
    %48 = vector.broadcast %47 : vector<1x128xf32> to vector<128x128xf32>
    %49 = arith.addf %46, %48 : vector<128x128xf32>
    %50 = vector.shape_cast %49 : vector<128x128xf32> to vector<8x16x128xf32>
    %51 = arith.truncf %50 : vector<8x16x128xf32> to vector<8x16x128xbf16>
    %c0_16 = arith.constant 0 : index
    %c0_17 = arith.constant 0 : index
    %c0_18 = arith.constant 0 : index
    %c0_19 = arith.constant 0 : index
    %52 = vector.load %arg7[%c0_16, %c0_17, %c0_18, %c0_19] : memref<1x8x16x128xbf16, #tpu.memory_space<vmem>>, vector<1x8x16x128xbf16>
    %53 = vector.shape_cast %52 : vector<1x8x16x128xbf16> to vector<8x16x128xbf16>
    %54 = vector.shape_cast %51 : vector<8x16x128xbf16> to vector<1x8x16x128xbf16>
    tpu.vector_store %arg7[%c0_16, %c0_17, %c0_18, %c0_19], %54 {strides = array<i32>} : memref<1x8x16x128xbf16, #tpu.memory_space<vmem>>, vector<1x8x16x128xbf16>,
    %cst_20 = arith.constant dense<0.000000e+00> : vector<128xf32>
    %55 = vector.multi_reduction <add>, %49, %cst_20 [0] : vector<128x128xf32> to vector<128xf32>
    %56 = vector.shape_cast %55 : vector<128xf32> to vector<1x128xf32>
    %57 = arith.mulf %49, %49 : vector<128x128xf32>
    %cst_21 = arith.constant dense<0.000000e+00> : vector<128xf32>
    %58 = vector.multi_reduction <add>, %57, %cst_21 [0] : vector<128x128xf32> to vector<128xf32>
    %59 = vector.shape_cast %58 : vector<128xf32> to vector<1x128xf32>
    %cst_22 = arith.constant 0.000000e+00 : f32
    %60 = vector.broadcast %cst_22 : f32 to vector<6x128xf32>
    %61 = tpu.concatenate %56, %59, %60 in 0 : vector<1x128xf32>, vector<1x128xf32>, vector<6x128xf32> -> vector<8x128xf32>
    %c0_23 = arith.constant 0 : index
    %c0_24 = arith.constant 0 : index
    %c0_25 = arith.constant 0 : index
    %c0_26 = arith.constant 0 : index
    %62 = vector.load %arg8[%c0_23, %c0_24, %c0_25, %c0_26] : memref<1x1x8x128xf32, #tpu.memory_space<vmem>>, vector<1x1x8x128xf32>
    %63 = vector.shape_cast %62 : vector<1x1x8x128xf32> to vector<8x128xf32>
    %64 = vector.shape_cast %61 : vector<8x128xf32> to vector<1x1x8x128xf32>
    tpu.vector_store %arg8[%c0_23, %c0_24, %c0_25, %c0_26], %64 {strides = array<i32>} : memref<1x1x8x128xf32, #tpu.memory_space<vmem>>, vector<1x1x8x128xf32>,
    return
  }
  func.func @transform_0(%arg0: i32, %arg1: i32) -> (i32, i32, i32, i32, i32) {
    %c0_i32 = arith.constant 0 : i32
    %c0_i32_0 = arith.constant 0 : i32
    %c0_i32_1 = arith.constant 0 : i32
    %c0_i32_2 = arith.constant 0 : i32
    return %arg0, %arg1, %c0_i32, %c0_i32_0, %c0_i32_1 : i32, i32, i32, i32, i32
  }
  func.func @transform_1(%arg0: i32, %arg1: i32) -> (i32, i32) {
    %c0_i32 = arith.constant 0 : i32
    %c0_i32_0 = arith.constant 0 : i32
    %c0_i32_1 = arith.constant 0 : i32
    return %c0_i32, %c0_i32_0 : i32, i32
  }
  func.func @transform_2(%arg0: i32, %arg1: i32) -> (i32, i32) {
    %c0_i32 = arith.constant 0 : i32
    %c0_i32_0 = arith.constant 0 : i32
    %c0_i32_1 = arith.constant 0 : i32
    return %c0_i32, %c0_i32_0 : i32, i32
  }
  func.func @transform_3(%arg0: i32, %arg1: i32) -> (i32, i32) {
    %c0_i32 = arith.constant 0 : i32
    %c0_i32_0 = arith.constant 0 : i32
    %c0_i32_1 = arith.constant 0 : i32
    return %c0_i32, %c0_i32_0 : i32, i32
  }
  func.func @transform_4(%arg0: i32, %arg1: i32) -> (i32, i32) {
    %c0_i32 = arith.constant 0 : i32
    %c0_i32_0 = arith.constant 0 : i32
    %c0_i32_1 = arith.constant 0 : i32
    return %c0_i32, %c0_i32_0 : i32, i32
  }
  func.func @transform_5(%arg0: i32, %arg1: i32) -> (i32, i32, i32, i32) {
    %c0_i32 = arith.constant 0 : i32
    %c0_i32_0 = arith.constant 0 : i32
    %c0_i32_1 = arith.constant 0 : i32
    return %arg0, %arg1, %c0_i32, %c0_i32_0 : i32, i32, i32, i32
  }
  func.func @transform_6(%arg0: i32, %arg1: i32) -> (i32, i32, i32, i32) {
    %c0_i32 = arith.constant 0 : i32
    %c0_i32_0 = arith.constant 0 : i32
    %c0_i32_1 = arith.constant 0 : i32
    return %arg0, %arg1, %c0_i32, %c0_i32_0 : i32, i32, i32, i32
  }
}

</mosaic_0001>

<bundles_post_ra>
// kernel: double_conv.5
= control target key start
LH: loop header
LB: loop body
LE: loop exit
PB: predicated region body
PF: predicated region fallthrough
CT: control target
= control target key end

     0   :  { %s580_s12 = smov 0   ;;  %s582_s13 = smov 0   ;;  %s705_s0 = inlined_call_operand.vmem [shape: bf16[2,16,16,128], index: 0, kind: input, shape index: {}]   ;;  %s706_s1 = inlined_call_operand.vmem [shape: f32[1,128], index: 1, kind: input, shape index: {}]   ;;  %s707_s2 = inlined_call_operand.vmem [shape: f32[1,128], index: 2, kind: input, shape index: {}]   ;;  %s708_s3 = inlined_call_operand.vmem [shape: f32[2,16,16,128], index: 3, kind: output, shape index: {}]  }
   0x1   :  { %s584_s14 = smov 0   ;;  %s586_s15 = smov 0  }
   0x2   :  { %s588_s16 = smov 0  }
   0x3 LB: > { %s22_s17 = sadd.s32 1, %s550_s14  ;;  %s25_s18 = sadd.s32 1, %s554_s15  ;;  %s558_s16 = sphi %s588_s16, %s13_s16   ;;  %s554_s15 = sphi %s586_s15, %s712_s15   ;;  %s550_s14 = sphi %s584_s14, %s711_s14   ;;  %s546_s13 = sphi %s582_s13, %s710_s13   ;;  %s542_s12 = sphi %s580_s12, %s709_s12  }
   0x4   : > { %p23_p0 = scmp.ge.s32.totalorder %s22_s17, 2  ;;  %p428_p1 = scmp.ge.s32.totalorder %s558_s16, 1 }
   0x5   : > { %p159_p2 = scmp.lt.s32.totalorder %s558_s16, 5 }
   0x6   : > { %s714_s17 = smov (%p23_p0, %s22_s17), 0  ;;  %s716_s18 = smov (!%p23_p0, %s25_s18), %s554_s15 }
   0x7   : > { %p160_p3 = pnand %p428_p1, %p159_p2  ;;  %p27_p4 = scmp.ge.s32.totalorder %s716_s18, 2 }
   0x8   : > { %s429_s19 = sshll.u32 (!%p160_p3), %s542_s12, 3  ;;  %p194_p5 = scmp.lt.s32.totalorder (!%p160_p3), %s546_s13, 1  ;;  %v621_v0 = vld [vmem:[%s706_s1] ss:$0 sm:$0xff] (!%p160_p3) }
   0x9   : > { %s718_s18 = smov (%p27_p4, %s716_s18), 0  ;;  %163 = sbr.rel (%p160_p3) target bundleno = 42 (0x2a), region = 32 }
   0xa   : > { %p196_p6 = scmp.lt.s32.totalorder (!%p160_p3), %s429_s19, 15  ;;  %v630_v9 = vld [vmem:[%s707_s2] ss:$0 sm:$0xff] (!%p160_p3) }
  0x10   : > { %s720_s13 = smov (!%p194_p5, %s546_s13), 1  ;;  %s722_s19 = smov (!%p196_p6, %s429_s19), 15 }
  0x11   : > { %s431_s20 = sshll.u32 %s720_s13, 5  ;;  %s430_s21 = sshll.u32 %s722_s19, 1 }
  0x12   : > { %s610_s22 = sadd.s32 %s431_s20, %s430_s21 }
  0x13   : > { %s432_s23 = sshll.u32 %s610_s22, 2  ;;  %s436_s4 = sshll.u32 %s610_s22, 3 }
  0x14   : > { %s616_s26 = scalar_lea.vmem %s705_s0, %s432_s23  ;;  %s648_s7 = scalar_lea.vmem %s708_s3, %s436_s4 }
  0x15   : > { %v442_v1 = vld [vmem:[%s616_s26] sm:$0xff]   ;;  %v473_v2 = vld [vmem:[%s616_s26 + $0x8] sm:$0xff]   ;;  %v474_v3 = vld [vmem:[%s616_s26 + $0x10] sm:$0xff]  }
  0x16   : > { %v443_v4 = vunpack.c.l.bf16 %v442_v1  ;;  %v444_v5 = vunpack.c.h.bf16 %v442_v1  ;;  %v447_v6 = vunpack.c.l.bf16 %v473_v2  ;;  %v448_v7 = vunpack.c.h.bf16 %v473_v2  ;;  %v475_v8 = vld [vmem:[%s616_s26 + $0x18] sm:$0xff]   ;;  %v476_v30 = vld [vmem:[%s616_s26 + $0x20] sm:$0xff]   ;;  %v477_v31 = vld [vmem:[%s616_s26 + $0x28] sm:$0xff]  }
  0x17   : > { %v451_v10 = vunpack.c.l.bf16 %v474_v3  ;;  %v452_v11 = vunpack.c.h.bf16 %v474_v3  ;;  %v455_v12 = vunpack.c.l.bf16 %v475_v8  ;;  %v456_v13 = vunpack.c.h.bf16 %v475_v8  ;;  %v478_v36 = vld [vmem:[%s616_s26 + $0x30] sm:$0xff]   ;;  %v479_v37 = vld [vmem:[%s616_s26 + $0x38] sm:$0xff]  }
  0x18   : > { %v254_v14 = vmul.f32 %v443_v4, %v621_v0  ;;  %v255_v15 = vmul.f32 %v444_v5, %v621_v0  ;;  %v256_v16 = vmul.f32 %v447_v6, %v621_v0  ;;  %v257_v17 = vmul.f32 %v448_v7, %v621_v0 }
  0x19   : > { %v258_v18 = vmul.f32 %v451_v10, %v621_v0  ;;  %v259_v19 = vmul.f32 %v452_v11, %v621_v0  ;;  %v260_v20 = vmul.f32 %v455_v12, %v621_v0  ;;  %v261_v21 = vmul.f32 %v456_v13, %v621_v0 }
  0x1a   : > { %v277_v22 = vadd.f32 %v630_v9, %v254_v14  ;;  %v278_v23 = vadd.f32 %v630_v9, %v255_v15  ;;  %v279_v24 = vadd.f32 %v630_v9, %v256_v16  ;;  %v280_v25 = vadd.f32 %v630_v9, %v257_v17 }
  0x1b   : > { %v281_v26 = vadd.f32 %v630_v9, %v258_v18  ;;  %v282_v27 = vadd.f32 %v630_v9, %v259_v19  ;;  %v283_v28 = vadd.f32 %v630_v9, %v260_v20  ;;  %v284_v29 = vadd.f32 %v630_v9, %v261_v21 }
  0x1c   : > { %v293_v32 = vmax.f32 %v277_v22, 0.0  ;;  %v294_v33 = vmax.f32 %v278_v23, 0.0  ;;  %v295_v34 = vmax.f32 %v279_v24, 0.0  ;;  %v296_v35 = vmax.f32 %v280_v25, 0.0 }
  0x1d   : > { %v297_v38 = vmax.f32 %v281_v26, 0.0  ;;  %v298_v39 = vmax.f32 %v282_v27, 0.0  ;;  %v299_v40 = vmax.f32 %v283_v28, 0.0  ;;  %v300_v41 = vmax.f32 %v284_v29, 0.0 }
  0x1e   : > { %309 = vst [vmem:[%s648_s7] sm:$0xff] %v293_v32  ;;  %310 = vst [vmem:[%s648_s7 + $0x8] sm:$0xff] %v294_v33  ;;  %v459_v42 = vunpack.c.l.bf16 %v476_v30  ;;  %v460_v43 = vunpack.c.h.bf16 %v476_v30  ;;  %v463_v44 = vunpack.c.l.bf16 %v477_v31  ;;  %v464_v45 = vunpack.c.h.bf16 %v477_v31 }
  0x1f   : > { %311 = vst [vmem:[%s648_s7 + $0x10] sm:$0xff] %v295_v34  ;;  %312 = vst [vmem:[%s648_s7 + $0x18] sm:$0xff] %v296_v35  ;;  %v467_v46 = vunpack.c.l.bf16 %v478_v36  ;;  %v468_v47 = vunpack.c.h.bf16 %v478_v36  ;;  %v471_v48 = vunpack.c.l.bf16 %v479_v37  ;;  %v472_v49 = vunpack.c.h.bf16 %v479_v37 }
  0x20   : > { %313 = vst [vmem:[%s648_s7 + $0x20] sm:$0xff] %v297_v38  ;;  %314 = vst [vmem:[%s648_s7 + $0x28] sm:$0xff] %v298_v39  ;;  %v262_v50 = vmul.f32 %v459_v42, %v621_v0  ;;  %v263_v51 = vmul.f32 %v460_v43, %v621_v0  ;;  %v264_v52 = vmul.f32 %v463_v44, %v621_v0 }
  0x21   : > { %315 = vst [vmem:[%s648_s7 + $0x30] sm:$0xff] %v299_v40  ;;  %316 = vst [vmem:[%s648_s7 + $0x38] sm:$0xff] %v300_v41  ;;  %v265_v53 = vmul.f32 %v464_v45, %v621_v0  ;;  %v266_v54 = vmul.f32 %v467_v46, %v621_v0  ;;  %v267_v55 = vmul.f32 %v468_v47, %v621_v0 }
  0x22   : > { %v268_v56 = vmul.f32 %v471_v48, %v621_v0  ;;  %v269_v57 = vmul.f32 %v472_v49, %v621_v0  ;;  %v285_v58 = vadd.f32 %v630_v9, %v262_v50  ;;  %v286_v59 = vadd.f32 %v630_v9, %v263_v51 }
  0x23   : > { %v287_v60 = vadd.f32 %v630_v9, %v264_v52  ;;  %v288_v61 = vadd.f32 %v630_v9, %v265_v53  ;;  %v289_v62 = vadd.f32 %v630_v9, %v266_v54  ;;  %v290_v63 = vadd.f32 %v630_v9, %v267_v55 }
  0x24   : > { %v291_v0 = vadd.f32 %v630_v9, %v268_v56  ;;  %v292_v1 = vadd.f32 %v630_v9, %v269_v57  ;;  %v301_v2 = vmax.f32 %v285_v58, 0.0  ;;  %v302_v3 = vmax.f32 %v286_v59, 0.0 }
  0x25   : > { %v303_v4 = vmax.f32 %v287_v60, 0.0  ;;  %v304_v5 = vmax.f32 %v288_v61, 0.0  ;;  %v305_v6 = vmax.f32 %v289_v62, 0.0  ;;  %v306_v7 = vmax.f32 %v290_v63, 0.0 }
  0x26   : > { %v307_v8 = vmax.f32 %v291_v0, 0.0  ;;  %v308_v10 = vmax.f32 %v292_v1, 0.0  ;;  %317 = vst [vmem:[%s648_s7 + $0x40] sm:$0xff] %v301_v2  ;;  %318 = vst [vmem:[%s648_s7 + $0x48] sm:$0xff] %v302_v3 }
  0x27   : > { %319 = vst [vmem:[%s648_s7 + $0x50] sm:$0xff] %v303_v4  ;;  %320 = vst [vmem:[%s648_s7 + $0x58] sm:$0xff] %v304_v5 }
  0x28   : > { %321 = vst [vmem:[%s648_s7 + $0x60] sm:$0xff] %v305_v6  ;;  %322 = vst [vmem:[%s648_s7 + $0x68] sm:$0xff] %v306_v7 }
  0x29   : > { %323 = vst [vmem:[%s648_s7 + $0x70] sm:$0xff] %v307_v8  ;;  %324 = vst [vmem:[%s648_s7 + $0x78] sm:$0xff] %v308_v10 }
  0x2a PF: > { %s13_s16 = sadd.s32 1, %s558_s16   ;;  %s709_s12 = smov %s550_s14 }
  0x2b   : > { %p10_p7 = scmp.ge.s32.totalorder %s13_s16, 6   ;;  %s710_s13 = smov %s554_s15 }
  0x2c   : > { %s711_s14 = smov %s714_s17  ;;  %s712_s15 = smov %s718_s18 }
  0x2d   :  { %12 = sbr.rel (!%p10_p7) target bundleno = 3 (0x3), region = 62 }

// kernel: double_conv.3
= control target key start
LH: loop header
LB: loop body
LE: loop exit
PB: predicated region body
PF: predicated region fallthrough
CT: control target
= control target key end

     0   :  { %s2677_s21 = smov 0   ;;  %s2679_s22 = smov 0   ;;  %s3280_s0 = inlined_call_operand.vmem [shape: bf16[2,2,10,18,128], index: 0, kind: input, shape index: {}]   ;;  %s3281_s1 = inlined_call_operand.vmem [shape: bf16[1152,128], index: 1, kind: input, shape index: {}]   ;;  %s3282_s2 = inlined_call_operand.vmem [shape: f32[1,128], index: 2, kind: input, shape index: {}]   ;;  %s3283_s3 = inlined_call_operand.vmem [shape: f32[1,128], index: 3, kind: input, shape index: {}]   ;;  %s3284_s4 = inlined_call_operand.vmem [shape: f32[1,128], index: 4, kind: input, shape index: {}]   ;;  %s3285_s5 = inlined_call_operand.vmem [shape: bf16[2,16,16,128], index: 5, kind: output, shape index: {0}]   ;;  %s3286_s6 = inlined_call_operand.vmem [shape: f32[2,2,8,128], index: 6, kind: output, shape index: {1}]  }
   0x1   :  { %s2681_s23 = smov 0   ;;  %s2683_s24 = smov 0  }
   0x2   :  { %s2685_s25 = smov 0  }
   0x3 LB: > { %s26_s3 = sadd.s32 1, %s2632_s23  ;;  %s29_s4 = sadd.s32 1, %s2636_s24  ;;  %s2640_s25 = sphi %s2685_s25, %s17_s25   ;;  %s2636_s24 = sphi %s2683_s24, %s3290_s24   ;;  %s2632_s23 = sphi %s2681_s23, %s3289_s23   ;;  %s2628_s22 = sphi %s2679_s22, %s3288_s22   ;;  %s2624_s21 = sphi %s2677_s21, %s3287_s21  }
   0x4   : > { %p27_p0 = scmp.ge.s32.totalorder %s26_s3, 2  ;;  %p1966_p1 = scmp.ge.s32.totalorder %s2640_s25, 1 }
   0x5   : > { %p237_p2 = scmp.lt.s32.totalorder %s2640_s25, 5 }
   0x6   : > { %s3292_s3 = smov (%p27_p0, %s26_s3), 0  ;;  %s3294_s4 = smov (!%p27_p0, %s29_s4), %s2636_s24 }
   0x7   : > { %p238_p3 = pnand %p1966_p1, %p237_p2  ;;  %p31_p4 = scmp.ge.s32.totalorder %s3294_s4, 2 }
   0x8   : > { %v2510_v0 = vld [vmem:[%s3281_s1 + $0x40] sm:$0xff] (!%p238_p3)   ;;  %v2514_v4 = vld [vmem:[%s3281_s1 + $0x48] sm:$0xff] (!%p238_p3)   ;;  %v2518_v8 = vld [vmem:[%s3281_s1 + $0x50] sm:$0xff] (!%p238_p3)   ;;  %p284_p5 = scmp.lt.s32.totalorder (!%p238_p3), %s2628_s22, 1  ;;  %p286_p6 = scmp.lt.s32.totalorder (!%p238_p3), %s2624_s21, 1  ;;  %vm520_vm1 = vcmask (!%p238_p3), 1046528  }
   0x9   : > { %s3296_s4 = smov (%p31_p4, %s3294_s4), 0  ;;  %241 = sbr.rel (%p238_p3) target bundleno = 437 (0x1b5), region = 40 }
   0xa   : > { %v2511_v1 = vld [vmem:[%s3281_s1 + $0xc0] sm:$0xff] (!%p238_p3)   ;;  %2148 = vmatprep.subr.bf16.mxu0 (!%p238_p3), %v2510_v0  ;;  %v2515_v5 = vld [vmem:[%s3281_s1 + $0xc8] sm:$0xff] (!%p238_p3)   ;;  %v2519_v9 = vld [vmem:[%s3281_s1 + $0xd0] sm:$0xff] (!%p238_p3)   ;;  %vm415_vm0 = vsmask.f32 (!%p238_p3), 7424  ;;  %s1968_s13 = sshll.u32 (!%p238_p3), %s2624_s21, 3 }
   0xb   : > { %v2512_v2 = vld [vmem:[%s3281_s1] sm:$0xff] (!%p238_p3)   ;;  %2212 = vmatprep.subr.bf16.mxu1 (!%p238_p3), %v2511_v1  ;;  %v2516_v6 = vld [vmem:[%s3281_s1 + $0x8] sm:$0xff] (!%p238_p3)   ;;  %v2520_v10 = vld [vmem:[%s3281_s1 + $0x10] sm:$0xff] (!%p238_p3)   ;;  %p296_p7 = scmp.lt.s32.totalorder (!%p238_p3), %s1968_s13, 15  ;;  %vm1811_vm2 = vcmask (!%p238_p3), 1040384   ;;  %vm1813_vm3 = vcmask (!%p238_p3), 1041408  }
   0xc   : > { %v2513_v3 = vld [vmem:[%s3281_s1 + $0x80] sm:$0xff] (!%p238_p3)   ;;  %2149 = vmatpush3.bf16.msra.mxu0 (!%p238_p3), %v2512_v2  ;;  %v2517_v7 = vld [vmem:[%s3281_s1 + $0x88] sm:$0xff] (!%p238_p3)   ;;  %v2521_v11 = vld [vmem:[%s3281_s1 + $0x90] sm:$0xff] (!%p238_p3)  }
   0xd   : > { %2213 = vmatpush3.bf16.msra.mxu1 (!%p238_p3), %v2513_v3  ;;  %2150 = vmatprep.subr.bf16.mxu0 (!%p238_p3), %v2514_v4  ;;  %v2522_v12 = vld [vmem:[%s3281_s1 + $0x58] sm:$0xff] (!%p238_p3)   ;;  %v2526_v16 = vld [vmem:[%s3281_s1 + $0x60] sm:$0xff] (!%p238_p3)   ;;  %v2530_v20 = vld [vmem:[%s3281_s1 + $0x68] sm:$0xff] (!%p238_p3)  }
   0xe   : > { %2214 = vmatprep.subr.bf16.mxu1 (!%p238_p3), %v2515_v5  ;;  %v2523_v13 = vld [vmem:[%s3281_s1 + $0xd8] sm:$0xff] (!%p238_p3)   ;;  %v2527_v17 = vld [vmem:[%s3281_s1 + $0xe0] sm:$0xff] (!%p238_p3)   ;;  %v2531_v21 = vld [vmem:[%s3281_s1 + $0xe8] sm:$0xff] (!%p238_p3)  }
   0xf   : > { %v2524_v14 = vld [vmem:[%s3281_s1 + $0x18] sm:$0xff] (!%p238_p3)   ;;  %v2528_v18 = vld [vmem:[%s3281_s1 + $0x20] sm:$0xff] (!%p238_p3)   ;;  %v2532_v22 = vld [vmem:[%s3281_s1 + $0x28] sm:$0xff] (!%p238_p3)  }
  0x10   : > { %2151 = vmatpush3.bf16.msra.mxu0 %v2516_v6  ;;  %v2525_v15 = vld [vmem:[%s3281_s1 + $0x98] sm:$0xff]   ;;  %s3298_s22 = smov (!%p284_p5, %s2628_s22), 1  ;;  %v2529_v19 = vld [vmem:[%s3281_s1 + $0xa0] sm:$0xff]   ;;  %v2533_v23 = vld [vmem:[%s3281_s1 + $0xa8] sm:$0xff]   ;;  %s3300_s13 = smov (!%p296_p7, %s1968_s13), 15 }
  0x11   : > { %2215 = vmatpush3.bf16.msra.mxu1 %v2517_v7  ;;  %2152 = vmatprep.subr.bf16.mxu0 %v2518_v8  ;;  %s2768_s17 = scalar_select %p286_p6, %s2624_s21, 1  ;;  %v2534_v24 = vld [vmem:[%s3281_s1 + $0x70] sm:$0xff]   ;;  %v2538_v28 = vld [vmem:[%s3281_s1 + $0x78] sm:$0xff]   ;;  %v2545_v40 = vld [vmem:[%s3281_s1 + $0x140] sm:$0xff]  }
  0x12   : > { %2216 = vmatprep.subr.bf16.mxu1 %v2519_v9  ;;  %s2469_s29 = smul.u32 60, %s3298_s22  ;;  %v2535_v25 = vld [vmem:[%s3281_s1 + $0xf0] sm:$0xff]   ;;  %v2539_v29 = vld [vmem:[%s3281_s1 + $0xf8] sm:$0xff]   ;;  %v2546_v45 = vld [vmem:[%s3281_s1 + $0x100] sm:$0xff]   ;;  %s1969_s21 = sshll.u32 %s3300_s13, 1 }
  0x13   : > { %s2468_s8 = smul.u32 30, %s2768_s17  ;;  %v2536_v26 = vld [vmem:[%s3281_s1 + $0x30] sm:$0xff]   ;;  %v2540_v30 = vld [vmem:[%s3281_s1 + $0x38] sm:$0xff]   ;;  %v2549_v54 = vld [vmem:[%s3281_s1 + $0x148] sm:$0xff]   ;;  %s1970_s14 = sshll.u32 %s3298_s22, 5 }
  0x14   : > { %2153 = vmatpush3.bf16.msra.mxu0 %v2520_v10  ;;  %v2537_v27 = vld [vmem:[%s3281_s1 + $0xb0] sm:$0xff]   ;;  %v2541_v31 = vld [vmem:[%s3281_s1 + $0xb8] sm:$0xff]   ;;  %v2550_v58 = vld [vmem:[%s3281_s1 + $0x108] sm:$0xff]   ;;  %s1972_s26 = sshll.u32 %s3298_s22, 1 }
  0x15   : > { %2217 = vmatpush3.bf16.msra.mxu1 %v2521_v11  ;;  %2154 = vmatprep.subr.bf16.mxu0 %v2522_v12  ;;  %s290_s18 = sadd.s32 %s2469_s29, %s2468_s8  ;;  %v2553_v2 = vld [vmem:[%s3281_s1 + $0x150] sm:$0xff]   ;;  %v2554_v6 = vld [vmem:[%s3281_s1 + $0x1c0] sm:$0xff]   ;;  %s309_s27 = sadd.s32 %s1972_s26, %s2768_s17 }
  0x16   : > { %2218 = vmatprep.subr.bf16.mxu1 %v2523_v13  ;;  %s1967_s7 = sshll.u32 %s290_s18, 2  ;;  %v2555_v9 = vld [vmem:[%s3281_s1 + $0x110] sm:$0xff]   ;;  %v2556_v10 = vld [vmem:[%s3281_s1 + $0x180] sm:$0xff]   ;;  %s1973_s28 = sshll.u32 %s309_s27, 3 }
  0x17   : > { %s2817_s15 = scalar_lea.vmem %s3280_s0, %s1967_s7  ;;  %s311_s9 = scalar_lea.vmem %s3286_s6, %s1973_s28 }
  0x18   : > { %2155 = vmatpush3.bf16.msra.mxu0 %v2524_v14  ;;  %v2542_v32 = vld [vmem:[%s2817_s15] sm:$0xff]   ;;  %v2543_v33 = vld [vmem:[%s2817_s15 + $0x8] ss:$0 sps:$4 sm:$0x11]   ;;  %v2544_v34 = vld [vmem:[%s2817_s15 + $0xc] sm:$0xff]  }
  0x19   : > { %2219 = vmatpush3.bf16.msra.mxu1 %v2525_v15  ;;  %2156 = vmatprep.subr.bf16.mxu0 %v2526_v16  ;;  %v417_v35 = vshrl.u32 %v2542_v32, 16  ;;  %v419_v36 = vshll.u32 %v2542_v32, 16  ;;  %v424_v37 = vshll.u32 %v2543_v33, 16  ;;  %v521_v38 = vrot.slane %v2542_v32, 1  ;;  %v2834_v49 = vld [vmem:[%s2817_s15 + $0x18] sm:$0xff]   ;;  %v2846_v60 = vld [vmem:[%s2817_s15 + $0x24] sm:$0xff]  }
  0x1a   : > { %2220 = vmatprep.subr.bf16.mxu1 %v2527_v17  ;;  %1317 = vmatprep.mubr.bf16.mxu1 %v2544_v34  ;;  %v522_v39 = vrot.slane %v2543_v33, 1  ;;  %v429_v43 = vshrl.u32 %v2544_v34, 16  ;;  %v2547_v46 = vld [vmem:[%s2817_s15 + $0x14] ss:$0 sps:$4 sm:$0x11]   ;;  %v431_v47 = vshll.u32 %v2544_v34, 16 }
  0x1b   : > { %v421_v41 = vrot.slane %v419_v36, 1  ;;  %v426_v42 = vrot.slane %v424_v37, 1  ;;  %v524_v50 = vrot.slane %v2544_v34, 1  ;;  %v436_v52 = vshll.u32 %v2547_v46, 16  ;;  %v2879_v15 = vld [vmem:[%s2817_s15 + $0x30] sm:$0xff]  }
  0x1c   : > { %2157 = vmatpush3.bf16.msra.mxu0 %v2528_v18  ;;  %v523_v44 = vsel %vm520_vm1, %v521_v38, %v522_v39  ;;  %v433_v51 = vrot.slane %v431_v47, 1  ;;  %v525_v53 = vrot.slane %v2547_v46, 1  ;;  %v441_v59 = vshrl.u32 %v2834_v49, 16  ;;  %v2551_v61 = vld [vmem:[%s2817_s15 + $0x20] ss:$0 sps:$4 sm:$0x11]  }
  0x1d   : > { %2221 = vmatpush3.bf16.msra.mxu1 %v2529_v19  ;;  %2158 = vmatprep.subr.bf16.mxu0 %v2530_v20  ;;  %v422_v48 = vor.u32 %v421_v41, %v417_v35  ;;  %v438_v57 = vrot.slane %v436_v52, 1  ;;  %v443_v62 = vshll.u32 %v2834_v49, 16  ;;  %v527_v1 = vrot.slane %v2834_v49, 1  ;;  %v2557_v13 = vld [vmem:[%s2817_s15 + $0x2c] ss:$0 sps:$4 sm:$0x11]  }
  0x1e   : > { %2222 = vmatprep.subr.bf16.mxu1 %v2531_v21  ;;  %v434_v56 = vor.u32 %v433_v51, %v429_v43  ;;  %v2854_v0 = vsel %vm520_vm1, %v524_v50, %v525_v53  ;;  %v448_v4 = vshll.u32 %v2551_v61, 16  ;;  %v528_v5 = vrot.slane %v2551_v61, 1  ;;  %v2559_v18 = vld [vmem:[%s3281_s1 + $0x158] sm:$0xff]   ;;  %v2560_v21 = vld [vmem:[%s3281_s1 + $0x1c8] sm:$0xff]   ;;  %v2566_v36 = vld [vmem:[%s3281_s1 + $0x1d0] sm:$0xff]  }
  0x1f   : > { %v427_v55 = vsel %vm415_vm0, %v422_v48, %v426_v42  ;;  %v445_v3 = vrot.slane %v443_v62, 1  ;;  %v453_v11 = vshrl.u32 %v2846_v60, 16  ;;  %v455_v14 = vshll.u32 %v2846_v60, 16  ;;  %v2567_v38 = vld [vmem:[%s3281_s1 + $0x120] sm:$0xff]   ;;  %v2568_v41 = vld [vmem:[%s3281_s1 + $0x190] sm:$0xff]   ;;  %v2932_v47 = vld [vmem:[%s2817_s15 + $0x48] sm:$0xff]  }
  0x20   : > { %2159 = vmatpush3.bf16.msra.mxu0 %v2532_v22  ;;  %1220 = vmatprep.mubr.bf16.mxu0 %v427_v55  ;;  %v2851_v63 = vsel %vm415_vm0, %v434_v56, %v438_v57  ;;  %v450_v8 = vrot.slane %v448_v4, 1  ;;  %v460_v17 = vshll.u32 %v2557_v13, 16  ;;  %v2886_v19 = vsel %vm520_vm1, %v527_v1, %v528_v5  ;;  %v2569_v42 = vld [vmem:[%s2817_s15 + $0x44] ss:$0 sps:$4 sm:$0x11]   ;;  %v2571_v48 = vld [vmem:[%s3281_s1 + $0x168] sm:$0xff]  }
  0x21   : > { %2223 = vmatpush3.bf16.msra.mxu1 %v2533_v23  ;;  %2160 = vmatprep.subr.bf16.mxu0 %v2534_v24  ;;  %v446_v7 = vor.u32 %v445_v3, %v441_v59  ;;  %v457_v16 = vrot.slane %v455_v14, 1  ;;  %v530_v20 = vrot.slane %v2846_v60, 1  ;;  %v2561_v24 = vld [vmem:[%s3281_s1 + $0x118] sm:$0xff]   ;;  %v533_v43 = vrot.slane %v2879_v15, 1  ;;  %v2573_v53 = vld [vmem:[%s3281_s1 + $0x128] sm:$0xff]   ;;  %v2577_v1 = vld [vmem:[%s3281_s1 + $0x170] sm:$0xff]  }
  0x22   : > { %2224 = vmatprep.subr.bf16.mxu1 %v2535_v25  ;;  %v462_v23 = vrot.slane %v460_v17, 1  ;;  %v2562_v25 = vld [vmem:[%s3281_s1 + $0x188] sm:$0xff]   ;;  %v484_v51 = vshll.u32 %v2569_v42, 16  ;;  %v2572_v52 = vld [vmem:[%s3281_s1 + $0x1d8] sm:$0xff]   ;;  %v537_v61 = vrot.slane %v2569_v42, 1  ;;  %v491_v62 = vshll.u32 %v2932_v47, 16 }
  0x23   : > { %v2874_v12 = vsel %vm415_vm0, %v446_v7, %v450_v8  ;;  %v458_v22 = vor.u32 %v457_v16, %v453_v11  ;;  %v2575_v55 = vld [vmem:[%s2817_s15 + $0x50] ss:$0 sps:$4 sm:$0x11]   ;;  %v2963_v3 = vld [vmem:[%s2817_s15 + $0x54] sm:$0xff]   ;;  %v2578_v4 = vld [vmem:[%s3281_s1 + $0x1e0] sm:$0xff]  }
  0x24   : > { %2161 = vmatpush3.bf16.msra.mxu0 %v2536_v26  ;;  %v467_v26 = vshll.u32 %v2879_v15, 16  ;;  %v486_v59 = vrot.slane %v484_v51, 1  ;;  %v496_v5 = vshll.u32 %v2575_v55, 16  ;;  %v493_v8 = vrot.slane %v491_v62, 1  ;;  %v2582_v17 = vld [vmem:[%s3281_s1 + $0x1a8] sm:$0xff]  }
  0x25   : > { %2225 = vmatpush3.bf16.msra.mxu1 %v2537_v27  ;;  %2162 = vmatprep.subr.bf16.mxu0 %v2538_v28  ;;  %v531_v27 = vrot.slane %v2557_v13, 1  ;;  %v2563_v28 = vld [vmem:[%s2817_s15 + $0x38] ss:$0 sps:$4 sm:$0x11]   ;;  %v539_v13 = vrot.slane %v2932_v47, 1  ;;  %v540_v14 = vrot.slane %v2575_v55, 1 }
  0x26   : > { %2226 = vmatprep.subr.bf16.mxu1 %v2539_v29  ;;  %v465_v29 = vshrl.u32 %v2879_v15, 16  ;;  %v472_v33 = vshll.u32 %v2563_v28, 16  ;;  %v498_v11 = vrot.slane %v496_v5, 1  ;;  %v3044_v55 = vld [vmem:[%s2817_s15 + $0x6c] sm:$0xff]  }
  0x27   : > { %v2918_v37 = vsel %vm520_vm1, %v530_v20, %v531_v27  ;;  %v2587_v27 = vld [vmem:[%s3281_s1 + $0x138] sm:$0xff]   ;;  %v591_v62 = vshll.u32 %v3044_v55, 16 }
  0x28   : > { %2163 = vmatpush3.bf16.msra.mxu0 %v2540_v30  ;;  %v2904_v30 = vld [vmem:[%s2817_s15 + $0x3c] sm:$0xff]   ;;  %v474_v35 = vrot.slane %v472_v33, 1 }
  0x29   : > { %2227 = vmatpush3.bf16.msra.mxu1 %v2541_v31  ;;  %2276 = vmatprep.subr.bf16.mxu0 %v2545_v40  ;;  %v2907_v31 = vsel %vm415_vm0, %v458_v22, %v462_v23  ;;  %v479_v39 = vshll.u32 %v2904_v30, 16  ;;  %v536_v57 = vrot.slane %v2904_v30, 1  ;;  %v2585_v22 = vld [vmem:[%s3281_s1 + $0x178] sm:$0xff]   ;;  %v501_v23 = vshrl.u32 %v2963_v3, 16 }
  0x2a   : > { %2340 = vmatprep.subr.bf16.mxu1 %v2554_v6  ;;  %v2579_v6 = vld [vmem:[%s3281_s1 + $0x130] sm:$0xff]   ;;  %v2589_v33 = vld [vmem:[%s3281_s1 + $0x1f8] sm:$0xff]  }
  0x2b   : > { %1221 = vmatmul.mubr.bf16.vlgmr.msra.gmra.mrb[0].mxu0 %v2542_v32  ;;  %v469_v32 = vrot.slane %v467_v26, 1  ;;  %v481_v46 = vrot.slane %v479_v39, 1  ;;  %v2986_v16 = vsel %vm520_vm1, %v536_v57, %v537_v61  ;;  %v2600_v57 = vld [vmem:[%s2817_s15 + $0x74] ss:$0 sps:$4 sm:$0x11]   ;;  %v589_v61 = vshrl.u32 %v3044_v55, 16 }
  0x2c   : > { %1318 = vmatmul.mubr.bf16.vlgmr.msra.gmra.mrb[0].mxu1 %v523_v44  ;;  %2277 = vmatpush3.bf16.msra.mxu0 %v2546_v45  ;;  %v534_v44 = vrot.slane %v2563_v28, 1  ;;  %v477_v45 = vshrl.u32 %v2904_v30, 16  ;;  %v602_v5 = vrot.slane %v2600_v57, 1 }
  0x2d   : > { %1325 = vmatprep.mubr.bf16.mxu1 %v2834_v49  ;;  %1228 = vmatprep.mubr.bf16.mxu0 %v2851_v63  ;;  %v470_v40 = vor.u32 %v469_v32, %v465_v29  ;;  %v2588_v32 = vld [vmem:[%s3281_s1 + $0x1b0] sm:$0xff]  }
  0x2e   : > { %2278 = vmatprep.subr.bf16.mxu0 %v2549_v54  ;;  %2341 = vmatpush3.bf16.msra.mxu1 %v2556_v10  ;;  %v2574_v54 = vld [vmem:[%s3281_s1 + $0x198] sm:$0xff]   ;;  %v2954_v56 = vsel %vm520_vm1, %v533_v43, %v534_v44  ;;  %v2581_v10 = vld [vmem:[%s3281_s1 + $0x1e8] sm:$0xff]   ;;  %v542_v43 = vrot.slane %v2963_v3, 1 }
  0x2f   : > { %2342 = vmatprep.subr.bf16.mxu1 %v2560_v21  ;;  %v2939_v50 = vsel %vm415_vm0, %v470_v40, %v474_v35  ;;  %v2583_v21 = vld [vmem:[%s2817_s15 + $0x5c] ss:$0 sps:$4 sm:$0x11]  }
  0x30   : > { %2279 = vmatpush3.bf16.msra.mxu0 %v2550_v58  ;;  %v482_v58 = vor.u32 %v481_v46, %v477_v45  ;;  %v508_v29 = vshll.u32 %v2583_v21, 16  ;;  %v543_v44 = vrot.slane %v2583_v21, 1  ;;  %v2597_v46 = vld [vmem:[%s2817_s15 + $0x68] ss:$0 sps:$4 sm:$0x11]  }
  0x31   : > { %2280 = vmatprep.subr.bf16.mxu0 %v2553_v2  ;;  %v489_v2 = vshrl.u32 %v2932_v47, 16 }
  0x32   : > { %2343 = vmatpush3.bf16.msra.mxu1 %v2562_v25  ;;  %v2974_v7 = vsel %vm415_vm0, %v482_v58, %v486_v59  ;;  %v2586_v25 = vld [vmem:[%s3281_s1 + $0x1f0] sm:$0xff]   ;;  %v510_v40 = vrot.slane %v508_v29, 1 }
  0x33   : > { %1229 = vmatmul.mubr.bf16.gmra.mrb[4].mxu0 %v2544_v34  ;;  %v2565_v34 = vld [vmem:[%s3281_s1 + $0x160] sm:$0xff]   ;;  %2344 = vmatprep.subr.bf16.mxu1 %v2566_v36  ;;  %v494_v20 = vor.u32 %v493_v8, %v489_v2  ;;  %v3024_v36 = vsel %vm520_vm1, %v539_v13, %v540_v14  ;;  %v601_v2 = vrot.slane %v3044_v55, 1  ;;  %v2592_v13 = vld [vmem:[%s3281_s1 + $0x208] sm:$0xff]   ;;  %v2593_v14 = vld [vmem:[%s3281_s1 + $0x210] sm:$0xff]  }
  0x34   : > { %1326 = vmatmul.mubr.bf16.gmra.mrb[4].mxu1 %v2854_v0  ;;  %1236 = vmatprep.mubr.bf16.mxu0 %v2874_v12 }
  0x35   : > { %1333 = vmatprep.mubr.bf16.mxu1 %v2846_v60  ;;  %2281 = vmatpush3.bf16.msra.mxu0 %v2555_v9  ;;  %v2580_v9 = vld [vmem:[%s3281_s1 + $0x1a0] sm:$0xff]   ;;  %v3009_v28 = vsel %vm415_vm0, %v494_v20, %v498_v11 }
  0x36   : > { %2282 = vmatprep.subr.bf16.mxu0 %v2559_v18  ;;  %2345 = vmatpush3.bf16.msra.mxu1 %v2568_v41  ;;  %v503_v18 = vshll.u32 %v2963_v3, 16 }
  0x37   : > { %2346 = vmatprep.subr.bf16.mxu1 %v2572_v52  ;;  %v570_v52 = vshll.u32 %v2597_v46, 16 }
  0x38   : > { %v505_v26 = vrot.slane %v503_v18, 1 }
  0x39   : > { %2283 = vmatpush3.bf16.msra.mxu0 %v2561_v24  ;;  %v2999_v24 = vld [vmem:[%s2817_s15 + $0x60] sm:$0xff]   ;;  %v572_v58 = vrot.slane %v570_v52, 1  ;;  %s300_s15 = sadd.s32 %s1970_s14, %s1969_s21 }
  0x3a   : > { %2284 = vmatprep.subr.bf16.mxu0 %v2565_v34  ;;  %2347 = vmatpush3.bf16.msra.mxu1 %v2574_v54  ;;  %v2590_v34 = vld [vmem:[%s3281_s1 + $0x1b8] sm:$0xff]   ;;  %v565_v35 = vshll.u32 %v2999_v24, 16  ;;  %v506_v39 = vor.u32 %v505_v26, %v501_v23  ;;  %v563_v41 = vshrl.u32 %v2999_v24, 16  ;;  %v3041_v54 = vsel %vm520_vm1, %v542_v43, %v543_v44  ;;  %s1971_s16 = sshll.u32 %s300_s15, 2 }
  0x3b   : > { %1237 = vmatmul.mubr.bf16.gmra.mrb[8].mxu0 %v2834_v49  ;;  %2348 = vmatprep.subr.bf16.mxu1 %v2578_v4  ;;  %s3218_s20 = scalar_lea.vmem %s3285_s5, %s1971_s16 }
  0x3c   : > { %1334 = vmatmul.mubr.bf16.gmra.mrb[8].mxu1 %v2886_v19  ;;  %1244 = vmatprep.mubr.bf16.mxu0 %v2907_v31  ;;  %v567_v42 = vrot.slane %v565_v35, 1  ;;  %v3034_v45 = vsel %vm415_vm0, %v506_v39, %v510_v40 }
  0x3d   : > { %1341 = vmatprep.mubr.bf16.mxu1 %v2879_v15  ;;  %2285 = vmatpush3.bf16.msra.mxu0 %v2567_v38  ;;  %v2591_v38 = vld [vmem:[%s3281_s1 + $0x200] sm:$0xff]  }
  0x3e   : > { %2286 = vmatprep.subr.bf16.mxu0 %v2571_v48  ;;  %2349 = vmatpush3.bf16.msra.mxu1 %v2580_v9  ;;  %v575_v48 = vrot.slane %v2999_v24, 1  ;;  %v568_v51 = vor.u32 %v567_v42, %v563_v41  ;;  %v3059_v9 = vsel %vm520_vm1, %v601_v2, %v602_v5 }
  0x3f   : > { %2350 = vmatprep.subr.bf16.mxu1 %v2581_v10 }
  0x40   : > { %v3055_v4 = vsel %vm415_vm0, %v568_v51, %v572_v58 }
  0x41   : > { %2287 = vmatpush3.bf16.msra.mxu0 %v2573_v53  ;;  %v576_v53 = vrot.slane %v2597_v46, 1 }
  0x42   : > { %2288 = vmatprep.subr.bf16.mxu0 %v2577_v1  ;;  %2351 = vmatpush3.bf16.msra.mxu1 %v2582_v17  ;;  %v596_v1 = vshll.u32 %v2600_v57, 16 }
  0x43   : > { %1245 = vmatmul.mubr.bf16.gmra.mrb[12].mxu0 %v2846_v60  ;;  %2352 = vmatprep.subr.bf16.mxu1 %v2586_v25  ;;  %v3048_v59 = vsel %vm520_vm1, %v575_v48, %v576_v53 }
  0x44   : > { %1342 = vmatmul.mubr.bf16.gmra.mrb[12].mxu1 %v2918_v37  ;;  %1252 = vmatprep.mubr.bf16.mxu0 %v2939_v50  ;;  %v598_v8 = vrot.slane %v596_v1, 1 }
  0x45   : > { %1349 = vmatprep.mubr.bf16.mxu1 %v2904_v30  ;;  %2289 = vmatpush3.bf16.msra.mxu0 %v2579_v6  ;;  %v593_v6 = vrot.slane %v591_v62, 1 }
  0x46   : > { %2290 = vmatprep.subr.bf16.mxu0 %v2585_v22  ;;  %2353 = vmatpush3.bf16.msra.mxu1 %v2588_v32 }
  0x47   : > { %2354 = vmatprep.subr.bf16.mxu1 %v2589_v33  ;;  %v594_v10 = vor.u32 %v593_v6, %v589_v61 }
  0x49   : > { %2291 = vmatpush3.bf16.msra.mxu0 %v2587_v27  ;;  %v599_v11 = vsel %vm415_vm0, %v594_v10, %v598_v8 }
  0x4a   : > { %2420 = vmatprep.subr.bf16.mxu0 %v2591_v38  ;;  %2355 = vmatpush3.bf16.msra.mxu1 %v2590_v34 }
  0x4b   : > { %1253 = vmatmul.mubr.bf16.gmra.mrb[16].mxu0 %v2879_v15  ;;  %2452 = vmatprep.subr.bf16.mxu1 %v2591_v38 }
  0x4c   : > { %1350 = vmatmul.mubr.bf16.gmra.mrb[16].mxu1 %v2954_v56  ;;  %1260 = vmatprep.mubr.bf16.mxu0 %v2974_v7 }
  0x4d   : > { %1357 = vmatprep.mubr.bf16.mxu1 %v2932_v47 }
  0x53   : > { %1261 = vmatmul.mubr.bf16.gmra.mrb[20].mxu0 %v2904_v30 }
  0x54   : > { %1358 = vmatmul.mubr.bf16.gmra.mrb[20].mxu1 %v2986_v16  ;;  %1268 = vmatprep.mubr.bf16.mxu0 %v3009_v28 }
  0x55   : > { %1365 = vmatprep.mubr.bf16.mxu1 %v2963_v3 }
  0x5b   : > { %1269 = vmatmul.mubr.bf16.gmra.mrb[24].mxu0 %v2932_v47 }
  0x5c   : > { %1366 = vmatmul.mubr.bf16.gmra.mrb[24].mxu1 %v3024_v36  ;;  %1276 = vmatprep.mubr.bf16.mxu0 %v3034_v45 }
  0x5d   : > { %1373 = vmatprep.mubr.bf16.mxu1 %v2999_v24 }
  0x63   : > { %1277 = vmatmul.mubr.bf16.gmra.mrb[28].mxu0 %v2963_v3 }
  0x64   : > { %1374 = vmatmul.mubr.bf16.gmra.mrb[28].mxu1 %v3041_v54  ;;  %1414 = vmatprep.mubr.bf16.mxu0 %v2854_v0  ;;  %v2594_v0 = vld [vmem:[%s3281_s1 + $0x218] sm:$0xff]  }
  0x65   : > { %1511 = vmatprep.mubr.bf16.mxu1 %v2874_v12 }
  0x6b   : > { %1415 = vmatmul.mubr.bf16.vlgmr.msra.gmra.mrb[32].mxu0 %v2851_v63  ;;  %v2598_v63 = vld [vmem:[%s3281_s1 + $0x230] sm:$0xff]  }
  0x6c   : > { %1512 = vmatmul.mubr.bf16.vlgmr.msra.gmra.mrb[32].mxu1 %v2834_v49  ;;  %2421 = vmatpush3.bf16.msra.mxu0 %v2591_v38  ;;  %v2595_v49 = vld [vmem:[%s3281_s1 + $0x220] sm:$0xff]  }
  0x6d   : > { %1519 = vmatprep.mubr.bf16.mxu1 %v2907_v31  ;;  %2460 = vmatpush3.bf16.msra.mxu1 %v2591_v38 }
  0x6e   : > { %2453 = vmatprep.subr.bf16.mxu1 %v2592_v13  ;;  %1422 = vmatprep.mubr.bf16.mxu0 %v2886_v19 }
  0x6f   : > { %2422 = vmatprep.subr.bf16.mxu0 %v2592_v13 }
  0x70   : > { %2423 = vmatpush3.bf16.msra.mxu0 %v2592_v13 }
  0x71   : > { %2461 = vmatpush3.bf16.msra.mxu1 %v2592_v13  ;;  %2424 = vmatprep.subr.bf16.mxu0 %v2593_v14 }
  0x72   : > { %2454 = vmatprep.subr.bf16.mxu1 %v2593_v14 }
  0x73   : > { %1423 = vmatmul.mubr.bf16.gmra.mrb[36].mxu0 %v2874_v12  ;;  %v2601_v12 = vld [vmem:[%s3281_s1 + $0x238] sm:$0xff]  }
  0x74   : > { %1520 = vmatmul.mubr.bf16.gmra.mrb[36].mxu1 %v2846_v60  ;;  %1430 = vmatprep.mubr.bf16.mxu0 %v2918_v37  ;;  %v2596_v60 = vld [vmem:[%s3281_s1 + $0x228] sm:$0xff]  }
  0x75   : > { %1527 = vmatprep.mubr.bf16.mxu1 %v2939_v50  ;;  %2462 = vmatpush3.bf16.msra.mxu1 %v2593_v14 }
  0x76   : > { %2455 = vmatprep.subr.bf16.mxu1 %v2594_v0  ;;  %2425 = vmatpush3.bf16.msra.mxu0 %v2593_v14 }
  0x77   : > { %2426 = vmatprep.subr.bf16.mxu0 %v2594_v0 }
  0x79   : > { %2463 = vmatpush3.bf16.msra.mxu1 %v2594_v0 }
  0x7a   : > { %2456 = vmatprep.subr.bf16.mxu1 %v2595_v49  ;;  %2427 = vmatpush3.bf16.msra.mxu0 %v2594_v0 }
  0x7b   : > { %2428 = vmatprep.subr.bf16.mxu0 %v2595_v49  ;;  %1431 = vmatmul.mubr.bf16.gmra.mrb[40].mxu0 %v2907_v31 }
  0x7c   : > { %1528 = vmatmul.mubr.bf16.gmra.mrb[40].mxu1 %v2879_v15  ;;  %1438 = vmatprep.mubr.bf16.mxu0 %v2954_v56 }
  0x7d   : > { %1535 = vmatprep.mubr.bf16.mxu1 %v2974_v7  ;;  %2464 = vmatpush3.bf16.msra.mxu1 %v2595_v49 }
  0x7e   : > { %2457 = vmatprep.subr.bf16.mxu1 %v2596_v60  ;;  %2429 = vmatpush3.bf16.msra.mxu0 %v2595_v49 }
  0x7f   : > { %2430 = vmatprep.subr.bf16.mxu0 %v2596_v60 }
  0x81   : > { %2465 = vmatpush3.bf16.msra.mxu1 %v2596_v60 }
  0x82   : > { %2458 = vmatprep.subr.bf16.mxu1 %v2598_v63  ;;  %2431 = vmatpush3.bf16.msra.mxu0 %v2596_v60 }
  0x83   : > { %2432 = vmatprep.subr.bf16.mxu0 %v2598_v63  ;;  %1439 = vmatmul.mubr.bf16.gmra.mrb[44].mxu0 %v2939_v50 }
  0x84   : > { %1536 = vmatmul.mubr.bf16.gmra.mrb[44].mxu1 %v2904_v30  ;;  %1446 = vmatprep.mubr.bf16.mxu0 %v2986_v16 }
  0x85   : > { %1543 = vmatprep.mubr.bf16.mxu1 %v3009_v28  ;;  %2466 = vmatpush3.bf16.msra.mxu1 %v2598_v63 }
  0x86   : > { %2459 = vmatprep.subr.bf16.mxu1 %v2601_v12  ;;  %2433 = vmatpush3.bf16.msra.mxu0 %v2598_v63 }
  0x87   : > { %2434 = vmatprep.subr.bf16.mxu0 %v2601_v12 }
  0x89   : > { %2467 = vmatpush3.bf16.msra.mxu1 %v2601_v12 }
  0x8a   : > { %2435 = vmatpush3.bf16.msra.mxu0 %v2601_v12 }
  0x8b   : > { %1447 = vmatmul.mubr.bf16.gmra.mrb[48].mxu0 %v2974_v7 }
  0x8c   : > { %1544 = vmatmul.mubr.bf16.gmra.mrb[48].mxu1 %v2932_v47  ;;  %1454 = vmatprep.mubr.bf16.mxu0 %v3024_v36 }
  0x8d   : > { %1551 = vmatprep.mubr.bf16.mxu1 %v3034_v45 }
  0x93   : > { %1455 = vmatmul.mubr.bf16.gmra.mrb[52].mxu0 %v3009_v28 }
  0x94   : > { %1552 = vmatmul.mubr.bf16.gmra.mrb[52].mxu1 %v2963_v3  ;;  %1462 = vmatprep.mubr.bf16.mxu0 %v3041_v54 }
  0x95   : > { %1559 = vmatprep.mubr.bf16.mxu1 %v3055_v4 }
  0x9b   : > { %1463 = vmatmul.mubr.bf16.gmra.mrb[56].mxu0 %v3034_v45 }
  0x9c   : > { %1560 = vmatmul.mubr.bf16.gmra.mrb[56].mxu1 %v2999_v24  ;;  %1470 = vmatprep.mubr.bf16.mxu0 %v3048_v59 }
  0x9d   : > { %1567 = vmatprep.mubr.bf16.mxu1 %v599_v11 }
  0xa3   : > { %1471 = vmatmul.mubr.bf16.gmra.mrb[60].mxu0 %v3055_v4 }
  0xa4   : > { %1568 = vmatmul.mubr.bf16.gmra.mrb[60].mxu1 %v3044_v55  ;;  %2436 = vmatprep.mubr.bf16.mxu0 %v2886_v19  ;;  %v3125_v19 = vld [vmem:[%s3282_s2] ss:$0 sm:$0xff] }
  0xa5   : > { %2444 = vmatprep.mubr.bf16.mxu1 %v3024_v36 }
  0xab   : > { %2437 = vmatmul.mubr.bf16.vlgmr.msra.gmra.mrb[64].mxu0 %v2918_v37 }
  0xac   : > { %2445 = vmatmul.mubr.bf16.vlgmr.msra.gmra.mrb[64].mxu1 %v3041_v54  ;;  %2440 = vmatprep.mubr.bf16.mxu0 %v2954_v56 }
  0xad   : > { %2448 = vmatprep.mubr.bf16.mxu1 %v3048_v59 }
  0xb3   : > { %2441 = vmatmul.mubr.bf16.gmra.mrb[68].mxu0 %v2986_v16 }
  0xb4   : > { %2449 = vmatmul.mubr.bf16.gmra.mrb[68].mxu1 %v3059_v9 }
  0xfe   : > { %v2164_v3 = vpop.f32.mrb[0].mxu0 }
  0xff   : > { %v2228_v15 = vpop.f32.mrb[0].mxu1  ;;  %v2165_v17 = vpop.f32.mrb[1].mxu0 }
 0x100   : > { %v2229_v30 = vpop.f32.mrb[1].mxu1  ;;  %v2166_v37 = vadd.f32 %v2165_v17, %v2164_v3  ;;  %v2167_v18 = vpop.f32.mrb[2].mxu0 }
 0x101   : > { %v2230_v31 = vadd.f32 %v2229_v30, %v2228_v15  ;;  %v2231_v47 = vpop.f32.mrb[2].mxu1  ;;  %v2168_v56 = vpop.f32.mrb[3].mxu0 }
 0x102   : > { %v2232_v50 = vpop.f32.mrb[3].mxu1  ;;  %v1223_v20 = vadd.f32 %v2166_v37, %v3125_v19  ;;  %v2169_v21 = vadd.f32 %v2168_v56, %v2167_v18 }
 0x103   : > { %v2233_v7 = vadd.f32 %v2232_v50, %v2231_v47 }
 0x104   : > { %v1226_v23 = vadd.f32 %v2169_v21, %v3125_v19  ;;  %v3129_v24 = vadd.f32 %v2230_v31, %v1223_v20 }
 0x106   : > { %v3131_v28 = vadd.f32 %v2233_v7, %v1226_v23  ;;  %v2170_v29 = vpop.f32.mrb[4].mxu0 }
 0x107   : > { %v2234_v16 = vpop.f32.mrb[4].mxu1  ;;  %v2171_v33 = vpop.f32.mrb[5].mxu0 }
 0x108   : > { %v2235_v22 = vpop.f32.mrb[5].mxu1  ;;  %v2172_v34 = vadd.f32 %v2171_v33, %v2170_v29  ;;  %v2173_v35 = vpop.f32.mrb[6].mxu0 }
 0x109   : > { %v2236_v25 = vadd.f32 %v2235_v22, %v2234_v16  ;;  %v2237_v26 = vpop.f32.mrb[6].mxu1  ;;  %v2174_v36 = vpop.f32.mrb[7].mxu0 }
 0x10a   : > { %v2238_v27 = vpop.f32.mrb[7].mxu1  ;;  %v1231_v38 = vadd.f32 %v2172_v34, %v3125_v19  ;;  %v2175_v39 = vadd.f32 %v2174_v36, %v2173_v35 }
 0x10b   : > { %v2239_v32 = vadd.f32 %v2238_v27, %v2237_v26 }
 0x10c   : > { %v1234_v42 = vadd.f32 %v2175_v39, %v3125_v19  ;;  %v3135_v43 = vadd.f32 %v2236_v25, %v1231_v38 }
 0x10e   : > { %v3137_v48 = vadd.f32 %v2239_v32, %v1234_v42  ;;  %v2176_v51 = vpop.f32.mrb[8].mxu0 }
 0x10f   : > { %v2240_v40 = vpop.f32.mrb[8].mxu1  ;;  %v2177_v53 = vpop.f32.mrb[9].mxu0 }
 0x110   : > { %v2241_v41 = vpop.f32.mrb[9].mxu1  ;;  %v2178_v54 = vadd.f32 %v2177_v53, %v2176_v51  ;;  %v2179_v55 = vpop.f32.mrb[10].mxu0 }
 0x111   : > { %v2242_v44 = vadd.f32 %v2241_v41, %v2240_v40  ;;  %v2243_v45 = vpop.f32.mrb[10].mxu1  ;;  %v2180_v57 = vpop.f32.mrb[11].mxu0 }
 0x112   : > { %v2244_v46 = vpop.f32.mrb[11].mxu1  ;;  %v1239_v58 = vadd.f32 %v2178_v54, %v3125_v19  ;;  %v2181_v59 = vadd.f32 %v2180_v57, %v2179_v55 }
 0x113   : > { %v2245_v52 = vadd.f32 %v2244_v46, %v2243_v45 }
 0x114   : > { %v1242_v1 = vadd.f32 %v2181_v59, %v3125_v19  ;;  %v3141_v2 = vadd.f32 %v2242_v44, %v1239_v58 }
 0x116   : > { %v3143_v8 = vadd.f32 %v2245_v52, %v1242_v1  ;;  %v2182_v9 = vpop.f32.mrb[12].mxu0 }
 0x117   : > { %v2246_v61 = vpop.f32.mrb[12].mxu1  ;;  %v2183_v11 = vpop.f32.mrb[13].mxu0 }
 0x118   : > { %v2247_v62 = vpop.f32.mrb[13].mxu1  ;;  %v2184_v13 = vadd.f32 %v2183_v11, %v2182_v9  ;;  %v2185_v14 = vpop.f32.mrb[14].mxu0 }
 0x119   : > { %v2248_v4 = vadd.f32 %v2247_v62, %v2246_v61  ;;  %v2249_v5 = vpop.f32.mrb[14].mxu1  ;;  %v2186_v0 = vpop.f32.mrb[15].mxu0 }
 0x11a   : > { %v2250_v6 = vpop.f32.mrb[15].mxu1  ;;  %v1247_v49 = vadd.f32 %v2184_v13, %v3125_v19  ;;  %v2187_v60 = vadd.f32 %v2186_v0, %v2185_v14 }
 0x11b   : > { %v2251_v10 = vadd.f32 %v2250_v6, %v2249_v5 }
 0x11c   : > { %v1250_v15 = vadd.f32 %v2187_v60, %v3125_v19  ;;  %v3147_v30 = vadd.f32 %v2248_v4, %v1247_v49 }
 0x11e   : > { %v3149_v3 = vadd.f32 %v2251_v10, %v1250_v15  ;;  %v2188_v7 = vpop.f32.mrb[16].mxu0 }
 0x11f   : > { %v2252_v63 = vpop.f32.mrb[16].mxu1  ;;  %v2189_v37 = vpop.f32.mrb[17].mxu0 }
 0x120   : > { %v2253_v12 = vpop.f32.mrb[17].mxu1  ;;  %v2190_v18 = vadd.f32 %v2189_v37, %v2188_v7  ;;  %v2191_v56 = vpop.f32.mrb[18].mxu0 }
 0x121   : > { %v2254_v31 = vadd.f32 %v2253_v12, %v2252_v63  ;;  %v2255_v47 = vpop.f32.mrb[18].mxu1  ;;  %v2192_v20 = vpop.f32.mrb[19].mxu0 }
 0x122   : > { %v2256_v50 = vpop.f32.mrb[19].mxu1  ;;  %v1255_v21 = vadd.f32 %v2190_v18, %v3125_v19  ;;  %v2193_v16 = vadd.f32 %v2192_v20, %v2191_v56 }
 0x123   : > { %v2257_v17 = vadd.f32 %v2256_v50, %v2255_v47 }
 0x124   : > { %v1258_v25 = vadd.f32 %v2193_v16, %v3125_v19  ;;  %v3153_v26 = vadd.f32 %v2254_v31, %v1255_v21 }
 0x126   : > { %v3155_v33 = vadd.f32 %v2257_v17, %v1258_v25  ;;  %v2194_v34 = vpop.f32.mrb[20].mxu0 }
 0x127   : > { %v2258_v22 = vpop.f32.mrb[20].mxu1  ;;  %v2195_v36 = vpop.f32.mrb[21].mxu0 }
 0x128   : > { %v2259_v23 = vpop.f32.mrb[21].mxu1  ;;  %v2196_v38 = vadd.f32 %v2195_v36, %v2194_v34  ;;  %v2197_v39 = vpop.f32.mrb[22].mxu0 }
 0x129   : > { %v2260_v27 = vadd.f32 %v2259_v23, %v2258_v22  ;;  %v2261_v29 = vpop.f32.mrb[22].mxu1  ;;  %v2198_v40 = vpop.f32.mrb[23].mxu0 }
 0x12a   : > { %v2262_v32 = vpop.f32.mrb[23].mxu1  ;;  %v1263_v41 = vadd.f32 %v2196_v38, %v3125_v19  ;;  %v2199_v42 = vadd.f32 %v2198_v40, %v2197_v39 }
 0x12b   : > { %v2263_v35 = vadd.f32 %v2262_v32, %v2261_v29 }
 0x12c   : > { %v1266_v46 = vadd.f32 %v2199_v42, %v3125_v19  ;;  %v3159_v51 = vadd.f32 %v2260_v27, %v1263_v41 }
 0x12e   : > { %v3161_v55 = vadd.f32 %v2263_v35, %v1266_v46  ;;  %v2200_v57 = vpop.f32.mrb[24].mxu0 }
 0x12f   : > { %v2264_v44 = vpop.f32.mrb[24].mxu1  ;;  %v2201_v59 = vpop.f32.mrb[25].mxu0 }
 0x130   : > { %v2265_v45 = vpop.f32.mrb[25].mxu1  ;;  %v2202_v61 = vadd.f32 %v2201_v59, %v2200_v57  ;;  %v2203_v62 = vpop.f32.mrb[26].mxu0 }
 0x131   : > { %v2266_v52 = vadd.f32 %v2265_v45, %v2264_v44  ;;  %v2267_v53 = vpop.f32.mrb[26].mxu1  ;;  %v2204_v1 = vpop.f32.mrb[27].mxu0 }
 0x132   : > { %v2268_v54 = vpop.f32.mrb[27].mxu1  ;;  %v1271_v4 = vadd.f32 %v2202_v61, %v3125_v19  ;;  %v2205_v5 = vadd.f32 %v2204_v1, %v2203_v62 }
 0x133   : > { %v2269_v58 = vadd.f32 %v2268_v54, %v2267_v53 }
 0x134   : > { %v1274_v10 = vadd.f32 %v2205_v5, %v3125_v19  ;;  %v3165_v11 = vadd.f32 %v2266_v52, %v1271_v4 }
 0x136   : > { %v3167_v49 = vadd.f32 %v2269_v58, %v1274_v10  ;;  %v2206_v60 = vpop.f32.mrb[28].mxu0 }
 0x137   : > { %v2270_v6 = vpop.f32.mrb[28].mxu1  ;;  %v2207_v12 = vpop.f32.mrb[29].mxu0 }
 0x138   : > { %v2271_v9 = vpop.f32.mrb[29].mxu1  ;;  %v2208_v15 = vadd.f32 %v2207_v12, %v2206_v60  ;;  %v2209_v31 = vpop.f32.mrb[30].mxu0 }
 0x139   : > { %v2272_v13 = vadd.f32 %v2271_v9, %v2270_v6  ;;  %v2273_v14 = vpop.f32.mrb[30].mxu1  ;;  %v2210_v47 = vpop.f32.mrb[31].mxu0 }
 0x13a   : > { %v2274_v0 = vpop.f32.mrb[31].mxu1  ;;  %v1279_v50 = vadd.f32 %v2208_v15, %v3125_v19  ;;  %v2211_v7 = vadd.f32 %v2210_v47, %v2209_v31 }
 0x13b   : > { %v2275_v63 = vadd.f32 %v2274_v0, %v2273_v14 }
 0x13c   : > { %v1282_v18 = vadd.f32 %v2211_v7, %v3125_v19  ;;  %v3171_v56 = vadd.f32 %v2272_v13, %v1279_v50 }
 0x13e   : > { %v3173_v22 = vadd.f32 %v2275_v63, %v1282_v18  ;;  %v2292_v23 = vpop.f32.mrb[32].mxu0 }
 0x13f   : > { %v2356_v17 = vpop.f32.mrb[32].mxu1  ;;  %v2293_v27 = vpop.f32.mrb[33].mxu0 }
 0x140   : > { %v2357_v37 = vpop.f32.mrb[33].mxu1  ;;  %v2294_v29 = vadd.f32 %v2293_v27, %v2292_v23  ;;  %v2295_v32 = vpop.f32.mrb[34].mxu0 }
 0x141   : > { %v2358_v20 = vadd.f32 %v2357_v37, %v2356_v17  ;;  %v2359_v21 = vpop.f32.mrb[34].mxu1  ;;  %v2296_v34 = vpop.f32.mrb[35].mxu0 }
 0x142   : > { %v2360_v16 = vpop.f32.mrb[35].mxu1  ;;  %v1417_v35 = vadd.f32 %v2294_v29, %v3129_v24  ;;  %v2297_v36 = vadd.f32 %v2296_v34, %v2295_v32 }
 0x143   : > { %v2361_v25 = vadd.f32 %v2360_v16, %v2359_v21 }
 0x144   : > { %v1420_v19 = vadd.f32 %v2297_v36, %v3131_v28  ;;  %v3177_v42 = vadd.f32 %v2358_v20, %v1417_v35 }
 0x146   : > { %v2298_v45 = vpop.f32.mrb[36].mxu0  ;;  %v3179_v52 = vadd.f32 %v2361_v25, %v1420_v19 }
 0x147   : > { %v2362_v38 = vpop.f32.mrb[36].mxu1  ;;  %v2299_v53 = vpop.f32.mrb[37].mxu0 }
 0x148   : > { %v2363_v39 = vpop.f32.mrb[37].mxu1  ;;  %v2300_v54 = vadd.f32 %v2299_v53, %v2298_v45  ;;  %v2301_v57 = vpop.f32.mrb[38].mxu0 }
 0x149   : > { %v2364_v40 = vadd.f32 %v2363_v39, %v2362_v38  ;;  %v2365_v41 = vpop.f32.mrb[38].mxu1  ;;  %v2302_v58 = vpop.f32.mrb[39].mxu0 }
 0x14a   : > { %v2366_v44 = vpop.f32.mrb[39].mxu1  ;;  %v1425_v24 = vadd.f32 %v2300_v54, %v3135_v43  ;;  %v2303_v59 = vadd.f32 %v2302_v58, %v2301_v57 }
 0x14b   : > { %v2367_v46 = vadd.f32 %v2366_v44, %v2365_v41 }
 0x14c   : > { %v1428_v28 = vadd.f32 %v2303_v59, %v3137_v48  ;;  %v3183_v5 = vadd.f32 %v2364_v40, %v1425_v24 }
 0x14e   : > { %v2304_v9 = vpop.f32.mrb[40].mxu0  ;;  %v3185_v13 = vadd.f32 %v2367_v46, %v1428_v28 }
 0x14f   : > { %v2368_v61 = vpop.f32.mrb[40].mxu1  ;;  %v2305_v14 = vpop.f32.mrb[41].mxu0 }
 0x150   : > { %v2369_v62 = vpop.f32.mrb[41].mxu1  ;;  %v2306_v0 = vadd.f32 %v2305_v14, %v2304_v9  ;;  %v2307_v60 = vpop.f32.mrb[42].mxu0 }
 0x151   : > { %v2370_v1 = vadd.f32 %v2369_v62, %v2368_v61  ;;  %v2371_v4 = vpop.f32.mrb[42].mxu1  ;;  %v2308_v63 = vpop.f32.mrb[43].mxu0 }
 0x152   : > { %v2372_v6 = vpop.f32.mrb[43].mxu1  ;;  %v1433_v43 = vadd.f32 %v2306_v0, %v3141_v2  ;;  %v2309_v12 = vadd.f32 %v2308_v63, %v2307_v60 }
 0x153   : > { %v2373_v10 = vadd.f32 %v2372_v6, %v2371_v4 }
 0x154   : > { %v1436_v48 = vadd.f32 %v2309_v12, %v3143_v8  ;;  %v3189_v7 = vadd.f32 %v2370_v1, %v1433_v43 }
 0x156   : > { %v2310_v37 = vpop.f32.mrb[44].mxu0  ;;  %v3191_v20 = vadd.f32 %v2373_v10, %v1436_v48 }
 0x157   : > { %v2374_v15 = vpop.f32.mrb[44].mxu1  ;;  %v2311_v21 = vpop.f32.mrb[45].mxu0 }
 0x158   : > { %v2375_v31 = vpop.f32.mrb[45].mxu1  ;;  %v2312_v16 = vadd.f32 %v2311_v21, %v2310_v37  ;;  %v2313_v23 = vpop.f32.mrb[46].mxu0 }
 0x159   : > { %v2376_v47 = vadd.f32 %v2375_v31, %v2374_v15  ;;  %v2377_v50 = vpop.f32.mrb[46].mxu1  ;;  %v2314_v25 = vpop.f32.mrb[47].mxu0 }
 0x15a   : > { %v2378_v17 = vpop.f32.mrb[47].mxu1  ;;  %v1441_v2 = vadd.f32 %v2312_v16, %v3147_v30  ;;  %v2315_v27 = vadd.f32 %v2314_v25, %v2313_v23 }
 0x15b   : > { %v2379_v18 = vadd.f32 %v2378_v17, %v2377_v50 }
 0x15c   : > { %v1444_v8 = vadd.f32 %v2315_v27, %v3149_v3  ;;  %v3195_v36 = vadd.f32 %v2376_v47, %v1441_v2 }
 0x15e   : > { %v2316_v39 = vpop.f32.mrb[48].mxu0  ;;  %v3197_v40 = vadd.f32 %v2379_v18, %v1444_v8 }
 0x15f   : > { %v2380_v29 = vpop.f32.mrb[48].mxu1  ;;  %v2317_v41 = vpop.f32.mrb[49].mxu0 }
 0x160   : > { %v2381_v32 = vpop.f32.mrb[49].mxu1  ;;  %v2318_v44 = vadd.f32 %v2317_v41, %v2316_v39  ;;  %v2319_v45 = vpop.f32.mrb[50].mxu0 }
 0x161   : > { %v2382_v34 = vadd.f32 %v2381_v32, %v2380_v29  ;;  %v2383_v35 = vpop.f32.mrb[50].mxu1  ;;  %v2320_v46 = vpop.f32.mrb[51].mxu0 }
 0x162   : > { %v2384_v38 = vpop.f32.mrb[51].mxu1  ;;  %v1449_v30 = vadd.f32 %v2318_v44, %v3153_v26  ;;  %v2321_v53 = vadd.f32 %v2320_v46, %v2319_v45 }
 0x163   : > { %v2385_v19 = vadd.f32 %v2384_v38, %v2383_v35 }
 0x164   : > { %v1452_v3 = vadd.f32 %v2321_v53, %v3155_v33  ;;  %v1546_v59 = vadd.f32 %v2382_v34, %v1449_v30 }
 0x166   : > { %v2322_v62 = vpop.f32.mrb[52].mxu0  ;;  %v1549_v1 = vadd.f32 %v2385_v19, %v1452_v3 }
 0x167   : > { %v2386_v54 = vpop.f32.mrb[52].mxu1  ;;  %v2323_v4 = vpop.f32.mrb[53].mxu0 }
 0x168   : > { %v2387_v57 = vpop.f32.mrb[53].mxu1  ;;  %v2324_v6 = vadd.f32 %v2323_v4, %v2322_v62  ;;  %v2325_v9 = vpop.f32.mrb[54].mxu0 }
 0x169   : > { %v2388_v58 = vadd.f32 %v2387_v57, %v2386_v54  ;;  %v2389_v24 = vpop.f32.mrb[54].mxu1  ;;  %v2326_v10 = vpop.f32.mrb[55].mxu0 }
 0x16a   : > { %v2390_v61 = vpop.f32.mrb[55].mxu1  ;;  %v1457_v14 = vadd.f32 %v2324_v6, %v3159_v51  ;;  %v2327_v26 = vadd.f32 %v2326_v10, %v2325_v9 }
 0x16b   : > { %v2391_v28 = vadd.f32 %v2390_v61, %v2389_v24 }
 0x16c   : > { %v1460_v63 = vadd.f32 %v2327_v26, %v3161_v55  ;;  %v1554_v12 = vadd.f32 %v2388_v58, %v1457_v14 }
 0x16e   : > { %v2328_v31 = vpop.f32.mrb[56].mxu0  ;;  %v1557_v47 = vadd.f32 %v2391_v28, %v1460_v63 }
 0x16f   : > { %v2392_v0 = vpop.f32.mrb[56].mxu1  ;;  %v2329_v50 = vpop.f32.mrb[57].mxu0 }
 0x170   : > { %v2393_v60 = vpop.f32.mrb[57].mxu1  ;;  %v2330_v17 = vadd.f32 %v2329_v50, %v2328_v31  ;;  %v2331_v37 = vpop.f32.mrb[58].mxu0 }
 0x171   : > { %v2394_v33 = vadd.f32 %v2393_v60, %v2392_v0  ;;  %v2395_v43 = vpop.f32.mrb[58].mxu1  ;;  %v2332_v18 = vpop.f32.mrb[59].mxu0 }
 0x172   : > { %v2396_v15 = vpop.f32.mrb[59].mxu1  ;;  %v1465_v51 = vadd.f32 %v2330_v17, %v3165_v11  ;;  %v2333_v21 = vadd.f32 %v2332_v18, %v2331_v37 }
 0x173   : > { %v2397_v48 = vadd.f32 %v2396_v15, %v2395_v43 }
 0x174   : > { %v1468_v55 = vadd.f32 %v2333_v21, %v3167_v49  ;;  %v1562_v27 = vadd.f32 %v2394_v33, %v1465_v51 }
 0x176   : > { %v2334_v32 = vpop.f32.mrb[60].mxu0  ;;  %v1565_v34 = vadd.f32 %v2397_v48, %v1468_v55 }
 0x177   : > { %v2398_v16 = vpop.f32.mrb[60].mxu1  ;;  %v2335_v35 = vpop.f32.mrb[61].mxu0 }
 0x178   : > { %v2399_v23 = vpop.f32.mrb[61].mxu1  ;;  %v2336_v38 = vadd.f32 %v2335_v35, %v2334_v32  ;;  %v2337_v39 = vpop.f32.mrb[62].mxu0 }
 0x179   : > { %v2400_v25 = vadd.f32 %v2399_v23, %v2398_v16  ;;  %v2401_v2 = vpop.f32.mrb[62].mxu1  ;;  %v2338_v19 = vpop.f32.mrb[63].mxu0 }
 0x17a   : > { %v2402_v29 = vpop.f32.mrb[63].mxu1  ;;  %v1473_v11 = vadd.f32 %v2336_v38, %v3171_v56  ;;  %v2339_v41 = vadd.f32 %v2338_v19, %v2337_v39 }
 0x17b   : > { %v2403_v8 = vadd.f32 %v2402_v29, %v2401_v2 }
 0x17c   : > { %v1476_v46 = vadd.f32 %v2339_v41, %v3173_v22  ;;  %v1570_v54 = vadd.f32 %v2400_v25, %v1473_v11 }
 0x17e   : > { %v2438_v58 = vpop.f32.mrb[64].mxu0  ;;  %v1573_v24 = vadd.f32 %v2403_v8, %v1476_v46 }
 0x17f   : > { %v2446_v44 = vpop.f32.mrb[64].mxu1  ;;  %v1619_v22 = vadd.f32 %v2438_v58, %v3183_v5 }
 0x180   : > { %v3208_v45 = vadd.f32 %v2446_v44, %v1554_v12  ;;  %v1642_v49 = vpop.f32.mrb[65].mxu1 }
 0x181   : > { %v3211_v30 = vadd.f32 %v1642_v49, %v1546_v59  ;;  %v2447_v53 = vpop.f32.mrb[66].mxu1  ;;  %v1610_v59 = vpop.f32.mrb[65].mxu0  ;;  %v1776_v15 = vmul.f32 %v1619_v22, %v1619_v22 }
 0x182   : > { %v3213_v57 = vadd.f32 %v2447_v53, %v1557_v47  ;;  %v1645_v3 = vpop.f32.mrb[67].mxu1  ;;  %v1611_v62 = vadd.f32 %v1610_v59, %v3177_v42  ;;  %v2439_v28 = vpop.f32.mrb[66].mxu0  ;;  %v1784_v58 = vmul.f32 %v3208_v45, %v3208_v45 }
 0x183   : > { %v3220_v56 = vadd.f32 %v1645_v3, %v1549_v1  ;;  %v1622_v6 = vadd.f32 %v2439_v28, %v3185_v13  ;;  %v1613_v9 = vpop.f32.mrb[67].mxu0  ;;  %v1782_v49 = vmul.f32 %v3211_v30, %v3211_v30 }
 0x184   : > { %v2129_v61 = vpack.c.bf16 %v3213_v57, %v3208_v45  ;;  %v1614_v1 = vadd.f32 %v1613_v9, %v3179_v52  ;;  %v1774_v10 = vmul.f32 %v1611_v62, %v1611_v62  ;;  %v1785_v59 = vmul.f32 %v3213_v57, %v3213_v57 }
 0x185   : > { %v2124_v4 = vpack.c.bf16 %v3220_v56, %v3211_v30  ;;  %v2109_v14 = vpack.c.bf16 %v1622_v6, %v1619_v22  ;;  %v1777_v50 = vmul.f32 %v1622_v6, %v1622_v6  ;;  %v1783_v53 = vmul.f32 %v3220_v56, %v3220_v56 }
 0x186   : > { %2145 = vst [vmem:[%s3218_s20 + $0x28] sm:$0xff] %v2129_v61   ;;  %v2104_v42 = vpack.c.bf16 %v1614_v1, %v1611_v62  ;;  %v1753_v60 = vadd.f32 %v1614_v1, %v1611_v62  ;;  %v1775_v63 = vmul.f32 %v1614_v1, %v1614_v1  ;;  %v2442_v48 = vpop.f32.mrb[68].mxu0 }
 0x187   : > { %2144 = vst [vmem:[%s3218_s20 + $0x20] sm:$0xff] %v2124_v4   ;;  %v2450_v5 = vpop.f32.mrb[68].mxu1  ;;  %2141 = vst [vmem:[%s3218_s20 + $0x8] sm:$0xff] %v2109_v14   ;;  %v1635_v17 = vadd.f32 %v2442_v48, %v3195_v36  ;;  %v1626_v37 = vpop.f32.mrb[69].mxu0 }
 0x188   : > { %v3232_v26 = vadd.f32 %v2450_v5, %v1570_v54  ;;  %v1658_v0 = vpop.f32.mrb[69].mxu1  ;;  %2105 = vst [vmem:[%s3218_s20] sm:$0xff] %v2104_v42   ;;  %v1754_v52 = vadd.f32 %v1753_v60, %v1619_v22  ;;  %v1790_v31 = vadd.f32 %v1775_v63, %v1774_v10  ;;  %v1627_v21 = vadd.f32 %v1626_v37, %v3189_v7  ;;  %v2443_v23 = vpop.f32.mrb[70].mxu0 }
 0x189   : > { %v1659_v33 = vadd.f32 %v1658_v0, %v1562_v27  ;;  %v2451_v43 = vpop.f32.mrb[70].mxu1  ;;  %v1638_v25 = vadd.f32 %v2443_v23, %v3197_v40  ;;  %v1629_v2 = vpop.f32.mrb[71].mxu0  ;;  %v1780_v39 = vmul.f32 %v1635_v17, %v1635_v17 }
 0x18a   : > { %v1670_v12 = vadd.f32 %v2451_v43, %v1573_v24  ;;  %v1661_v13 = vpop.f32.mrb[71].mxu1  ;;  %v1791_v51 = vadd.f32 %v1790_v31, %v1776_v15  ;;  %v1755_v16 = vadd.f32 %v1754_v52, %v1622_v6  ;;  %v1778_v29 = vmul.f32 %v1627_v21, %v1627_v21 }
 0x18b   : > { %v1662_v47 = vadd.f32 %v1661_v13, %v1565_v34  ;;  %v1630_v36 = vadd.f32 %v1629_v2, %v3191_v20  ;;  %v2119_v8 = vpack.c.bf16 %v1638_v25, %v1635_v17  ;;  %v1781_v41 = vmul.f32 %v1638_v25, %v1638_v25 }
 0x18c   : > { %v2139_v18 = vpack.c.bf16 %v1670_v12, %v3232_v26  ;;  %v1756_v27 = vadd.f32 %v1755_v16, %v1627_v21  ;;  %v1792_v32 = vadd.f32 %v1791_v51, %v1777_v50  ;;  %v1789_v10 = vmul.f32 %v1670_v12, %v1670_v12 }
 0x18d   : > { %v2134_v55 = vpack.c.bf16 %v1662_v47, %v1659_v33  ;;  %v2114_v35 = vpack.c.bf16 %v1630_v36, %v1627_v21  ;;  %v1779_v7 = vmul.f32 %v1630_v36, %v1630_v36  ;;  %2143 = vst [vmem:[%s3218_s20 + $0x18] sm:$0xff] %v2119_v8   ;;  %v1787_v9 = vmul.f32 %v1662_v47, %v1662_v47 }
 0x18e   : > { %2147 = vst [vmem:[%s3218_s20 + $0x38] sm:$0xff] %v2139_v18   ;;  %v1793_v34 = vadd.f32 %v1792_v32, %v1778_v29  ;;  %v1757_v38 = vadd.f32 %v1756_v27, %v1630_v36 }
 0x18f   : > { %2146 = vst [vmem:[%s3218_s20 + $0x30] sm:$0xff] %v2134_v55   ;;  %2142 = vst [vmem:[%s3218_s20 + $0x10] sm:$0xff] %v2114_v35  }
 0x190   : > { %v1758_v19 = vadd.f32 %v1757_v38, %v1635_v17  ;;  %v1794_v11 = vadd.f32 %v1793_v34, %v1779_v7 }
 0x192   : > { %v1759_v40 = vadd.f32 %v1758_v19, %v1638_v25  ;;  %v1795_v44 = vadd.f32 %v1794_v11, %v1780_v39 }
 0x194   : > { %v1760_v46 = vadd.f32 %v1759_v40, %v3211_v30  ;;  %v1796_v20 = vadd.f32 %v1795_v44, %v1781_v41  ;;  %v1786_v30 = vmul.f32 %v1659_v33, %v1659_v33 }
 0x196   : > { %v1797_v54 = vadd.f32 %v1796_v20, %v1782_v49  ;;  %v1761_v3 = vadd.f32 %v1760_v46, %v3220_v56  ;;  %v1788_v56 = vmul.f32 %v3232_v26, %v3232_v26 }
 0x198   : > { %v1762_v24 = vadd.f32 %v1761_v3, %v3208_v45  ;;  %v1798_v22 = vadd.f32 %v1797_v54, %v1783_v53 }
 0x19a   : > { %v1763_v61 = vadd.f32 %v1762_v24, %v3213_v57  ;;  %v1799_v62 = vadd.f32 %v1798_v22, %v1784_v58 }
 0x19c   : > { %v1764_v28 = vadd.f32 %v1763_v61, %v1659_v33  ;;  %v1800_v4 = vadd.f32 %v1799_v62, %v1785_v59 }
 0x19e   : > { %v1765_v6 = vadd.f32 %v1764_v28, %v1662_v47  ;;  %v1801_v1 = vadd.f32 %v1800_v4, %v1786_v30 }
 0x1a0   : > { %v1766_v45 = vadd.f32 %v1765_v6, %v3232_v26  ;;  %v1802_v5 = vadd.f32 %v1801_v1, %v1787_v9 }
 0x1a2   : > { %v1767_v14 = vadd.f32 %v1766_v45, %v1670_v12  ;;  %v1803_v0 = vadd.f32 %v1802_v5, %v1788_v56 }
 0x1a4   : > { %v1768_v42 = vrot.slane %v1767_v14, 4  ;;  %v1804_v57 = vadd.f32 %v1803_v0, %v1789_v10 }
 0x1a6   : > { %v1769_v60 = vadd.f32 %v1768_v42, %v1767_v14  ;;  %v1805_v63 = vrot.slane %v1804_v57, 4 }
 0x1a8   : > { %v1770_v33 = vrot.slane %v1769_v60, 2  ;;  %v1806_v43 = vadd.f32 %v1805_v63, %v1804_v57 }
 0x1aa   : > { %v1771_v13 = vadd.f32 %v1770_v33, %v1769_v60  ;;  %v1807_v15 = vrot.slane %v1806_v43, 2 }
 0x1ac   : > { %v1772_v52 = vrot.slane %v1771_v13, 1  ;;  %v1808_v31 = vadd.f32 %v1807_v15, %v1806_v43 }
 0x1ae   : > { %v1809_v48 = vrot.slane %v1808_v31, 1  ;;  %v1773_v26 = vadd.f32 %v1772_v52, %v1771_v13 }
 0x1b0   : > { %v1810_v47 = vadd.f32 %v1809_v48, %v1808_v31 }
 0x1b2   : > { %v1812_v12 = vsel %vm1811_vm2, %v1773_v26, %v1810_v47 }
 0x1b3   : > { %v1814_v50 = vsel %vm1813_vm3, %v1812_v12, 0.0 }
 0x1b4   : > { %1815 = vst [vmem:[%s311_s9] sm:$0xff] %v1814_v50 }
 0x1b5 PF: > { %s17_s25 = sadd.s32 1, %s2640_s25   ;;  %s3287_s21 = smov %s2632_s23 }
 0x1b6   : > { %p14_p8 = scmp.ge.s32.totalorder %s17_s25, 6   ;;  %s3288_s22 = smov %s2636_s24 }
 0x1b7   : > { %s3289_s23 = smov %s3292_s3  ;;  %s3290_s24 = smov %s3296_s4 }
 0x1b8   :  { %16 = sbr.rel (!%p14_p8) target bundleno = 3 (0x3), region = 82 }

// kernel: double_conv.4
= control target key start
LH: loop header
LB: loop body
LE: loop exit
PB: predicated region body
PF: predicated region fallthrough
CT: control target
= control target key end

     0   :  { %s3021_s21 = smov 0   ;;  %s3023_s22 = smov 0   ;;  %s4172_s0 = inlined_call_operand.vmem [shape: bf16[2,2,10,18,128], index: 0, kind: input, shape index: {}]   ;;  %s4173_s1 = inlined_call_operand.vmem [shape: bf16[1152,128], index: 1, kind: input, shape index: {}]   ;;  %s4174_s2 = inlined_call_operand.vmem [shape: f32[1,128], index: 2, kind: input, shape index: {}]   ;;  %s4175_s3 = inlined_call_operand.vmem [shape: f32[1,128], index: 3, kind: input, shape index: {}]   ;;  %s4176_s4 = inlined_call_operand.vmem [shape: f32[1,128], index: 4, kind: input, shape index: {}]   ;;  %s4177_s5 = inlined_call_operand.vmem [shape: bf16[2,16,16,128], index: 5, kind: output, shape index: {0}]   ;;  %s4178_s6 = inlined_call_operand.vmem [shape: f32[2,2,8,128], index: 6, kind: output, shape index: {1}]  }
   0x1   :  { %s3025_s23 = smov 0   ;;  %s3027_s24 = smov 0  }
   0x2   :  { %s3029_s25 = smov 0  }
   0x3 LB: > { %s26_s26 = sadd.s32 1, %s2976_s23  ;;  %s29_s27 = sadd.s32 1, %s2980_s24  ;;  %s2984_s25 = sphi %s3029_s25, %s17_s25   ;;  %s2980_s24 = sphi %s3027_s24, %s4279_s24   ;;  %s2976_s23 = sphi %s3025_s23, %s4278_s23   ;;  %s2972_s22 = sphi %s3023_s22, %s4277_s22   ;;  %s2968_s21 = sphi %s3021_s21, %s4276_s21  }
   0x4   : > { %p27_p0 = scmp.ge.s32.totalorder %s26_s26, 2  ;;  %p2251_p1 = scmp.ge.s32.totalorder %s2984_s25, 1 }
   0x5   : > { %p237_p2 = scmp.lt.s32.totalorder %s2984_s25, 5 }
   0x6   : > { %s4281_s26 = smov (%p27_p0, %s26_s26), 0  ;;  %s4283_s27 = smov (!%p27_p0, %s29_s27), %s2980_s24 }
   0x7   : > { %p238_p3 = pnand %p2251_p1, %p237_p2  ;;  %p31_p4 = scmp.ge.s32.totalorder %s4283_s27, 2 }
   0x8   : > { %v2874_v0 = vld [vmem:[%s4173_s1 + $0x40] sm:$0xff] (!%p238_p3)   ;;  %v2878_v4 = vld [vmem:[%s4173_s1 + $0x48] sm:$0xff] (!%p238_p3)   ;;  %p284_p5 = scmp.lt.s32.totalorder (!%p238_p3), %s2972_s22, 1  ;;  %v2882_v8 = vld [vmem:[%s4173_s1 + $0x50] sm:$0xff] (!%p238_p3)   ;;  %p286_p6 = scmp.lt.s32.totalorder (!%p238_p3), %s2968_s21, 1  ;;  %v488_v17 = vlaneseq (!%p238_p3)  ;;  %vm4182_vm10 = vcmask (!%p238_p3), 1046528  }
   0x9   : > { %s4285_s27 = smov (%p31_p4, %s4283_s27), 0  ;;  %241 = sbr.rel (%p238_p3) target bundleno = 439 (0x1b7), region = 40 }
   0xa   : > { %v2875_v1 = vld [vmem:[%s4173_s1 + $0xc0] sm:$0xff] (!%p238_p3)   ;;  %2512 = vmatprep.subr.bf16.mxu0 (!%p238_p3), %v2874_v0  ;;  %v2879_v5 = vld [vmem:[%s4173_s1 + $0xc8] sm:$0xff] (!%p238_p3)   ;;  %v2883_v9 = vld [vmem:[%s4173_s1 + $0xd0] sm:$0xff] (!%p238_p3)   ;;  %s3126_s14 = sshll.u32 (!%p238_p3), %s2968_s21, 3  ;;  %v3131_v22 = vshrl.u32 (!%p238_p3), %v488_v17, 7 }
   0xb   : > { %v2876_v2 = vld [vmem:[%s4173_s1] sm:$0xff] (!%p238_p3)   ;;  %2576 = vmatprep.subr.bf16.mxu1 (!%p238_p3), %v2875_v1  ;;  %v2880_v6 = vld [vmem:[%s4173_s1 + $0x8] sm:$0xff] (!%p238_p3)   ;;  %v2884_v10 = vld [vmem:[%s4173_s1 + $0x10] sm:$0xff] (!%p238_p3)   ;;  %v3140_v25 = vstv (!%p238_p3), %s3126_s14  ;;  %vm4181_vm15 = vsmask.f32 (!%p238_p3), 7424  ;;  %p296_p7 = scmp.lt.s32.totalorder (!%p238_p3), %s3126_s14, 15 }
   0xc   : > { %v2877_v3 = vld [vmem:[%s4173_s1 + $0x80] sm:$0xff] (!%p238_p3)   ;;  %2513 = vmatpush3.bf16.msra.mxu0 (!%p238_p3), %v2876_v2  ;;  %v2881_v7 = vld [vmem:[%s4173_s1 + $0x88] sm:$0xff] (!%p238_p3)   ;;  %v2885_v11 = vld [vmem:[%s4173_s1 + $0x90] sm:$0xff] (!%p238_p3)   ;;  %v3149_v28 = vadd.s32 (!%p238_p3), 16, %v3131_v22  ;;  %vm492_vm0 = vcmp.ge.s32.totalorder (!%p238_p3), %v3140_v25, 1  ;;  %vm502_vm1 = vcmp.le.s32.totalorder (!%p238_p3), %v3140_v25, 16 }
   0xd   : > { %2577 = vmatpush3.bf16.msra.mxu1 (!%p238_p3), %v2877_v3  ;;  %2514 = vmatprep.subr.bf16.mxu0 (!%p238_p3), %v2878_v4  ;;  %v2886_v12 = vld [vmem:[%s4173_s1 + $0x58] sm:$0xff] (!%p238_p3)   ;;  %v2890_v16 = vld [vmem:[%s4173_s1 + $0x60] sm:$0xff] (!%p238_p3)   ;;  %v2894_v21 = vld [vmem:[%s4173_s1 + $0x68] sm:$0xff] (!%p238_p3)   ;;  %v479_v32 = vadd.s32 (!%p238_p3), 1, %v3140_v25  ;;  %vm522_vm2 = vcmp.ge.s32.totalorder (!%p238_p3), %v3131_v22, 1  ;;  %v3180_v36 = vadd.s32 (!%p238_p3), 2, %v3140_v25 }
   0xe   : > { %2578 = vmatprep.subr.bf16.mxu1 (!%p238_p3), %v2879_v5  ;;  %v2887_v13 = vld [vmem:[%s4173_s1 + $0xd8] sm:$0xff] (!%p238_p3)   ;;  %v2891_v18 = vld [vmem:[%s4173_s1 + $0xe0] sm:$0xff] (!%p238_p3)   ;;  %v2895_v23 = vld [vmem:[%s4173_s1 + $0xe8] sm:$0xff] (!%p238_p3)   ;;  %vm4180_vm3 = vcmp.le.s32.totalorder (!%p238_p3), %v3149_v28, 16  ;;  %v3193_v41 = vadd.s32 (!%p238_p3), 3, %v3140_v25  ;;  %v3218_v54 = vadd.s32 (!%p238_p3), 4, %v3140_v25 }
   0xf   : > { %v2888_v14 = vld [vmem:[%s4173_s1 + $0x18] sm:$0xff] (!%p238_p3)   ;;  %v2892_v19 = vld [vmem:[%s4173_s1 + $0x20] sm:$0xff] (!%p238_p3)   ;;  %v2896_v24 = vld [vmem:[%s4173_s1 + $0x28] sm:$0xff] (!%p238_p3)   ;;  %vm493_vm4 = vcmp.ge.s32.totalorder (!%p238_p3), %v479_v32, 1  ;;  %vm503_vm5 = vcmp.le.s32.totalorder (!%p238_p3), %v479_v32, 16  ;;  %vm494_vm7 = vcmp.ge.s32.totalorder (!%p238_p3), %v3180_v36, 1 }
  0x10   : > { %2515 = vmatpush3.bf16.msra.mxu0 %v2880_v6  ;;  %s4287_s22 = smov (!%p284_p5, %s2972_s22), 1  ;;  %v2889_v15 = vld [vmem:[%s4173_s1 + $0x98] sm:$0xff]   ;;  %v2893_v20 = vld [vmem:[%s4173_s1 + $0xa0] sm:$0xff]   ;;  %v2897_v26 = vld [vmem:[%s4173_s1 + $0xa8] sm:$0xff]   ;;  %vm504_vm8 = vcmp.le.s32.totalorder %v3180_v36, 16  ;;  %vm495_vm11 = vcmp.ge.s32.totalorder %v3193_v41, 1 }
  0x11   : > { %2579 = vmatpush3.bf16.msra.mxu1 %v2881_v7  ;;  %2516 = vmatprep.subr.bf16.mxu0 %v2882_v8  ;;  %s3100_s13 = scalar_select %p286_p6, %s2968_s21, 1  ;;  %v2898_v27 = vld [vmem:[%s4173_s1 + $0x70] sm:$0xff]   ;;  %v2902_v33 = vld [vmem:[%s4173_s1 + $0x78] sm:$0xff]   ;;  %v3190_v40 = vld [vmem:[%s4175_s3] ss:$0 sm:$0xff]  ;;  %vm505_vm12 = vcmp.le.s32.totalorder %v3193_v41, 16 }
  0x12   : > { %2580 = vmatprep.subr.bf16.mxu1 %v2883_v9  ;;  %s2833_s20 = smul.u32 60, %s4287_s22  ;;  %v2899_v29 = vld [vmem:[%s4173_s1 + $0xf0] sm:$0xff]   ;;  %v2903_v34 = vld [vmem:[%s4173_s1 + $0xf8] sm:$0xff]   ;;  %v3198_v45 = vld [vmem:[%s4176_s4] ss:$0 sm:$0xff]  ;;  %v3230_v58 = vadd.s32 5, %v3140_v25 }
  0x13   : > { %s2832_s30 = smul.u32 30, %s3100_s13  ;;  %v2900_v30 = vld [vmem:[%s4173_s1 + $0x30] sm:$0xff]   ;;  %v2904_v35 = vld [vmem:[%s4173_s1 + $0x38] sm:$0xff]   ;;  %vm3205_vm6 = vmand %vm492_vm0, %vm502_vm1  ;;  %v3233_v59 = vadd.s32 6, %v3140_v25  ;;  %v3249_v2 = vadd.s32 7, %v3140_v25  ;;  %s4289_s14 = smov (!%p296_p7, %s3126_s14), 15 }
  0x14   : > { %2517 = vmatpush3.bf16.msra.mxu0 %v2884_v10  ;;  %v2901_v31 = vld [vmem:[%s4173_s1 + $0xb0] sm:$0xff]   ;;  %v2905_v37 = vld [vmem:[%s4173_s1 + $0xb8] sm:$0xff]   ;;  %v2906_v53 = vld [vmem:[%s4173_s1 + $0x140] sm:$0xff]   ;;  %s2255_s21 = sshll.u32 %s4287_s22, 5 }
  0x15   : > { %2581 = vmatpush3.bf16.msra.mxu1 %v2885_v11  ;;  %2518 = vmatprep.subr.bf16.mxu0 %v2886_v12  ;;  %s290_s17 = sadd.s32 %s2833_s20, %s2832_s30  ;;  %vm3223_vm9 = vmand %vm493_vm4, %vm503_vm5  ;;  %v2907_v41 = vld [vmem:[%s4173_s1 + $0x100] sm:$0xff]  }
  0x16   : > { %2582 = vmatprep.subr.bf16.mxu1 %v2887_v13  ;;  %s2252_s20 = sshll.u32 %s290_s17, 2  ;;  %vm3242_vm13 = vmand %vm3205_vm6, %vm522_vm2 }
  0x17   : > { %s3173_s7 = scalar_lea.vmem %s4172_s0, %s2252_s20  ;;  %vm3255_vm14 = vmand %vm3205_vm6, %vm4180_vm3  ;;  %s2257_s20 = sshll.u32 %s4287_s22, 1 }
  0x18   : > { %2519 = vmatpush3.bf16.msra.mxu0 %v2888_v14  ;;  %v2442_v38 = vld [vmem:[%s3173_s7] sm:$0xff]   ;;  %v315_v39 = vld [vmem:[%s3173_s7 + $0x8] sm:$0x1]  ;;  %v316_v46 = vld [vmem:[%s3173_s7 + $0xc] sm:$0xff]   ;;  %s309_s11 = sadd.s32 %s2257_s20, %s3100_s13 }
  0x19   : > { %2583 = vmatpush3.bf16.msra.mxu1 %v2889_v15  ;;  %2520 = vmatprep.subr.bf16.mxu0 %v2890_v16  ;;  %v2443_v42 = vunpack.c.l.bf16 %v2442_v38  ;;  %v2444_v43 = vunpack.c.h.bf16 %v2442_v38  ;;  %v345_v44 = vunpack.c.l.bf16 %v315_v39  ;;  %v346_v48 = vunpack.c.l.bf16 %v316_v46  ;;  %v318_v0 = vld [vmem:[%s3173_s7 + $0x14] sm:$0x1]  ;;  %v2501_v1 = vld [vmem:[%s3173_s7 + $0x18] sm:$0xff]   ;;  %vm3265_vm0 = vmand %vm3223_vm9, %vm522_vm2  ;;  %s2258_s12 = sshll.u32 %s309_s11, 3 }
  0x1a   : > { %2584 = vmatprep.subr.bf16.mxu1 %v2891_v18  ;;  %v347_v49 = vunpack.c.h.bf16 %v316_v46  ;;  %v348_v6 = vunpack.c.l.bf16 %v318_v0  ;;  %v2447_v7 = vunpack.c.l.bf16 %v2501_v1  ;;  %v2448_v12 = vunpack.c.h.bf16 %v2501_v1  ;;  %vm4179_vm1 = vmpackc.low %vm3223_vm9, %vm3265_vm0  ;;  %v321_v39 = vld [vmem:[%s3173_s7 + $0x20] sm:$0x1]  ;;  %v322_v46 = vld [vmem:[%s3173_s7 + $0x24] sm:$0xff]   ;;  %s311_s17 = scalar_lea.vmem %s4178_s6, %s2258_s12 }
  0x1b   : > { %v380_v50 = vmul.f32 %v2443_v42, %v3190_v40  ;;  %v381_v51 = vmul.f32 %v2444_v43, %v3190_v40  ;;  %v382_v52 = vmul.f32 %v3190_v40, %v345_v44  ;;  %v383_v55 = vmul.f32 %v3190_v40, %v346_v48  ;;  %vm3297_vm4 = vmand %vm494_vm7, %vm504_vm8  ;;  %v2911_v48 = vld [vmem:[%s4173_s1 + $0x1c0] sm:$0xff]  }
  0x1c   : > { %2521 = vmatpush3.bf16.msra.mxu0 %v2892_v19  ;;  %v384_v56 = vmul.f32 %v3190_v40, %v347_v49  ;;  %v385_v15 = vmul.f32 %v3190_v40, %v348_v6  ;;  %v386_v16 = vmul.f32 %v2447_v7, %v3190_v40  ;;  %vm3305_vm5 = vmand %vm3223_vm9, %vm4180_vm3  ;;  %v2913_v0 = vld [vmem:[%s4173_s1 + $0x180] sm:$0xff]   ;;  %vm497_vm7 = vcmp.ge.s32.totalorder %v3230_v58, 1  ;;  %v2941_v7 = vld [vmem:[%s4173_s1 + $0x218] sm:$0xff]  }
  0x1d   : > { %2585 = vmatpush3.bf16.msra.mxu1 %v2893_v20  ;;  %2522 = vmatprep.subr.bf16.mxu0 %v2894_v21  ;;  %v417_v60 = vadd.f32 %v3198_v45, %v380_v50  ;;  %v418_v61 = vadd.f32 %v3198_v45, %v381_v51  ;;  %v419_v62 = vadd.f32 %v3198_v45, %v382_v52  ;;  %vm507_vm8 = vcmp.le.s32.totalorder %v3230_v58, 16 }
  0x1e   : > { %2586 = vmatprep.subr.bf16.mxu1 %v2895_v23  ;;  %v420_v4 = vadd.f32 %v3198_v45, %v383_v55  ;;  %v421_v5 = vadd.f32 %v3198_v45, %v384_v56  ;;  %v423_v51 = vadd.f32 %v3198_v45, %v386_v16 }
  0x1f   : > { %v447_v8 = vmax.f32 %v417_v60, 0.0  ;;  %v448_v9 = vmax.f32 %v418_v61, 0.0  ;;  %v449_v10 = vmax.f32 %v419_v62, 0.0  ;;  %v2921_v62 = vld [vmem:[%s4173_s1 + $0x190] sm:$0xff]  }
  0x20   : > { %2523 = vmatpush3.bf16.msra.mxu0 %v2896_v24  ;;  %v450_v13 = vmax.f32 %v420_v4, 0.0  ;;  %v451_v14 = vmax.f32 %v421_v5, 0.0  ;;  %v453_v4 = vmax.f32 %v423_v51, 0.0 }
  0x21   : > { %2587 = vmatpush3.bf16.msra.mxu1 %v2897_v26  ;;  %2524 = vmatprep.subr.bf16.mxu0 %v2898_v27  ;;  %v648_v17 = vsel %vm3242_vm13, %v447_v8, 0.0  ;;  %v649_v18 = vsel %vm3205_vm6, %v448_v9, 0.0  ;;  %v650_v19 = vsel %vm3255_vm14, %v449_v10, 0.0  ;;  %v3277_v20 = vpack.c.bf16 %v448_v9, %v447_v8  ;;  %vm3330_vm14 = vmand %vm3297_vm4, %vm522_vm2 }
  0x22   : > { %2588 = vmatprep.subr.bf16.mxu1 %v2899_v29  ;;  %v678_v21 = vpack.c.bf16 %v649_v18, %v648_v17  ;;  %v679_v23 = vpack.c.bf16 %v650_v19, %v650_v19  ;;  %v651_v24 = vsel %vm3265_vm0, %v450_v13, 0.0  ;;  %v652_v26 = vsel %vm3223_vm9, %v451_v14, 0.0  ;;  %v2908_v17 = vld [vmem:[%s4173_s1 + $0x148] sm:$0xff]  }
  0x23   : > { %v3287_v27 = vpack.c.bf16 %v652_v26, %v651_v24  ;;  %v3289_v29 = vpack.c.bf16 %v451_v14, %v450_v13  ;;  %v351_v8 = vunpack.c.l.bf16 %v321_v39  ;;  %v352_v9 = vunpack.c.l.bf16 %v322_v46  ;;  %v2909_v24 = vld [vmem:[%s4173_s1 + $0x108] sm:$0xff]  }
  0x24   : > { %2525 = vmatpush3.bf16.msra.mxu0 %v2900_v30  ;;  %v422_v30 = vadd.f32 %v3198_v45, %v385_v15  ;;  %v820_v38 = vrot.slane %v678_v21, 1  ;;  %v821_v43 = vrot.slane %v679_v23, 1  ;;  %v353_v10 = vunpack.c.h.bf16 %v322_v46 }
  0x25   : > { %2589 = vmatpush3.bf16.msra.mxu1 %v2901_v31  ;;  %2526 = vmatprep.subr.bf16.mxu0 %v2902_v33  ;;  %v387_v31 = vmul.f32 %v2448_v12, %v3190_v40  ;;  %v700_v33 = vshrl.u32 %v678_v21, 16  ;;  %v712_v42 = vshrl.u32 %v3287_v27, 16  ;;  %v714_v36 = vshll.u32 %v3287_v27, 16  ;;  %v324_v12 = vld [vmem:[%s3173_s7 + $0x2c] sm:$0x1] }
  0x26   : > { %2590 = vmatprep.subr.bf16.mxu1 %v2903_v34  ;;  %v702_v34 = vshll.u32 %v678_v21, 16  ;;  %2361 = vmatprep.mubr.msk.bf16.mxu1 %vm4179_vm1, %v3289_v29  ;;  %v452_v44 = vmax.f32 %v422_v30, 0.0  ;;  %v822_v55 = vsel %vm4182_vm10, %v820_v38, %v821_v43  ;;  %v823_v61 = vrot.slane %v3287_v27, 1  ;;  %vm3342_vm1 = vmand %vm495_vm11, %vm505_vm12  ;;  %v2502_v27 = vld [vmem:[%s3173_s7 + $0x30] sm:$0xff]  }
  0x27   : > { %v424_v52 = vadd.f32 %v3198_v45, %v387_v31  ;;  %v716_v60 = vrot.slane %v714_v36, 1  ;;  %vm3360_vm11 = vmpackc.low %vm3297_vm4, %vm3330_vm14  ;;  %v654_v15 = vsel %vm3330_vm14, %v453_v4, 0.0  ;;  %v388_v26 = vmul.f32 %v3190_v40, %v351_v8 }
  0x28   : > { %2527 = vmatpush3.bf16.msra.mxu0 %v2904_v35  ;;  %v707_v35 = vshll.u32 %v679_v23, 16  ;;  %v704_v49 = vrot.slane %v702_v34, 1  ;;  %v653_v56 = vsel %vm3305_vm5, %v452_v44, 0.0  ;;  %vm2335_vm5 = vmpackc.low %vm3205_vm6, %vm3242_vm13  ;;  %v389_v31 = vmul.f32 %v3190_v40, %v352_v9  ;;  %v2910_v34 = vld [vmem:[%s4173_s1 + $0x150] sm:$0xff]  }
  0x29   : > { %2591 = vmatpush3.bf16.msra.mxu1 %v2905_v37  ;;  %2640 = vmatprep.subr.bf16.mxu0 %v2906_v53  ;;  %v681_v3 = vpack.c.bf16 %v653_v56, %v653_v56  ;;  %v454_v5 = vmax.f32 %v424_v52, 0.0  ;;  %v717_v6 = vor.u32 %v716_v60, %v712_v42  ;;  %vm3377_vm12 = vmand %vm3342_vm1, %vm522_vm2  ;;  %v2915_v37 = vld [vmem:[%s4173_s1 + $0x1c8] sm:$0xff]   ;;  %v425_v63 = vadd.f32 %v3198_v45, %v388_v26  ;;  %v2912_v60 = vld [vmem:[%s4173_s1 + $0x110] sm:$0xff]  }
  0x2a   : > { %v709_v50 = vrot.slane %v707_v35, 1  ;;  %2704 = vmatprep.subr.bf16.mxu1 %v2911_v48  ;;  %v705_v1 = vor.u32 %v704_v49, %v700_v33  ;;  %v390_v33 = vmul.f32 %v3190_v40, %v353_v10  ;;  %v354_v35 = vunpack.c.l.bf16 %v324_v12  ;;  %vm3417_vm6 = vmand %vm3297_vm4, %vm4180_vm3  ;;  %v2917_v42 = vld [vmem:[%s4173_s1 + $0x188] sm:$0xff]   ;;  %v327_v48 = vld [vmem:[%s3173_s7 + $0x38] sm:$0x1] }
  0x2b   : > { %v719_v14 = vshll.u32 %v681_v3, 16  ;;  %v655_v16 = vsel %vm3297_vm4, %v454_v5, 0.0  ;;  %v3385_v21 = vpack.c.bf16 %v454_v5, %v453_v4  ;;  %v824_v23 = vrot.slane %v681_v3, 1  ;;  %vm3435_vm13 = vmpackc.low %vm3342_vm1, %vm3377_vm12  ;;  %v2914_v12 = vld [vmem:[%s4173_s1 + $0x158] sm:$0xff]   ;;  %v2944_v44 = vld [vmem:[%s4173_s1 + $0x230] sm:$0xff]  }
  0x2c   : > { %1603 = vmatmul.mubr.bf16.vlgmr.msra.gmra.mrb[0].mxu1 %v822_v55  ;;  %v710_v13 = vsel %vm4181_vm15, %v705_v1, %v709_v50  ;;  %v3383_v19 = vpack.c.bf16 %v655_v16, %v654_v15  ;;  %v426_v43 = vadd.f32 %v3198_v45, %v389_v31  ;;  %v427_v32 = vadd.f32 %v3198_v45, %v390_v33  ;;  %vm3447_vm4 = vmand %vm3342_vm1, %vm4180_vm3 }
  0x2d   : > { %2705 = vmatpush3.bf16.msra.mxu1 %v2913_v0  ;;  %1505 = vmatprep.mubr.bf16.mxu0 %v710_v13  ;;  %v721_v30 = vrot.slane %v719_v14, 1  ;;  %v3410_v47 = vsel %vm4182_vm10, %v823_v61, %v824_v23  ;;  %v455_v49 = vmax.f32 %v425_v63, 0.0  ;;  %v391_v51 = vmul.f32 %v3190_v40, %v354_v35  ;;  %v2919_v13 = vld [vmem:[%s4173_s1 + $0x1d0] sm:$0xff]   ;;  %v2918_v63 = vld [vmem:[%s4173_s1 + $0x160] sm:$0xff]  }
  0x2e   : > { %2337 = vmatmul.mubr.msk.bf16.vlgmr.msra.gmra.mrb[0].mxu0 %vm2335_vm5, %v3277_v20  ;;  %2364 = vmatprep.mubr.msk.bf16.mxu1 %vm3360_vm11, %v3385_v21  ;;  %v724_v38 = vshrl.u32 %v3383_v19, 16  ;;  %v726_v39 = vshll.u32 %v3383_v19, 16  ;;  %v826_v46 = vrot.slane %v3383_v19, 1  ;;  %v2451_v53 = vunpack.c.l.bf16 %v2502_v27  ;;  %v330_v20 = vld [vmem:[%s3173_s7 + $0x44] sm:$0x1] }
  0x2f   : > { %2641 = vmatpush3.bf16.msra.mxu0 %v2907_v41  ;;  %v3427_v36 = vsel %vm4181_vm15, %v717_v6, %v721_v30  ;;  %2706 = vmatprep.subr.bf16.mxu1 %v2915_v37  ;;  %v456_v55 = vmax.f32 %v426_v43, 0.0  ;;  %v457_v56 = vmax.f32 %v427_v32, 0.0  ;;  %v2452_v61 = vunpack.c.h.bf16 %v2502_v27  ;;  %v3470_v6 = vld [vmem:[%s3173_s7 + $0x3c] sm:$0xff]  }
  0x30   : > { %2642 = vmatprep.subr.bf16.mxu0 %v2908_v17  ;;  %1513 = vmatprep.mubr.bf16.mxu0 %v3427_v36  ;;  %v728_v50 = vrot.slane %v726_v39, 1  ;;  %vm4211_vm14 = vcmp.le.s32.totalorder %v3218_v54, 16  ;;  %vm4212_vm5 = vcmp.ge.s32.totalorder %v3218_v54, 1  ;;  %v357_v1 = vunpack.c.l.bf16 %v327_v48  ;;  %v2916_v30 = vld [vmem:[%s4173_s1 + $0x118] sm:$0xff]  }
  0x31   : > { %2707 = vmatpush3.bf16.msra.mxu1 %v2917_v42  ;;  %vm3459_vm3 = vmand %vm4212_vm5, %vm4211_vm14  ;;  %vm498_vm15 = vcmp.ge.s32.totalorder %v3233_v59, 1  ;;  %vm508_vm10 = vcmp.le.s32.totalorder %v3233_v59, 16  ;;  %v656_v41 = vsel %vm3417_vm6, %v455_v49, 0.0  ;;  %v428_v4 = vadd.f32 %v3198_v45, %v391_v51  ;;  %v2923_v48 = vld [vmem:[%s4173_s1 + $0x1d8] sm:$0xff]  }
  0x32   : > { %v729_v3 = vor.u32 %v728_v50, %v724_v38  ;;  %v392_v5 = vmul.f32 %v2451_v53, %v3190_v40  ;;  %v683_v54 = vpack.c.bf16 %v656_v41, %v656_v41  ;;  %v657_v8 = vsel %vm3377_vm12, %v456_v55, 0.0  ;;  %vm3502_vm12 = vmand %vm3459_vm3, %vm522_vm2  ;;  %2708 = vmatprep.subr.bf16.mxu1 %v2919_v13  ;;  %v3530_v38 = vld [vmem:[%s3173_s7 + $0x48] sm:$0xff]  }
  0x33   : > { %2643 = vmatpush3.bf16.msra.mxu0 %v2909_v24  ;;  %v658_v9 = vsel %vm3342_vm1, %v457_v56, 0.0  ;;  %v3476_v10 = vpack.c.bf16 %v457_v56, %v456_v55  ;;  %v458_v15 = vmax.f32 %v428_v4, 0.0  ;;  %v393_v16 = vmul.f32 %v2452_v61, %v3190_v40  ;;  %vm4215_vm1 = vmpackc.low %vm3223_vm9, %vm3265_vm0  ;;  %v2922_v55 = vld [vmem:[%s4173_s1 + $0x168] sm:$0xff]  }
  0x34   : > { %1611 = vmatmul.mubr.bf16.gmra.mrb[4].mxu1 %v3410_v47  ;;  %2644 = vmatprep.subr.bf16.mxu0 %v2910_v34  ;;  %v684_v14 = vpack.c.bf16 %v658_v9, %v657_v8  ;;  %v429_v17 = vadd.f32 %v3198_v45, %v392_v5  ;;  %v731_v18 = vshll.u32 %v683_v54, 16  ;;  %v827_v19 = vrot.slane %v683_v54, 1  ;;  %vm3518_vm9 = vmand %vm497_vm7, %vm507_vm8  ;;  %v2925_v54 = vld [vmem:[%s4173_s1 + $0x198] sm:$0xff]  }
  0x35   : > { %2367 = vmatprep.mubr.msk.bf16.mxu1 %vm3435_vm13, %v3476_v10  ;;  %v394_v57 = vmul.f32 %v3190_v40, %v357_v1  ;;  %v358_v11 = vunpack.c.l.bf16 %v3470_v6  ;;  %v430_v27 = vadd.f32 %v3198_v45, %v393_v16  ;;  %vm4220_vm0 = vcmask 1046528   ;;  %2709 = vmatpush3.bf16.msra.mxu1 %v2921_v62  ;;  %vm3536_vm7 = vmpackc.low %vm3459_vm3, %vm3502_vm12  ;;  %v2932_v62 = vld [vmem:[%s4173_s1 + $0x178] sm:$0xff]  }
  0x36   : > { %2340 = vmatmul.mubr.msk.bf16.gmra.mrb[4].mxu0 %vm4215_vm1, %v3289_v29  ;;  %v659_v29 = vsel %vm3447_vm4, %v458_v15, 0.0  ;;  %v736_v24 = vshrl.u32 %v684_v14, 16  ;;  %v738_v26 = vshll.u32 %v684_v14, 16  ;;  %v733_v33 = vrot.slane %v731_v18, 1  ;;  %vm3573_vm14 = vmand %vm3518_vm9, %vm522_vm2  ;;  %2710 = vmatprep.subr.bf16.mxu1 %v2923_v48  ;;  %v2928_v48 = vld [vmem:[%s4173_s1 + $0x130] sm:$0xff]  }
  0x37   : > { %2645 = vmatpush3.bf16.msra.mxu0 %v2912_v60  ;;  %v3523_v34 = vsel %vm4220_vm0, %v826_v46, %v827_v19  ;;  %v685_v35 = vpack.c.bf16 %v659_v29, %v659_v29  ;;  %v459_v37 = vmax.f32 %v429_v17, 0.0  ;;  %v460_v39 = vmax.f32 %v430_v27, 0.0  ;;  %v2920_v46 = vld [vmem:[%s4173_s1 + $0x120] sm:$0xff]   ;;  %vm4229_vm5 = vmmov %vm4220_vm0  ;;  %v2926_v29 = vld [vmem:[%s4173_s1 + $0x170] sm:$0xff]  }
  0x38   : > { %2646 = vmatprep.subr.bf16.mxu0 %v2914_v12  ;;  %v740_v58 = vrot.slane %v738_v26, 1  ;;  %v829_v43 = vrot.slane %v684_v14, 1  ;;  %v431_v32 = vadd.f32 %v3198_v45, %v394_v57  ;;  %vm4223_vm8 = vsmask.f32 7424  ;;  %v2924_v14 = vld [vmem:[%s4173_s1 + $0x128] sm:$0xff]  }
  0x39   : > { %v3548_v49 = vsel %vm4223_vm8, %v729_v3, %v733_v33  ;;  %v743_v50 = vshll.u32 %v685_v35, 16  ;;  %v660_v51 = vsel %vm3502_vm12, %v459_v37, 0.0  ;;  %v830_v52 = vrot.slane %v685_v35, 1  ;;  %vm4232_vm0 = vmmov %vm4223_vm8  ;;  %2711 = vmatpush3.bf16.msra.mxu1 %v2925_v54  ;;  %v2927_v35 = vld [vmem:[%s4173_s1 + $0x1e0] sm:$0xff]  }
  0x3a   : > { %vm4224_vm6 = vcmp.le.s32.totalorder %v3149_v28, 16  ;;  %1521 = vmatprep.mubr.bf16.mxu0 %v3548_v49  ;;  %v741_v56 = vor.u32 %v740_v58, %v736_v24  ;;  %v661_v60 = vsel %vm3459_vm3, %v460_v39, 0.0  ;;  %v3567_v61 = vpack.c.bf16 %v460_v39, %v459_v37  ;;  %v3642_v58 = vld [vmem:[%s3173_s7 + $0x54] sm:$0xff]   ;;  %2712 = vmatprep.subr.bf16.mxu1 %v2927_v35  ;;  %v2504_v33 = vld [vmem:[%s3173_s7 + $0x60] sm:$0xff]  }
  0x3b   : > { %vm3557_vm4 = vmand %vm3459_vm3, %vm4224_vm6  ;;  %2647 = vmatpush3.bf16.msra.mxu0 %v2916_v30  ;;  %v461_v1 = vmax.f32 %v431_v32, 0.0  ;;  %v745_v3 = vrot.slane %v743_v50, 1  ;;  %v686_v4 = vpack.c.bf16 %v661_v60, %v660_v51  ;;  %v3578_v5 = vsel %vm4229_vm5, %v829_v43, %v830_v52  ;;  %v2929_v50 = vld [vmem:[%s4173_s1 + $0x1a0] sm:$0xff]   ;;  %v2930_v60 = vld [vmem:[%s4173_s1 + $0x1e8] sm:$0xff]  }
  0x3c   : > { %1619 = vmatmul.mubr.bf16.gmra.mrb[8].mxu1 %v3523_v34  ;;  %v359_v0 = vunpack.c.h.bf16 %v3470_v6  ;;  %2648 = vmatprep.subr.bf16.mxu0 %v2918_v63  ;;  %v395_v9 = vmul.f32 %v3190_v40, %v358_v11  ;;  %v360_v12 = vunpack.c.l.bf16 %v330_v20  ;;  %v2455_v13 = vunpack.c.l.bf16 %v3530_v38  ;;  %vm3595_vm3 = vmand %vm498_vm15, %vm508_vm10  ;;  %v333_v11 = vld [vmem:[%s3173_s7 + $0x50] sm:$0x1] }
  0x3d   : > { %2370 = vmatprep.mubr.msk.bf16.mxu1 %vm3536_vm7, %v3567_v61  ;;  %v662_v8 = vsel %vm3557_vm4, %v461_v1, 0.0  ;;  %vm499_vm1 = vcmp.ge.s32.totalorder %v3249_v2, 1  ;;  %vm509_vm12 = vcmp.le.s32.totalorder %v3249_v2, 16  ;;  %v3608_v15 = vsel %vm4232_vm0, %v741_v56, %v745_v3  ;;  %vm4233_vm10 = vmmov %vm4224_vm6  ;;  %2713 = vmatpush3.bf16.msra.mxu1 %v2929_v50  ;;  %v2935_v2 = vld [vmem:[%s4173_s1 + $0x1b0] sm:$0xff]  }
  0x3e   : > { %2343 = vmatmul.mubr.msk.bf16.gmra.mrb[8].mxu0 %vm3360_vm11, %v3385_v21  ;;  %v687_v59 = vpack.c.bf16 %v662_v8, %v662_v8  ;;  %v748_v16 = vshrl.u32 %v686_v4, 16  ;;  %v750_v17 = vshll.u32 %v686_v4, 16  ;;  %vm3614_vm15 = vmand %vm3518_vm9, %vm4233_vm10  ;;  %v396_v18 = vmul.f32 %v3190_v40, %v359_v0  ;;  %v2931_v0 = vld [vmem:[%s4173_s1 + $0x1a8] sm:$0xff]   ;;  %2714 = vmatprep.subr.bf16.mxu1 %v2930_v60 }
  0x3f   : > { %1529 = vmatprep.mubr.bf16.mxu0 %v3608_v15  ;;  %v432_v19 = vadd.f32 %v3198_v45, %v395_v9  ;;  %v832_v23 = vrot.slane %v686_v4, 1  ;;  %2649 = vmatpush3.bf16.msra.mxu0 %v2920_v46  ;;  %v397_v57 = vmul.f32 %v3190_v40, %v360_v12  ;;  %v2456_v30 = vunpack.c.h.bf16 %v3530_v38  ;;  %vm3631_vm8 = vmand %vm3595_vm3, %vm522_vm2 }
  0x40   : > { %v752_v24 = vrot.slane %v750_v17, 1  ;;  %v755_v26 = vshll.u32 %v687_v59, 16  ;;  %v833_v27 = vrot.slane %v687_v59, 1  ;;  %2650 = vmatprep.subr.bf16.mxu0 %v2922_v55  ;;  %v433_v37 = vadd.f32 %v3198_v45, %v396_v18  ;;  %vm4238_vm6 = vmmov %vm4229_vm5 }
  0x41   : > { %v462_v63 = vmax.f32 %v432_v19, 0.0  ;;  %v434_v20 = vadd.f32 %v3198_v45, %v397_v57  ;;  %v398_v38 = vmul.f32 %v2455_v13, %v3190_v40  ;;  %v399_v46 = vmul.f32 %v2456_v30, %v3190_v40  ;;  %vm3661_vm4 = vmpackc.low %vm3518_vm9, %vm3573_vm14  ;;  %2715 = vmatpush3.bf16.msra.mxu1 %v2931_v0  ;;  %v2937_v0 = vld [vmem:[%s4173_s1 + $0x1b8] sm:$0xff]  }
  0x42   : > { %v753_v39 = vor.u32 %v752_v24, %v748_v16  ;;  %v757_v43 = vrot.slane %v755_v26, 1  ;;  %v3646_v32 = vsel %vm4238_vm6, %v832_v23, %v833_v27  ;;  %v463_v51 = vmax.f32 %v433_v37, 0.0  ;;  %vm4241_vm5 = vmmov %vm4232_vm0 }
  0x43   : > { %v663_v52 = vsel %vm3573_vm14, %v462_v63, 0.0  ;;  %v464_v55 = vmax.f32 %v434_v20, 0.0  ;;  %v435_v56 = vadd.f32 %v3198_v45, %v398_v38  ;;  %2651 = vmatpush3.bf16.msra.mxu0 %v2924_v14  ;;  %v436_v41 = vadd.f32 %v3198_v45, %v399_v46  ;;  %vm3687_vm14 = vmpackc.low %vm3595_vm3, %vm3631_vm8  ;;  %v336_v14 = vld [vmem:[%s3173_s7 + $0x5c] sm:$0x1] }
  0x44   : > { %1627 = vmatmul.mubr.bf16.gmra.mrb[12].mxu1 %v3578_v5  ;;  %v3670_v1 = vsel %vm4241_vm5, %v753_v39, %v757_v43  ;;  %v363_v3 = vunpack.c.l.bf16 %v333_v11  ;;  %v364_v4 = vunpack.c.l.bf16 %v3642_v58  ;;  %2652 = vmatprep.subr.bf16.mxu0 %v2926_v29  ;;  %v664_v54 = vsel %vm3518_vm9, %v463_v51, 0.0  ;;  %v2933_v11 = vld [vmem:[%s4173_s1 + $0x1f0] sm:$0xff]   ;;  %vm3716_vm9 = vmand %vm499_vm1, %vm509_vm12  ;;  %v2934_v38 = vld [vmem:[%s4173_s1 + $0x138] sm:$0xff]  }
  0x45   : > { %v3679_v8 = vpack.c.bf16 %v463_v51, %v462_v63  ;;  %v665_v9 = vsel %vm3614_vm15, %v464_v55, 0.0  ;;  %v465_v12 = vmax.f32 %v435_v56, 0.0  ;;  %v688_v31 = vpack.c.bf16 %v664_v54, %v663_v52  ;;  %2716 = vmatprep.subr.bf16.mxu1 %v2933_v11  ;;  %vm4246_vm1 = vmmov %vm4233_vm10 }
  0x46   : > { %2346 = vmatmul.mubr.msk.bf16.gmra.mrb[12].mxu0 %vm3435_vm13, %v3476_v10  ;;  %v689_v59 = vpack.c.bf16 %v665_v9, %v665_v9  ;;  %v466_v16 = vmax.f32 %v436_v41, 0.0  ;;  %v400_v17 = vmul.f32 %v3190_v40, %v363_v3  ;;  %v365_v19 = vunpack.c.h.bf16 %v3642_v58  ;;  %vm3737_vm12 = vmand %vm3595_vm3, %vm4246_vm1  ;;  %2717 = vmatpush3.bf16.msra.mxu1 %v2935_v2 }
  0x47   : > { %1537 = vmatprep.mubr.bf16.mxu0 %v3670_v1  ;;  %2373 = vmatprep.mubr.msk.bf16.mxu1 %vm3661_vm4, %v3679_v8  ;;  %v666_v18 = vsel %vm3631_vm8, %v465_v12, 0.0  ;;  %v401_v23 = vmul.f32 %v3190_v40, %v364_v4  ;;  %v366_v57 = vunpack.c.l.bf16 %v336_v14  ;;  %v760_v29 = vshrl.u32 %v688_v31, 16  ;;  %vm4249_vm0 = vmmov %vm4238_vm6  ;;  %v2936_v4 = vld [vmem:[%s4173_s1 + $0x1f8] sm:$0xff]  }
  0x48   : > { %v762_v24 = vshll.u32 %v688_v31, 16  ;;  %v767_v26 = vshll.u32 %v689_v59, 16  ;;  %v667_v27 = vsel %vm3595_vm3, %v466_v16, 0.0  ;;  %2653 = vmatpush3.bf16.msra.mxu0 %v2928_v48  ;;  %v3723_v37 = vpack.c.bf16 %v466_v16, %v465_v12  ;;  %vm3754_vm3 = vmand %vm3716_vm9, %vm522_vm2  ;;  %2718 = vmatprep.subr.bf16.mxu1 %v2936_v4 }
  0x49   : > { %v3721_v35 = vpack.c.bf16 %v667_v27, %v666_v18  ;;  %v835_v63 = vrot.slane %v688_v31, 1  ;;  %v836_v20 = vrot.slane %v689_v59, 1  ;;  %2654 = vmatprep.subr.bf16.mxu0 %v2932_v62  ;;  %v437_v43 = vadd.f32 %v3198_v45, %v400_v17  ;;  %vm4252_vm10 = vmmov %vm4241_vm5  ;;  %v3779_v62 = vld [vmem:[%s4173_s1 + $0x200] sm:$0xff]  }
  0x4a   : > { %v764_v58 = vrot.slane %v762_v24, 1  ;;  %v769_v39 = vrot.slane %v767_v26, 1  ;;  %v402_v48 = vmul.f32 %v3190_v40, %v365_v19  ;;  %v438_v52 = vadd.f32 %v3198_v45, %v401_v23  ;;  %vm3788_vm15 = vmpackc.low %vm3716_vm9, %vm3754_vm3  ;;  %2719 = vmatpush3.bf16.msra.mxu1 %v2937_v0 }
  0x4b   : > { %v3746_v50 = vsel %vm4249_vm0, %v835_v63, %v836_v20  ;;  %v774_v51 = vshll.u32 %v3721_v35, 16  ;;  %v486_v55 = vadd.s32 8, %v3140_v25  ;;  %v467_v60 = vmax.f32 %v437_v43, 0.0  ;;  %vm4255_vm8 = vmmov %vm4246_vm1  ;;  %2816 = vmatprep.subr.bf16.mxu1 %v3779_v62 }
  0x4c   : > { %1635 = vmatmul.mubr.bf16.gmra.mrb[16].mxu1 %v3646_v32  ;;  %v765_v56 = vor.u32 %v764_v58, %v760_v29  ;;  %v772_v41 = vshrl.u32 %v3721_v35, 16  ;;  %v439_v3 = vadd.f32 %v3198_v45, %v402_v48  ;;  %2655 = vmatpush3.bf16.msra.mxu0 %v2934_v38  ;;  %v468_v9 = vmax.f32 %v438_v52, 0.0  ;;  %vm3802_vm6 = vmand %vm3716_vm9, %vm4255_vm8 }
  0x4d   : > { %2376 = vmatprep.mubr.msk.bf16.mxu1 %vm3687_vm14, %v3723_v37  ;;  %v776_v54 = vrot.slane %v774_v51, 1  ;;  %v403_v12 = vmul.f32 %v3190_v40, %v366_v57  ;;  %v2459_v14 = vunpack.c.l.bf16 %v2504_v33  ;;  %v668_v59 = vsel %vm3737_vm12, %v467_v60, 0.0  ;;  %2784 = vmatprep.subr.bf16.mxu0 %v3779_v62  ;;  %vm4260_vm12 = vmmov %vm4252_vm10 }
  0x4e   : > { %2349 = vmatmul.mubr.msk.bf16.gmra.mrb[16].mxu0 %vm3536_vm7, %v3567_v61  ;;  %v3772_v31 = vsel %vm4252_vm10, %v765_v56, %v769_v39  ;;  %v469_v16 = vmax.f32 %v439_v3, 0.0  ;;  %v2460_v17 = vunpack.c.h.bf16 %v2504_v33  ;;  %v691_v18 = vpack.c.bf16 %v668_v59, %v668_v59 }
  0x4f   : > { %1545 = vmatprep.mubr.bf16.mxu0 %v3772_v31  ;;  %v669_v19 = vsel %vm3754_vm3, %v468_v9, 0.0  ;;  %v838_v57 = vrot.slane %v3721_v35, 1  ;;  %v440_v11 = vadd.f32 %v3198_v45, %v403_v12  ;;  %v404_v27 = vmul.f32 %v2459_v14, %v3190_v40 }
  0x50   : > { %v670_v29 = vsel %vm3716_vm9, %v469_v16, 0.0  ;;  %v3796_v24 = vpack.c.bf16 %v469_v16, %v468_v9  ;;  %v405_v33 = vmul.f32 %v2460_v17, %v3190_v40  ;;  %v777_v35 = vor.u32 %v776_v54, %v772_v41  ;;  %v339_v41 = vld [vmem:[%s3173_s7 + $0x68] sm:$0x1]  ;;  %v340_v16 = vld [vmem:[%s3173_s7 + $0x6c] sm:$0xff]   ;;  %v342_v17 = vld [vmem:[%s3173_s7 + $0x74] sm:$0x1] }
  0x51   : > { %v779_v63 = vshll.u32 %v691_v18, 16  ;;  %v3809_v20 = vpack.c.bf16 %v670_v29, %v669_v19  ;;  %v470_v38 = vmax.f32 %v440_v11, 0.0  ;;  %v441_v30 = vadd.f32 %v3198_v45, %v404_v27  ;;  %s2254_s7 = sshll.u32 %s4289_s14, 1 }
  0x52   : > { %v442_v2 = vadd.f32 %v3198_v45, %v405_v33  ;;  %vm500_vm5 = vcmp.ge.s32.totalorder %v486_v55, 1  ;;  %vm510_vm9 = vcmp.le.s32.totalorder %v486_v55, 16  ;;  %v839_v39 = vrot.slane %v691_v18, 1  ;;  %s300_s30 = sadd.s32 %s2255_s21, %s2254_s7 }
  0x53   : > { %v781_v58 = vrot.slane %v779_v63, 1  ;;  %v671_v43 = vsel %vm3802_vm6, %v470_v38, 0.0  ;;  %v784_v46 = vshrl.u32 %v3809_v20, 16  ;;  %vm3821_vm1 = vmand %vm500_vm5, %vm510_vm9  ;;  %v786_v52 = vshll.u32 %v3809_v20, 16  ;;  %s2256_s8 = sshll.u32 %s300_s30, 2 }
  0x54   : > { %1643 = vmatmul.mubr.bf16.gmra.mrb[20].mxu1 %v3746_v50  ;;  %v693_v51 = vpack.c.bf16 %v671_v43, %v671_v43  ;;  %v471_v6 = vmax.f32 %v441_v30, 0.0  ;;  %v472_v55 = vmax.f32 %v442_v2, 0.0  ;;  %vm3833_vm0 = vmand %vm3821_vm1, %vm522_vm2  ;;  %v487_v3 = vadd.s32 9, %v3140_v25  ;;  %s4110_s10 = scalar_lea.vmem %s4177_s5, %s2256_s8 }
  0x55   : > { %2379 = vmatprep.mubr.msk.bf16.mxu1 %vm3788_vm15, %v3796_v24  ;;  %v3827_v56 = vsel %vm4260_vm12, %v777_v35, %v781_v58  ;;  %v788_v4 = vrot.slane %v786_v52, 1  ;;  %vm4263_vm3 = vcmask 1046528   ;;  %v369_v25 = vunpack.c.l.bf16 %v339_v41  ;;  %vm2380_vm10 = vmpackc.low %vm3821_vm1, %vm3833_vm0 }
  0x56   : > { %2352 = vmatmul.mubr.msk.bf16.gmra.mrb[20].mxu0 %vm3661_vm4, %v3679_v8  ;;  %v791_v0 = vshll.u32 %v693_v51, 16  ;;  %v672_v54 = vsel %vm3833_vm0, %v471_v6, 0.0  ;;  %v673_v9 = vsel %vm3821_vm1, %v472_v55, 0.0  ;;  %v3848_v12 = vsel %vm4263_vm3, %v838_v57, %v839_v39 }
  0x57   : > { %1553 = vmatprep.mubr.bf16.mxu0 %v3827_v56  ;;  %v694_v14 = vpack.c.bf16 %v673_v9, %v672_v54  ;;  %v3850_v59 = vpack.c.bf16 %v472_v55, %v471_v6  ;;  %v789_v18 = vor.u32 %v788_v4, %v784_v46  ;;  %v370_v11 = vunpack.c.l.bf16 %v340_v16 }
  0x58   : > { %v793_v19 = vrot.slane %v791_v0, 1  ;;  %v371_v29 = vunpack.c.h.bf16 %v340_v16  ;;  %v406_v26 = vmul.f32 %v3190_v40, %v369_v25  ;;  %vm501_vm8 = vcmp.ge.s32.totalorder %v487_v3, 1 }
  0x59   : > { %v855_v27 = vshll.u32 %v694_v14, 16  ;;  %v841_v57 = vrot.slane %v3809_v20, 1  ;;  %v372_v33 = vunpack.c.l.bf16 %v342_v17  ;;  %v407_v35 = vmul.f32 %v3190_v40, %v370_v11 }
  0x5a   : > { %v842_v63 = vrot.slane %v693_v51, 1  ;;  %v443_v38 = vadd.f32 %v3198_v45, %v406_v26  ;;  %vm4264_vm6 = vcmp.le.s32.totalorder %v3149_v28, 16  ;;  %v408_v20 = vmul.f32 %v3190_v40, %v371_v29 }
  0x5b   : > { %vm3873_vm5 = vmand %vm3821_vm1, %vm4264_vm6  ;;  %vm511_vm9 = vcmp.le.s32.totalorder %v487_v3, 16  ;;  %v3879_v2 = vsel %vm4260_vm12, %v789_v18, %v793_v19  ;;  %v409_v58 = vmul.f32 %v3190_v40, %v372_v33  ;;  %v444_v39 = vadd.f32 %v3198_v45, %v407_v35 }
  0x5c   : > { %1651 = vmatmul.mubr.bf16.gmra.mrb[24].mxu1 %v3848_v12  ;;  %vm3883_vm3 = vmand %vm501_vm8, %vm511_vm9  ;;  %v473_v46 = vmax.f32 %v443_v38, 0.0  ;;  %v853_v51 = vshrl.u32 %v694_v14, 16  ;;  %v857_v52 = vrot.slane %v855_v27, 1  ;;  %v445_v6 = vadd.f32 %v3198_v45, %v408_v20 }
  0x5d   : > { %2382 = vmatprep.mubr.msk.bf16.mxu1 %vm2380_vm10, %v3850_v59  ;;  %vm3892_vm6 = vmand %vm3883_vm3, %vm522_vm2  ;;  %v446_v40 = vadd.f32 %v3198_v45, %v409_v58  ;;  %v474_v41 = vmax.f32 %v444_v39, 0.0  ;;  %vm4271_vm8 = vcmask 1046528   ;;  %vm4272_vm2 = vcmp.le.s32.totalorder %v3149_v28, 16  ;;  %v2939_v39 = vld [vmem:[%s4173_s1 + $0x208] sm:$0xff]  }
  0x5e   : > { %2355 = vmatmul.mubr.msk.bf16.gmra.mrb[24].mxu0 %vm3687_vm14, %v3723_v37  ;;  %v3902_v3 = vsel %vm4271_vm8, %v841_v57, %v842_v63  ;;  %v674_v22 = vsel %vm3873_vm5, %v473_v46, 0.0  ;;  %v475_v4 = vmax.f32 %v445_v6, 0.0  ;;  %vm587_vm9 = vmand %vm3883_vm3, %vm4272_vm2  ;;  %v867_v54 = vrot.slane %v694_v14, 1 }
  0x5f   : > { %1561 = vmatprep.mubr.bf16.mxu0 %v3879_v2  ;;  %v695_v0 = vpack.c.bf16 %v674_v22, %v674_v22  ;;  %v476_v9 = vmax.f32 %v446_v40, 0.0  ;;  %v675_v45 = vsel %vm3892_vm6, %v474_v41, 0.0  ;;  %v858_v25 = vor.u32 %v857_v52, %v853_v51  ;;  %vm4273_vm5 = vmmov %vm4271_vm8 }
  0x60   : > { %v676_v16 = vsel %vm3883_vm3, %v475_v4, 0.0  ;;  %v3914_v17 = vpack.c.bf16 %v475_v4, %v474_v41  ;;  %vm4274_vm8 = vmmov %vm4273_vm5 }
  0x61   : > { %v860_v18 = vshll.u32 %v695_v0, 16  ;;  %v868_v19 = vrot.slane %v695_v0, 1  ;;  %v677_v28 = vsel %vm587_vm9, %v476_v9, 0.0  ;;  %v696_v11 = vpack.c.bf16 %v676_v16, %v675_v45  ;;  %vm4275_vm2 = vmmov %vm4260_vm12 }
  0x62   : > { %v697_v29 = vpack.c.bf16 %v677_v28, %v677_v28 }
  0x63   : > { %v862_v14 = vrot.slane %v860_v18, 1  ;;  %v3919_v26 = vsel %vm4273_vm5, %v867_v54, %v868_v19  ;;  %v872_v27 = vshrl.u32 %v696_v11, 16  ;;  %v874_v57 = vshll.u32 %v696_v11, 16 }
  0x64   : > { %1659 = vmatmul.mubr.bf16.gmra.mrb[28].mxu1 %v3902_v3  ;;  %v879_v33 = vshll.u32 %v697_v29, 16  ;;  %v886_v35 = vrot.slane %v696_v11, 1  ;;  %v887_v63 = vrot.slane %v697_v29, 1 }
  0x65   : > { %1796 = vmatprep.mubr.bf16.mxu1 %v3548_v49  ;;  %v3925_v38 = vsel %vm4260_vm12, %v858_v25, %v862_v14  ;;  %v876_v30 = vrot.slane %v874_v57, 1 }
  0x66   : > { %2358 = vmatmul.mubr.msk.bf16.gmra.mrb[28].mxu0 %vm3788_vm15, %v3796_v24  ;;  %v881_v20 = vrot.slane %v879_v33, 1  ;;  %v3929_v58 = vsel %vm4274_vm8, %v886_v35, %v887_v63 }
  0x67   : > { %1699 = vmatprep.mubr.bf16.mxu0 %v3410_v47  ;;  %v877_v46 = vor.u32 %v876_v30, %v872_v27  ;;  %v2940_v47 = vld [vmem:[%s4173_s1 + $0x210] sm:$0xff]  }
  0x69   : > { %v882_v51 = vsel %vm4275_vm2, %v877_v46, %v881_v20 }
  0x6c   : > { %2385 = vmatmul.mubr.msk.bf16.vlgmr.msra.gmra.mrb[32].mxu1 %vm3360_vm11, %v3385_v21  ;;  %v2942_v21 = vld [vmem:[%s4173_s1 + $0x220] sm:$0xff]   ;;  %vm2404_vm11 = vmpackc.low %vm3883_vm3, %vm3892_vm6 }
  0x6d   : > { %1804 = vmatprep.mubr.bf16.mxu1 %v3608_v15  ;;  %2824 = vmatpush3.bf16.msra.mxu1 %v3779_v62 }
  0x6e   : > { %2817 = vmatprep.subr.bf16.mxu1 %v2939_v39  ;;  %1700 = vmatmul.mubr.bf16.vlgmr.msra.gmra.mrb[32].mxu0 %v3427_v36  ;;  %v2943_v36 = vld [vmem:[%s4173_s1 + $0x228] sm:$0xff]  }
  0x6f   : > { %2785 = vmatpush3.bf16.msra.mxu0 %v3779_v62  ;;  %1707 = vmatprep.mubr.bf16.mxu0 %v3523_v34 }
  0x70   : > { %2786 = vmatprep.subr.bf16.mxu0 %v2939_v39 }
  0x71   : > { %2825 = vmatpush3.bf16.msra.mxu1 %v2939_v39 }
  0x72   : > { %2818 = vmatprep.subr.bf16.mxu1 %v2940_v47 }
  0x73   : > { %2787 = vmatpush3.bf16.msra.mxu0 %v2939_v39 }
  0x74   : > { %2388 = vmatmul.mubr.msk.bf16.gmra.mrb[36].mxu1 %vm3435_vm13, %v3476_v10  ;;  %2788 = vmatprep.subr.bf16.mxu0 %v2940_v47  ;;  %v2945_v10 = vld [vmem:[%s4173_s1 + $0x238] sm:$0xff]   ;;  %vm2096_vm13 = vcmask 1040384  }
  0x75   : > { %1812 = vmatprep.mubr.bf16.mxu1 %v3670_v1  ;;  %2826 = vmatpush3.bf16.msra.mxu1 %v2940_v47 }
  0x76   : > { %2819 = vmatprep.subr.bf16.mxu1 %v2941_v7  ;;  %1708 = vmatmul.mubr.bf16.gmra.mrb[36].mxu0 %v3548_v49 }
  0x77   : > { %1715 = vmatprep.mubr.bf16.mxu0 %v3578_v5  ;;  %2789 = vmatpush3.bf16.msra.mxu0 %v2940_v47 }
  0x78   : > { %2790 = vmatprep.subr.bf16.mxu0 %v2941_v7 }
  0x79   : > { %2827 = vmatpush3.bf16.msra.mxu1 %v2941_v7 }
  0x7a   : > { %2820 = vmatprep.subr.bf16.mxu1 %v2942_v21 }
  0x7b   : > { %2791 = vmatpush3.bf16.msra.mxu0 %v2941_v7 }
  0x7c   : > { %2391 = vmatmul.mubr.msk.bf16.gmra.mrb[40].mxu1 %vm3536_vm7, %v3567_v61  ;;  %2792 = vmatprep.subr.bf16.mxu0 %v2942_v21  ;;  %vm2098_vm7 = vcmask 1041408  }
  0x7d   : > { %1820 = vmatprep.mubr.bf16.mxu1 %v3772_v31  ;;  %2828 = vmatpush3.bf16.msra.mxu1 %v2942_v21 }
  0x7e   : > { %2821 = vmatprep.subr.bf16.mxu1 %v2943_v36  ;;  %1716 = vmatmul.mubr.bf16.gmra.mrb[40].mxu0 %v3608_v15 }
  0x7f   : > { %1723 = vmatprep.mubr.bf16.mxu0 %v3646_v32  ;;  %2793 = vmatpush3.bf16.msra.mxu0 %v2942_v21 }
  0x80   : > { %2794 = vmatprep.subr.bf16.mxu0 %v2943_v36 }
  0x81   : > { %2829 = vmatpush3.bf16.msra.mxu1 %v2943_v36 }
  0x82   : > { %2822 = vmatprep.subr.bf16.mxu1 %v2944_v44 }
  0x83   : > { %2795 = vmatpush3.bf16.msra.mxu0 %v2943_v36 }
  0x84   : > { %2394 = vmatmul.mubr.msk.bf16.gmra.mrb[44].mxu1 %vm3661_vm4, %v3679_v8  ;;  %2796 = vmatprep.subr.bf16.mxu0 %v2944_v44 }
  0x85   : > { %1828 = vmatprep.mubr.bf16.mxu1 %v3827_v56  ;;  %2830 = vmatpush3.bf16.msra.mxu1 %v2944_v44 }
  0x86   : > { %2823 = vmatprep.subr.bf16.mxu1 %v2945_v10  ;;  %1724 = vmatmul.mubr.bf16.gmra.mrb[44].mxu0 %v3670_v1 }
  0x87   : > { %1731 = vmatprep.mubr.bf16.mxu0 %v3746_v50  ;;  %2797 = vmatpush3.bf16.msra.mxu0 %v2944_v44 }
  0x88   : > { %2798 = vmatprep.subr.bf16.mxu0 %v2945_v10 }
  0x89   : > { %2831 = vmatpush3.bf16.msra.mxu1 %v2945_v10 }
  0x8b   : > { %2799 = vmatpush3.bf16.msra.mxu0 %v2945_v10 }
  0x8c   : > { %2397 = vmatmul.mubr.msk.bf16.gmra.mrb[48].mxu1 %vm3687_vm14, %v3723_v37 }
  0x8d   : > { %1836 = vmatprep.mubr.bf16.mxu1 %v3879_v2 }
  0x8e   : > { %1732 = vmatmul.mubr.bf16.gmra.mrb[48].mxu0 %v3772_v31 }
  0x8f   : > { %1739 = vmatprep.mubr.bf16.mxu0 %v3848_v12 }
  0x94   : > { %2400 = vmatmul.mubr.msk.bf16.gmra.mrb[52].mxu1 %vm3788_vm15, %v3796_v24 }
  0x95   : > { %1844 = vmatprep.mubr.bf16.mxu1 %v3925_v38 }
  0x96   : > { %1740 = vmatmul.mubr.bf16.gmra.mrb[52].mxu0 %v3827_v56 }
  0x97   : > { %1747 = vmatprep.mubr.bf16.mxu0 %v3902_v3 }
  0x9c   : > { %2403 = vmatmul.mubr.msk.bf16.gmra.mrb[56].mxu1 %vm2380_vm10, %v3850_v59 }
  0x9d   : > { %1852 = vmatprep.mubr.bf16.mxu1 %v882_v51 }
  0x9e   : > { %1748 = vmatmul.mubr.bf16.gmra.mrb[56].mxu0 %v3879_v2 }
  0x9f   : > { %1755 = vmatprep.mubr.bf16.mxu0 %v3919_v26 }
  0xa4   : > { %2406 = vmatmul.mubr.msk.bf16.gmra.mrb[60].mxu1 %vm2404_vm11, %v3914_v17 }
  0xa5   : > { %2808 = vmatprep.mubr.bf16.mxu1 %v3848_v12 }
  0xa6   : > { %1756 = vmatmul.mubr.bf16.gmra.mrb[60].mxu0 %v3925_v38 }
  0xa7   : > { %2800 = vmatprep.mubr.bf16.mxu0 %v3523_v34  ;;  %v4016_v34 = vld [vmem:[%s4174_s2] ss:$0 sm:$0xff] }
  0xac   : > { %2809 = vmatmul.mubr.bf16.vlgmr.msra.gmra.mrb[64].mxu1 %v3902_v3 }
  0xad   : > { %2812 = vmatprep.mubr.bf16.mxu1 %v3919_v26 }
  0xae   : > { %2801 = vmatmul.mubr.bf16.vlgmr.msra.gmra.mrb[64].mxu0 %v3578_v5 }
  0xaf   : > { %2804 = vmatprep.mubr.bf16.mxu0 %v3646_v32 }
  0xb4   : > { %2813 = vmatmul.mubr.bf16.gmra.mrb[68].mxu1 %v3929_v58 }
  0xb6   : > { %2805 = vmatmul.mubr.bf16.gmra.mrb[68].mxu0 %v3746_v50 }
  0xff   : > { %v2592_v42 = vpop.f32.mrb[0].mxu1 }
 0x100   : > { %v2593_v49 = vpop.f32.mrb[1].mxu1 }
 0x101   : > { %v2594_v61 = vadd.f32 %v2593_v49, %v2592_v42  ;;  %v2595_v15 = vpop.f32.mrb[2].mxu1  ;;  %v2528_v1 = vpop.f32.mrb[0].mxu0 }
 0x102   : > { %v2596_v53 = vpop.f32.mrb[3].mxu1  ;;  %v2529_v13 = vpop.f32.mrb[1].mxu0 }
 0x103   : > { %v2597_v8 = vadd.f32 %v2596_v53, %v2595_v15  ;;  %v2530_v5 = vadd.f32 %v2529_v13, %v2528_v1  ;;  %v2531_v37 = vpop.f32.mrb[2].mxu0 }
 0x104   : > { %v2532_v32 = vpop.f32.mrb[3].mxu0 }
 0x105   : > { %v1508_v31 = vadd.f32 %v2530_v5, %v4016_v34  ;;  %v2533_v62 = vadd.f32 %v2532_v32, %v2531_v37 }
 0x107   : > { %v2598_v50 = vpop.f32.mrb[4].mxu1  ;;  %v1511_v24 = vadd.f32 %v2533_v62, %v4016_v34  ;;  %v4020_v48 = vadd.f32 %v2594_v61, %v1508_v31 }
 0x108   : > { %v2599_v23 = vpop.f32.mrb[5].mxu1 }
 0x109   : > { %v2600_v56 = vadd.f32 %v2599_v23, %v2598_v50  ;;  %v2601_v60 = vpop.f32.mrb[6].mxu1  ;;  %v4022_v59 = vadd.f32 %v2597_v8, %v1511_v24  ;;  %v2534_v2 = vpop.f32.mrb[4].mxu0 }
 0x10a   : > { %v2602_v12 = vpop.f32.mrb[7].mxu1  ;;  %v2535_v52 = vpop.f32.mrb[5].mxu0 }
 0x10b   : > { %v2603_v43 = vadd.f32 %v2602_v12, %v2601_v60  ;;  %v2536_v6 = vadd.f32 %v2535_v52, %v2534_v2  ;;  %v2537_v55 = vpop.f32.mrb[6].mxu0 }
 0x10c   : > { %v2538_v40 = vpop.f32.mrb[7].mxu0 }
 0x10d   : > { %v1516_v41 = vadd.f32 %v2536_v6, %v4016_v34  ;;  %v2539_v3 = vadd.f32 %v2538_v40, %v2537_v55 }
 0x10f   : > { %v2604_v22 = vpop.f32.mrb[8].mxu1  ;;  %v1519_v0 = vadd.f32 %v2539_v3, %v4016_v34  ;;  %v4026_v54 = vadd.f32 %v2600_v56, %v1516_v41 }
 0x110   : > { %v2605_v4 = vpop.f32.mrb[9].mxu1 }
 0x111   : > { %v2606_v9 = vadd.f32 %v2605_v4, %v2604_v22  ;;  %v2607_v45 = vpop.f32.mrb[10].mxu1  ;;  %v4028_v16 = vadd.f32 %v2603_v43, %v1519_v0  ;;  %v2540_v17 = vpop.f32.mrb[8].mxu0 }
 0x112   : > { %v2608_v25 = vpop.f32.mrb[11].mxu1  ;;  %v2541_v19 = vpop.f32.mrb[9].mxu0 }
 0x113   : > { %v2609_v18 = vadd.f32 %v2608_v25, %v2607_v45  ;;  %v2542_v28 = vadd.f32 %v2541_v19, %v2540_v17  ;;  %v2543_v11 = vpop.f32.mrb[10].mxu0 }
 0x114   : > { %v2544_v29 = vpop.f32.mrb[11].mxu0 }
 0x115   : > { %v1524_v14 = vadd.f32 %v2542_v28, %v4016_v34  ;;  %v2545_v26 = vadd.f32 %v2544_v29, %v2543_v11 }
 0x117   : > { %v2610_v27 = vpop.f32.mrb[12].mxu1  ;;  %v1527_v33 = vadd.f32 %v2545_v26, %v4016_v34  ;;  %v4032_v35 = vadd.f32 %v2606_v9, %v1524_v14 }
 0x118   : > { %v2611_v57 = vpop.f32.mrb[13].mxu1 }
 0x119   : > { %v2612_v63 = vadd.f32 %v2611_v57, %v2610_v27  ;;  %v2613_v38 = vpop.f32.mrb[14].mxu1  ;;  %v4034_v20 = vadd.f32 %v2609_v18, %v1527_v33  ;;  %v2546_v58 = vpop.f32.mrb[12].mxu0 }
 0x11a   : > { %v2614_v30 = vpop.f32.mrb[15].mxu1  ;;  %v2547_v46 = vpop.f32.mrb[13].mxu0 }
 0x11b   : > { %v2615_v39 = vadd.f32 %v2614_v30, %v2613_v38  ;;  %v2548_v51 = vadd.f32 %v2547_v46, %v2546_v58  ;;  %v2549_v47 = vpop.f32.mrb[14].mxu0 }
 0x11c   : > { %v2550_v7 = vpop.f32.mrb[15].mxu0 }
 0x11d   : > { %v1532_v21 = vadd.f32 %v2548_v51, %v4016_v34  ;;  %v2551_v36 = vadd.f32 %v2550_v7, %v2549_v47 }
 0x11f   : > { %v2616_v44 = vpop.f32.mrb[16].mxu1  ;;  %v1535_v42 = vadd.f32 %v2551_v36, %v4016_v34  ;;  %v4038_v49 = vadd.f32 %v2612_v63, %v1532_v21 }
 0x120   : > { %v2617_v10 = vpop.f32.mrb[17].mxu1 }
 0x121   : > { %v2618_v61 = vadd.f32 %v2617_v10, %v2616_v44  ;;  %v2619_v15 = vpop.f32.mrb[18].mxu1  ;;  %v4040_v1 = vadd.f32 %v2615_v39, %v1535_v42  ;;  %v2552_v8 = vpop.f32.mrb[16].mxu0 }
 0x122   : > { %v2620_v53 = vpop.f32.mrb[19].mxu1  ;;  %v2553_v5 = vpop.f32.mrb[17].mxu0 }
 0x123   : > { %v2621_v13 = vadd.f32 %v2620_v53, %v2619_v15  ;;  %v2554_v37 = vadd.f32 %v2553_v5, %v2552_v8  ;;  %v2555_v32 = vpop.f32.mrb[18].mxu0 }
 0x124   : > { %v2556_v31 = vpop.f32.mrb[19].mxu0 }
 0x125   : > { %v1540_v62 = vadd.f32 %v2554_v37, %v4016_v34  ;;  %v2557_v50 = vadd.f32 %v2556_v31, %v2555_v32 }
 0x127   : > { %v2622_v23 = vpop.f32.mrb[20].mxu1  ;;  %v1543_v56 = vadd.f32 %v2557_v50, %v4016_v34  ;;  %v4044_v60 = vadd.f32 %v2618_v61, %v1540_v62 }
 0x128   : > { %v2623_v24 = vpop.f32.mrb[21].mxu1 }
 0x129   : > { %v2624_v12 = vadd.f32 %v2623_v24, %v2622_v23  ;;  %v2625_v2 = vpop.f32.mrb[22].mxu1  ;;  %v4046_v52 = vadd.f32 %v2621_v13, %v1543_v56  ;;  %v2558_v6 = vpop.f32.mrb[20].mxu0 }
 0x12a   : > { %v2626_v43 = vpop.f32.mrb[23].mxu1  ;;  %v2559_v40 = vpop.f32.mrb[21].mxu0 }
 0x12b   : > { %v2627_v55 = vadd.f32 %v2626_v43, %v2625_v2  ;;  %v2560_v41 = vadd.f32 %v2559_v40, %v2558_v6  ;;  %v2561_v3 = vpop.f32.mrb[22].mxu0 }
 0x12c   : > { %v2562_v22 = vpop.f32.mrb[23].mxu0 }
 0x12d   : > { %v1548_v4 = vadd.f32 %v2560_v41, %v4016_v34  ;;  %v2563_v0 = vadd.f32 %v2562_v22, %v2561_v3 }
 0x12f   : > { %v2628_v9 = vpop.f32.mrb[24].mxu1  ;;  %v1551_v25 = vadd.f32 %v2563_v0, %v4016_v34  ;;  %v4050_v17 = vadd.f32 %v2624_v12, %v1548_v4 }
 0x130   : > { %v2629_v45 = vpop.f32.mrb[25].mxu1 }
 0x131   : > { %v2630_v18 = vadd.f32 %v2629_v45, %v2628_v9  ;;  %v2631_v19 = vpop.f32.mrb[26].mxu1  ;;  %v4052_v11 = vadd.f32 %v2627_v55, %v1551_v25  ;;  %v2564_v29 = vpop.f32.mrb[24].mxu0 }
 0x132   : > { %v2632_v28 = vpop.f32.mrb[27].mxu1  ;;  %v2565_v26 = vpop.f32.mrb[25].mxu0 }
 0x133   : > { %v2633_v14 = vadd.f32 %v2632_v28, %v2631_v19  ;;  %v2566_v27 = vadd.f32 %v2565_v26, %v2564_v29  ;;  %v2567_v57 = vpop.f32.mrb[26].mxu0 }
 0x134   : > { %v2568_v33 = vpop.f32.mrb[27].mxu0 }
 0x135   : > { %v1556_v63 = vadd.f32 %v2566_v27, %v4016_v34  ;;  %v2569_v38 = vadd.f32 %v2568_v33, %v2567_v57 }
 0x137   : > { %v2634_v30 = vpop.f32.mrb[28].mxu1  ;;  %v1559_v39 = vadd.f32 %v2569_v38, %v4016_v34  ;;  %v4056_v46 = vadd.f32 %v2630_v18, %v1556_v63 }
 0x138   : > { %v2635_v58 = vpop.f32.mrb[29].mxu1 }
 0x139   : > { %v2636_v51 = vadd.f32 %v2635_v58, %v2634_v30  ;;  %v2637_v47 = vpop.f32.mrb[30].mxu1  ;;  %v4058_v21 = vadd.f32 %v2633_v14, %v1559_v39  ;;  %v2570_v36 = vpop.f32.mrb[28].mxu0 }
 0x13a   : > { %v2638_v7 = vpop.f32.mrb[31].mxu1  ;;  %v2571_v10 = vpop.f32.mrb[29].mxu0 }
 0x13b   : > { %v2639_v44 = vadd.f32 %v2638_v7, %v2637_v47  ;;  %v2572_v42 = vadd.f32 %v2571_v10, %v2570_v36  ;;  %v2573_v61 = vpop.f32.mrb[30].mxu0 }
 0x13c   : > { %v2574_v15 = vpop.f32.mrb[31].mxu0 }
 0x13d   : > { %v1564_v53 = vadd.f32 %v2572_v42, %v4016_v34  ;;  %v2575_v8 = vadd.f32 %v2574_v15, %v2573_v61 }
 0x13f   : > { %v2720_v13 = vpop.f32.mrb[32].mxu1  ;;  %v1567_v37 = vadd.f32 %v2575_v8, %v4016_v34  ;;  %v4062_v32 = vadd.f32 %v2636_v51, %v1564_v53 }
 0x140   : > { %v2721_v5 = vpop.f32.mrb[33].mxu1 }
 0x141   : > { %v2722_v31 = vadd.f32 %v2721_v5, %v2720_v13  ;;  %v2723_v62 = vpop.f32.mrb[34].mxu1  ;;  %v4064_v23 = vadd.f32 %v2639_v44, %v1567_v37  ;;  %v2656_v24 = vpop.f32.mrb[32].mxu0 }
 0x142   : > { %v2724_v50 = vpop.f32.mrb[35].mxu1  ;;  %v2657_v12 = vpop.f32.mrb[33].mxu0 }
 0x143   : > { %v2725_v56 = vadd.f32 %v2724_v50, %v2723_v62  ;;  %v2658_v2 = vadd.f32 %v2657_v12, %v2656_v24  ;;  %v2659_v43 = vpop.f32.mrb[34].mxu0 }
 0x144   : > { %v2660_v6 = vpop.f32.mrb[35].mxu0 }
 0x145   : > { %v1702_v55 = vadd.f32 %v2658_v2, %v4020_v48  ;;  %v2661_v40 = vadd.f32 %v2660_v6, %v2659_v43 }
 0x147   : > { %v2726_v41 = vpop.f32.mrb[36].mxu1  ;;  %v1705_v34 = vadd.f32 %v2661_v40, %v4022_v59  ;;  %v4068_v0 = vadd.f32 %v2722_v31, %v1702_v55 }
 0x148   : > { %v2727_v3 = vpop.f32.mrb[37].mxu1 }
 0x149   : > { %v2728_v22 = vadd.f32 %v2727_v3, %v2726_v41  ;;  %v2729_v4 = vpop.f32.mrb[38].mxu1  ;;  %v2662_v45 = vpop.f32.mrb[36].mxu0  ;;  %v4070_v18 = vadd.f32 %v2725_v56, %v1705_v34 }
 0x14a   : > { %v2730_v9 = vpop.f32.mrb[39].mxu1  ;;  %v2663_v19 = vpop.f32.mrb[37].mxu0 }
 0x14b   : > { %v2731_v25 = vadd.f32 %v2730_v9, %v2729_v4  ;;  %v2664_v28 = vadd.f32 %v2663_v19, %v2662_v45  ;;  %v2665_v29 = vpop.f32.mrb[38].mxu0 }
 0x14c   : > { %v2666_v14 = vpop.f32.mrb[39].mxu0 }
 0x14d   : > { %v1710_v48 = vadd.f32 %v2664_v28, %v4026_v54  ;;  %v2667_v26 = vadd.f32 %v2666_v14, %v2665_v29 }
 0x14f   : > { %v2732_v27 = vpop.f32.mrb[40].mxu1  ;;  %v1713_v59 = vadd.f32 %v2667_v26, %v4028_v16  ;;  %v4074_v38 = vadd.f32 %v2728_v22, %v1710_v48 }
 0x150   : > { %v2733_v57 = vpop.f32.mrb[41].mxu1 }
 0x151   : > { %v2734_v33 = vadd.f32 %v2733_v57, %v2732_v27  ;;  %v2735_v63 = vpop.f32.mrb[42].mxu1  ;;  %v2668_v58 = vpop.f32.mrb[40].mxu0  ;;  %v4076_v51 = vadd.f32 %v2731_v25, %v1713_v59 }
 0x152   : > { %v2736_v30 = vpop.f32.mrb[43].mxu1  ;;  %v2669_v47 = vpop.f32.mrb[41].mxu0 }
 0x153   : > { %v2737_v39 = vadd.f32 %v2736_v30, %v2735_v63  ;;  %v2670_v7 = vadd.f32 %v2669_v47, %v2668_v58  ;;  %v2671_v36 = vpop.f32.mrb[42].mxu0 }
 0x154   : > { %v2672_v44 = vpop.f32.mrb[43].mxu0 }
 0x155   : > { %v1718_v54 = vadd.f32 %v2670_v7, %v4032_v35  ;;  %v2673_v10 = vadd.f32 %v2672_v44, %v2671_v36 }
 0x157   : > { %v2738_v42 = vpop.f32.mrb[44].mxu1  ;;  %v1721_v16 = vadd.f32 %v2673_v10, %v4034_v20  ;;  %v4080_v8 = vadd.f32 %v2734_v33, %v1718_v54 }
 0x158   : > { %v2739_v61 = vpop.f32.mrb[45].mxu1 }
 0x159   : > { %v2740_v15 = vadd.f32 %v2739_v61, %v2738_v42  ;;  %v2741_v53 = vpop.f32.mrb[46].mxu1  ;;  %v2674_v5 = vpop.f32.mrb[44].mxu0  ;;  %v4082_v31 = vadd.f32 %v2737_v39, %v1721_v16 }
 0x15a   : > { %v2742_v13 = vpop.f32.mrb[47].mxu1  ;;  %v2675_v62 = vpop.f32.mrb[45].mxu0 }
 0x15b   : > { %v2743_v37 = vadd.f32 %v2742_v13, %v2741_v53  ;;  %v2676_v50 = vadd.f32 %v2675_v62, %v2674_v5  ;;  %v2677_v24 = vpop.f32.mrb[46].mxu0 }
 0x15c   : > { %v2678_v56 = vpop.f32.mrb[47].mxu0 }
 0x15d   : > { %v1726_v35 = vadd.f32 %v2676_v50, %v4038_v49  ;;  %v2679_v12 = vadd.f32 %v2678_v56, %v2677_v24 }
 0x15f   : > { %v2744_v2 = vpop.f32.mrb[48].mxu1  ;;  %v1729_v20 = vadd.f32 %v2679_v12, %v4040_v1  ;;  %v4086_v40 = vadd.f32 %v2740_v15, %v1726_v35 }
 0x160   : > { %v2745_v43 = vpop.f32.mrb[49].mxu1 }
 0x161   : > { %v2746_v6 = vadd.f32 %v2745_v43, %v2744_v2  ;;  %v2747_v55 = vpop.f32.mrb[50].mxu1  ;;  %v2680_v3 = vpop.f32.mrb[48].mxu0  ;;  %v4088_v22 = vadd.f32 %v2743_v37, %v1729_v20 }
 0x162   : > { %v2748_v41 = vpop.f32.mrb[51].mxu1  ;;  %v2681_v4 = vpop.f32.mrb[49].mxu0 }
 0x163   : > { %v2749_v34 = vadd.f32 %v2748_v41, %v2747_v55  ;;  %v2682_v9 = vadd.f32 %v2681_v4, %v2680_v3  ;;  %v2683_v45 = vpop.f32.mrb[50].mxu0 }
 0x164   : > { %v2684_v25 = vpop.f32.mrb[51].mxu0 }
 0x165   : > { %v1734_v49 = vadd.f32 %v2682_v9, %v4044_v60  ;;  %v2685_v19 = vadd.f32 %v2684_v25, %v2683_v45 }
 0x167   : > { %v2750_v28 = vpop.f32.mrb[52].mxu1  ;;  %v1737_v1 = vadd.f32 %v2685_v19, %v4046_v52  ;;  %v1831_v26 = vadd.f32 %v2746_v6, %v1734_v49 }
 0x168   : > { %v2751_v29 = vpop.f32.mrb[53].mxu1 }
 0x169   : > { %v2752_v14 = vadd.f32 %v2751_v29, %v2750_v28  ;;  %v2753_v48 = vpop.f32.mrb[54].mxu1  ;;  %v2686_v57 = vpop.f32.mrb[52].mxu0  ;;  %v1834_v33 = vadd.f32 %v2749_v34, %v1737_v1 }
 0x16a   : > { %v2754_v27 = vpop.f32.mrb[55].mxu1  ;;  %v2687_v63 = vpop.f32.mrb[53].mxu0 }
 0x16b   : > { %v2755_v59 = vadd.f32 %v2754_v27, %v2753_v48  ;;  %v2688_v30 = vadd.f32 %v2687_v63, %v2686_v57  ;;  %v2689_v58 = vpop.f32.mrb[54].mxu0 }
 0x16c   : > { %v2690_v39 = vpop.f32.mrb[55].mxu0 }
 0x16d   : > { %v1742_v47 = vadd.f32 %v2688_v30, %v4050_v17  ;;  %v2691_v60 = vadd.f32 %v2690_v39, %v2689_v58 }
 0x16f   : > { %v2756_v7 = vpop.f32.mrb[56].mxu1  ;;  %v1745_v52 = vadd.f32 %v2691_v60, %v4052_v11  ;;  %v1839_v10 = vadd.f32 %v2752_v14, %v1742_v47 }
 0x170   : > { %v2757_v36 = vpop.f32.mrb[57].mxu1 }
 0x171   : > { %v2758_v44 = vadd.f32 %v2757_v36, %v2756_v7  ;;  %v2759_v54 = vpop.f32.mrb[58].mxu1  ;;  %v2692_v61 = vpop.f32.mrb[56].mxu0  ;;  %v1842_v15 = vadd.f32 %v2755_v59, %v1745_v52 }
 0x172   : > { %v2760_v42 = vpop.f32.mrb[59].mxu1  ;;  %v2693_v53 = vpop.f32.mrb[57].mxu0 }
 0x173   : > { %v2761_v16 = vadd.f32 %v2760_v42, %v2759_v54  ;;  %v2694_v13 = vadd.f32 %v2693_v53, %v2692_v61  ;;  %v2695_v5 = vpop.f32.mrb[58].mxu0 }
 0x174   : > { %v2696_v37 = vpop.f32.mrb[59].mxu0 }
 0x175   : > { %v1750_v17 = vadd.f32 %v2694_v13, %v4056_v46  ;;  %v2697_v62 = vadd.f32 %v2696_v37, %v2695_v5 }
 0x177   : > { %v2762_v50 = vpop.f32.mrb[60].mxu1  ;;  %v1753_v11 = vadd.f32 %v2697_v62, %v4058_v21  ;;  %v1847_v12 = vadd.f32 %v2758_v44, %v1750_v17 }
 0x178   : > { %v2763_v24 = vpop.f32.mrb[61].mxu1 }
 0x179   : > { %v2764_v56 = vadd.f32 %v2763_v24, %v2762_v50  ;;  %v2765_v35 = vpop.f32.mrb[62].mxu1  ;;  %v2698_v43 = vpop.f32.mrb[60].mxu0  ;;  %v1850_v6 = vadd.f32 %v2761_v16, %v1753_v11 }
 0x17a   : > { %v2766_v2 = vpop.f32.mrb[63].mxu1  ;;  %v2699_v55 = vpop.f32.mrb[61].mxu0 }
 0x17b   : > { %v2767_v20 = vadd.f32 %v2766_v2, %v2765_v35  ;;  %v2700_v41 = vadd.f32 %v2699_v55, %v2698_v43  ;;  %v2701_v3 = vpop.f32.mrb[62].mxu0 }
 0x17c   : > { %v2702_v34 = vpop.f32.mrb[63].mxu0 }
 0x17d   : > { %v1758_v46 = vadd.f32 %v2700_v41, %v4062_v32  ;;  %v2703_v4 = vadd.f32 %v2702_v34, %v2701_v3 }
 0x17f   : > { %v2810_v9 = vpop.f32.mrb[64].mxu1  ;;  %v1761_v25 = vadd.f32 %v2703_v4, %v4064_v23  ;;  %v1855_v28 = vadd.f32 %v2764_v56, %v1758_v46 }
 0x180   : > { %v4100_v45 = vadd.f32 %v2810_v9, %v1839_v10  ;;  %v1927_v21 = vpop.f32.mrb[65].mxu1 }
 0x181   : > { %v4103_v49 = vadd.f32 %v1927_v21, %v1831_v26  ;;  %v2811_v19 = vpop.f32.mrb[66].mxu1  ;;  %v2802_v14 = vpop.f32.mrb[64].mxu0  ;;  %v1858_v48 = vadd.f32 %v2767_v20, %v1761_v25 }
 0x182   : > { %v4105_v29 = vadd.f32 %v2811_v19, %v1842_v15  ;;  %v1930_v1 = vpop.f32.mrb[67].mxu1  ;;  %v1904_v23 = vadd.f32 %v2802_v14, %v4074_v38  ;;  %v1895_v26 = vpop.f32.mrb[65].mxu0  ;;  %v2069_v14 = vmul.f32 %v4100_v45, %v4100_v45 }
 0x183   : > { %v4112_v32 = vadd.f32 %v1930_v1, %v1834_v33  ;;  %v1896_v57 = vadd.f32 %v1895_v26, %v4068_v0  ;;  %v2803_v59 = vpop.f32.mrb[66].mxu0  ;;  %v2067_v21 = vmul.f32 %v4103_v49, %v4103_v49 }
 0x184   : > { %v2489_v27 = vpack.c.bf16 %v4105_v29, %v4100_v45  ;;  %v1907_v30 = vadd.f32 %v2803_v59, %v4076_v51  ;;  %v1898_v58 = vpop.f32.mrb[67].mxu0  ;;  %v2061_v42 = vmul.f32 %v1904_v23, %v1904_v23  ;;  %v2070_v26 = vmul.f32 %v4105_v29, %v4105_v29 }
 0x185   : > { %v2484_v63 = vpack.c.bf16 %v4112_v32, %v4103_v49  ;;  %v1899_v33 = vadd.f32 %v1898_v58, %v4070_v18  ;;  %v2059_v39 = vmul.f32 %v1896_v57, %v1896_v57  ;;  %v2068_v19 = vmul.f32 %v4112_v32, %v4112_v32 }
 0x186   : > { %2509 = vst [vmem:[%s4110_s10 + $0x28] sm:$0xff] %v2489_v27   ;;  %v2469_v47 = vpack.c.bf16 %v1907_v30, %v1904_v23  ;;  %v2062_v53 = vmul.f32 %v1907_v30, %v1907_v30 }
 0x187   : > { %2508 = vst [vmem:[%s4110_s10 + $0x20] sm:$0xff] %v2484_v63   ;;  %v2814_v38 = vpop.f32.mrb[68].mxu1  ;;  %v2464_v0 = vpack.c.bf16 %v1899_v33, %v1896_v57  ;;  %v2038_v36 = vadd.f32 %v1899_v33, %v1896_v57  ;;  %v2060_v52 = vmul.f32 %v1899_v33, %v1899_v33 }
 0x188   : > { %v4124_v60 = vadd.f32 %v2814_v38, %v1855_v28  ;;  %v1943_v7 = vpop.f32.mrb[69].mxu1  ;;  %2505 = vst [vmem:[%s4110_s10 + $0x8] sm:$0xff] %v2469_v47  }
 0x189   : > { %v1944_v44 = vadd.f32 %v1943_v7, %v1847_v12  ;;  %v2815_v54 = vpop.f32.mrb[70].mxu1  ;;  %2465 = vst [vmem:[%s4110_s10] sm:$0xff] %v2464_v0   ;;  %v2039_v18 = vadd.f32 %v2038_v36, %v1904_v23  ;;  %v2075_v61 = vadd.f32 %v2060_v52, %v2059_v39  ;;  %v2806_v16 = vpop.f32.mrb[68].mxu0 }
 0x18a   : > { %v1955_v10 = vadd.f32 %v2815_v54, %v1858_v48  ;;  %v1946_v51 = vpop.f32.mrb[71].mxu1  ;;  %v1920_v13 = vadd.f32 %v2806_v16, %v4086_v40  ;;  %v1911_v5 = vpop.f32.mrb[69].mxu0 }
 0x18b   : > { %v1947_v15 = vadd.f32 %v1946_v51, %v1850_v6  ;;  %v2076_v17 = vadd.f32 %v2075_v61, %v2061_v42  ;;  %v1912_v62 = vadd.f32 %v1911_v5, %v4080_v8  ;;  %v2040_v50 = vadd.f32 %v2039_v18, %v1907_v30  ;;  %v2807_v24 = vpop.f32.mrb[70].mxu0 }
 0x18c   : > { %v2499_v37 = vpack.c.bf16 %v1955_v10, %v4124_v60  ;;  %v1923_v56 = vadd.f32 %v2807_v24, %v4088_v22  ;;  %v1914_v35 = vpop.f32.mrb[71].mxu0  ;;  %v2065_v3 = vmul.f32 %v1920_v13, %v1920_v13  ;;  %v2074_v39 = vmul.f32 %v1955_v10, %v1955_v10 }
 0x18d   : > { %v2494_v11 = vpack.c.bf16 %v1947_v15, %v1944_v44  ;;  %v2041_v12 = vadd.f32 %v2040_v50, %v1912_v62  ;;  %v2063_v2 = vmul.f32 %v1912_v62, %v1912_v62  ;;  %v2077_v43 = vadd.f32 %v2076_v17, %v2062_v53 }
 0x18e   : > { %2511 = vst [vmem:[%s4110_s10 + $0x38] sm:$0xff] %v2499_v37   ;;  %v1915_v40 = vadd.f32 %v1914_v35, %v4082_v31  ;;  %v2479_v20 = vpack.c.bf16 %v1923_v56, %v1920_v13  ;;  %v2066_v4 = vmul.f32 %v1923_v56, %v1923_v56  ;;  %v2072_v58 = vmul.f32 %v1947_v15, %v1947_v15 }
 0x18f   : > { %2510 = vst [vmem:[%s4110_s10 + $0x30] sm:$0xff] %v2494_v11   ;;  %v2078_v6 = vadd.f32 %v2077_v43, %v2063_v2 }
 0x190   : > { %v2474_v55 = vpack.c.bf16 %v1915_v40, %v1912_v62  ;;  %v2042_v41 = vadd.f32 %v2041_v12, %v1915_v40  ;;  %v2064_v8 = vmul.f32 %v1915_v40, %v1915_v40  ;;  %2507 = vst [vmem:[%s4110_s10 + $0x18] sm:$0xff] %v2479_v20  }
 0x192   : > { %2506 = vst [vmem:[%s4110_s10 + $0x10] sm:$0xff] %v2474_v55   ;;  %v2043_v34 = vadd.f32 %v2042_v41, %v1920_v13  ;;  %v2079_v46 = vadd.f32 %v2078_v6, %v2064_v8 }
 0x194   : > { %v2044_v22 = vadd.f32 %v2043_v34, %v1923_v56  ;;  %v2080_v9 = vadd.f32 %v2079_v46, %v2065_v3 }
 0x196   : > { %v2045_v25 = vadd.f32 %v2044_v22, %v4103_v49  ;;  %v2081_v31 = vadd.f32 %v2080_v9, %v2066_v4  ;;  %v2071_v49 = vmul.f32 %v1944_v44, %v1944_v44 }
 0x198   : > { %v2082_v28 = vadd.f32 %v2081_v31, %v2067_v21  ;;  %v2046_v1 = vadd.f32 %v2045_v25, %v4112_v32  ;;  %v2073_v32 = vmul.f32 %v4124_v60, %v4124_v60 }
 0x19a   : > { %v2047_v48 = vadd.f32 %v2046_v1, %v4100_v45  ;;  %v2083_v23 = vadd.f32 %v2082_v28, %v2068_v19 }
 0x19c   : > { %v2048_v27 = vadd.f32 %v2047_v48, %v4105_v29  ;;  %v2084_v57 = vadd.f32 %v2083_v23, %v2069_v14 }
 0x19e   : > { %v2049_v59 = vadd.f32 %v2048_v27, %v1944_v44  ;;  %v2085_v63 = vadd.f32 %v2084_v57, %v2070_v26 }
 0x1a0   : > { %v2050_v30 = vadd.f32 %v2049_v59, %v1947_v15  ;;  %v2086_v33 = vadd.f32 %v2085_v63, %v2071_v49 }
 0x1a2   : > { %v2051_v45 = vadd.f32 %v2050_v30, %v4124_v60  ;;  %v2087_v38 = vadd.f32 %v2086_v33, %v2072_v58 }
 0x1a4   : > { %v2052_v47 = vadd.f32 %v2051_v45, %v1955_v10  ;;  %v2088_v7 = vadd.f32 %v2087_v38, %v2073_v32 }
 0x1a6   : > { %v2053_v0 = vrot.slane %v2052_v47, 4  ;;  %v2089_v29 = vadd.f32 %v2088_v7, %v2074_v39 }
 0x1a8   : > { %v2054_v36 = vadd.f32 %v2053_v0, %v2052_v47  ;;  %v2090_v52 = vrot.slane %v2089_v29, 4 }
 0x1aa   : > { %v2055_v44 = vrot.slane %v2054_v36, 2  ;;  %v2091_v54 = vadd.f32 %v2090_v52, %v2089_v29 }
 0x1ac   : > { %v2056_v51 = vadd.f32 %v2055_v44, %v2054_v36  ;;  %v2092_v42 = vrot.slane %v2091_v54, 2 }
 0x1ae   : > { %v2057_v18 = vrot.slane %v2056_v51, 1  ;;  %v2093_v61 = vadd.f32 %v2092_v42, %v2091_v54 }
 0x1b0   : > { %v2094_v16 = vrot.slane %v2093_v61, 1  ;;  %v2058_v60 = vadd.f32 %v2057_v18, %v2056_v51 }
 0x1b2   : > { %v2095_v15 = vadd.f32 %v2094_v16, %v2093_v61 }
 0x1b4   : > { %v2097_v10 = vsel %vm2096_vm13, %v2058_v60, %v2095_v15 }
 0x1b5   : > { %v2099_v53 = vsel %vm2098_vm7, %v2097_v10, 0.0 }
 0x1b6   : > { %2100 = vst [vmem:[%s311_s17] sm:$0xff] %v2099_v53 }
 0x1b7 PF: > { %s17_s25 = sadd.s32 1, %s2984_s25   ;;  %s4276_s21 = smov %s2976_s23 }
 0x1b8   : > { %p14_p8 = scmp.ge.s32.totalorder %s17_s25, 6   ;;  %s4277_s22 = smov %s2980_s24 }
 0x1b9   : > { %s4278_s23 = smov %s4281_s26  ;;  %s4279_s24 = smov %s4285_s27 }
 0x1ba   :  { %16 = sbr.rel (!%p14_p8) target bundleno = 3 (0x3), region = 82 }

</bundles_post_ra>
